<compile_context>
chip_gen: v7x
topology: tpu7x:2x2x1
jax: 0.10.0
libtpu: 0.0.40
codegen_flags: <defaults>
</compile_context>

<pallas_src>
import jax
import jax.numpy as jnp
from jax.experimental import pallas as pl
from jax.experimental.pallas import tpu as pltpu


MM_DTYPE = jnp.bfloat16     # matmul-operand / inter-layer activation dtype
_LANE = 128                 # lane width
_VMEM_SPEC = pl.BlockSpec(memory_space=pltpu.MemorySpace.VMEM)


def _round_up(x, m):
    return ((x + m - 1) // m) * m


def _batch_pack(dtype):
    # Sublane packing of the per-step (Bp, Hp) tiles: f32 vreg is (8,128),
    # bf16 packs (16,128) — pad batch so bf16 stores are full-tile.
    return 16 if dtype == jnp.bfloat16 else 8


def _sigmoid_fast(x):
    # sigmoid(x) = 1 / (1 + exp(-x)); exp on the EUP, approx reciprocal on
    # the EUP slot instead of a VALU-path divide.
    return pl.reciprocal(1.0 + jnp.exp(-x), approx=True)


# ----------------------------------------------------------------------------
# Fused kernel: all LSTM layers + output Linear in one pallas_call.
# ----------------------------------------------------------------------------
def _make_fused_kernel(num_layers, seq_len, b_pad, h_pad, mm_dtype):
    def kernel(*refs):
        x_ref = refs[0]                                   # (T*Bp, Din_pad) mm_dtype
        layer_refs = refs[1:1 + 3 * num_layers]
        wout_ref = refs[1 + 3 * num_layers]               # (Hp, Op) mm_dtype
        bout_ref = refs[2 + 3 * num_layers]               # (1, Op)  f32
        o_ref = refs[3 + 3 * num_layers]                  # (Bp, Op) f32
        gx_sc, seq_sc = refs[4 + 3 * num_layers:]

        cur_in = x_ref                                    # time-major rows
        h = None
        for layer in range(num_layers):
            wih_ref = layer_refs[3 * layer + 0]           # (Din_pad, 4*Hp) mm_dtype
            whh_ref = layer_refs[3 * layer + 1]           # (Hp,      4*Hp) mm_dtype
            b_ref = layer_refs[3 * layer + 2]             # (1,       4*Hp) f32

            # Hoisted input projection (+ fused bias) for the whole sequence:
            # one big MXU matmul instead of T tiny ones inside the recurrence.
            gx_sc[...] = (
                jnp.dot(cur_in[...], wih_ref[...],
                        preferred_element_type=jnp.float32)
                + b_ref[...]
            )

            # Loop-carried vreg state (no per-step VMEM round trip).
            h = jnp.zeros((b_pad, h_pad), jnp.float32)
            c = jnp.zeros((b_pad, h_pad), jnp.float32)
            write_seq = layer < num_layers - 1            # last layer: only h_T needed

            # Fully unrolled short static time loop: only h @ W_hh remains on
            # the serial critical path of each step.
            for t in range(seq_len):
                rows = pl.ds(t * b_pad, b_pad)
                gates = gx_sc[rows, :] + jnp.dot(
                    h.astype(mm_dtype), whh_ref[...],
                    preferred_element_type=jnp.float32)   # (Bp, 4*Hp) f32
                # Lane-aligned gate blocks (each gate padded to h_pad lanes);
                # PyTorch gate order [i, f, g, o].
                i_g = _sigmoid_fast(gates[:, 0 * h_pad:1 * h_pad])
                f_g = _sigmoid_fast(gates[:, 1 * h_pad:2 * h_pad])
                g_g = jnp.tanh(gates[:, 2 * h_pad:3 * h_pad])
                o_g = _sigmoid_fast(gates[:, 3 * h_pad:4 * h_pad])
                c = f_g * c + i_g * g_g
                h = o_g * jnp.tanh(c)
                if write_seq:
                    seq_sc[rows, :] = h.astype(mm_dtype)  # bf16: full-tile store

            cur_in = seq_sc                               # next layer's input sequence

        # Output head on the final hidden state (last timestep, last layer).
        o_ref[...] = (
            jnp.dot(h.astype(mm_dtype), wout_ref[...],
                    preferred_element_type=jnp.float32)
            + bout_ref[...]
        )

    return kernel


# ----------------------------------------------------------------------------
# Public forward (batch-first input, like the PyTorch module)
# ----------------------------------------------------------------------------
@jax.jit
def lstms_forward(x, layer_params, wout_p, bout_p):
    """x: (B, T, input_dim). Returns (B, 1, 1), matching LSTMs.forward."""
    B, T, d_in = x.shape
    num_layers = len(layer_params)
    d_pad = layer_params[0][0].shape[0]       # padded layer-0 input width
    h_pad = layer_params[0][1].shape[0]       # padded hidden width
    o_pad = wout_p.shape[1]                   # padded output width
    pack = _batch_pack(MM_DTYPE)
    b_pad = _round_up(max(B, pack), pack)

    # batch-first -> time-major, pad batch & feature dims with zeros, flatten
    # (T, Bp) into sublane-aligned rows, pre-cast to the matmul dtype.
    x_tm = jnp.transpose(x.astype(jnp.float32), (1, 0, 2))           # (T, B, Din)
    x_tm = jnp.pad(x_tm, ((0, 0), (0, b_pad - B), (0, d_pad - d_in)))
    x2d = x_tm.reshape(T * b_pad, d_pad).astype(MM_DTYPE)

    flat_weights = [w for lp in layer_params for w in lp]

    # Advisory cost estimate for the XLA scheduler.
    flops = 2 * b_pad * h_pad * o_pad
    for (wih_p, whh_p, _b) in layer_params:
        flops += 2 * (T * b_pad) * wih_p.shape[0] * (4 * h_pad)      # x @ Wih
        flops += 2 * T * b_pad * h_pad * (4 * h_pad)                 # h @ Whh
    transcendentals = num_layers * T * b_pad * 6 * h_pad             # exp/recip/tanh
    bytes_accessed = int(
        x2d.size * x2d.dtype.itemsize
        + sum(w.size * w.dtype.itemsize for w in flat_weights)
        + wout_p.size * wout_p.dtype.itemsize
        + bout_p.size * bout_p.dtype.itemsize
        + b_pad * o_pad * 4)

    kernel = _make_fused_kernel(num_layers, T, b_pad, h_pad, MM_DTYPE)
    y = pl.pallas_call(
        kernel,
        out_shape=jax.ShapeDtypeStruct((b_pad, o_pad), jnp.float32),
        in_specs=[_VMEM_SPEC] * (1 + 3 * num_layers + 2),
        out_specs=_VMEM_SPEC,
        scratch_shapes=[
            pltpu.VMEM((T * b_pad, 4 * h_pad), jnp.float32),    # hoisted x@Wih + b
            pltpu.VMEM((T * b_pad, h_pad), MM_DTYPE),           # inter-layer sequence
        ],
        compiler_params=pltpu.CompilerParams(
            vmem_limit_bytes=32 * 1024 * 1024),
        cost_estimate=pl.CostEstimate(
            flops=flops, transcendentals=transcendentals,
            bytes_accessed=bytes_accessed),
    )(x2d, *flat_weights, wout_p, bout_p)

    return y[:B, :1].reshape(B, 1, 1)


# ----------------------------------------------------------------------------
# Parameter init (PyTorch-style) and kernel-ready preparation
# ----------------------------------------------------------------------------
def init_params(key, input_dim, hidden_dim, num_layers):
    """Raw PyTorch-layout params: per layer (w_ih(4H,Din), w_hh(4H,H), b_ih, b_hh)."""
    H = hidden_dim
    bound = 1.0 / (H ** 0.5)
    raw_layers = []
    for layer in range(num_layers):
        d_in = input_dim if layer == 0 else H
        key, k1, k2, k3, k4 = jax.random.split(key, 5)
        w_ih = jax.random.uniform(k1, (4 * H, d_in), jnp.float32, -bound, bound)
        w_hh = jax.random.uniform(k2, (4 * H, H), jnp.float32, -bound, bound)
        b_ih = jax.random.uniform(k3, (4 * H,), jnp.float32, -bound, bound)
        b_hh = jax.random.uniform(k4, (4 * H,), jnp.float32, -bound, bound)
        raw_layers.append((w_ih, w_hh, b_ih, b_hh))
    key, k5, k6 = jax.random.split(key, 3)
    w_out = jax.random.uniform(k5, (1, H), jnp.float32, -bound, bound)
    b_out = jax.random.uniform(k6, (1,), jnp.float32, -bound, bound)
    return tuple(raw_layers), w_out, b_out


def prepare_params(raw_layers, w_out, b_out, mm_dtype=MM_DTYPE):
    """Pad / transpose / cast params for the fused kernel.

    Each gate block is padded from H to Hp=round_up(H,128) lanes, the hidden
    width to Hp, and the layer-0 input width to a multiple of 128.  Zero
    padding guarantees padded lanes of h/c remain exactly 0.
    """
    H = raw_layers[0][1].shape[1]
    h_pad = _round_up(H, _LANE)
    prepared = []
    for (w_ih, w_hh, b_ih, b_hh) in raw_layers:
        d_in = w_ih.shape[1]
        d_pad = _round_up(d_in, _LANE)
        wih_p = jnp.zeros((d_pad, 4 * h_pad), jnp.float32)
        whh_p = jnp.zeros((h_pad, 4 * h_pad), jnp.float32)
        bias_p = jnp.zeros((1, 4 * h_pad), jnp.float32)
        b_sum = b_ih + b_hh
        for g in range(4):
            rows = slice(g * H, (g + 1) * H)
            cols = slice(g * h_pad, g * h_pad + H)
            wih_p = wih_p.at[:d_in, cols].set(w_ih[rows, :].T)
            whh_p = whh_p.at[:H, cols].set(w_hh[rows, :].T)
            bias_p = bias_p.at[0, cols].set(b_sum[rows])
        prepared.append((wih_p.astype(mm_dtype), whh_p.astype(mm_dtype), bias_p))
    o_pad = _LANE  # lane-dense output slab; real output lives in column 0
    wout_p = jnp.zeros((h_pad, o_pad), jnp.float32).at[:H, 0].set(w_out[0, :])
    bout_p = jnp.zeros((1, o_pad), jnp.float32).at[0, 0].set(b_out[0])
    return tuple(prepared), wout_p.astype(mm_dtype), bout_p


# ----------------------------------------------------------------------------
# Pure-JAX reference (same math; matmul dtype configurable)
# ----------------------------------------------------------------------------
def reference_forward(x, raw_layers, w_out, b_out, mm_dtype=jnp.float32):
    B, T, _ = x.shape
    layer_in = x.astype(jnp.float32)
    for (w_ih, w_hh, b_ih, b_hh) in raw_layers:
        H = w_hh.shape[1]
        wih_t = w_ih.T.astype(mm_dtype)
        whh_t = w_hh.T.astype(mm_dtype)
        bias = (b_ih + b_hh)[None, :]
        h = jnp.zeros((B, H), jnp.float32)
        c = jnp.zeros((B, H), jnp.float32)
        outs = []
        for t in range(T):
            gates = (
                jnp.dot(layer_in[:, t, :].astype(mm_dtype), wih_t,
                        preferred_element_type=jnp.float32)
                + jnp.dot(h.astype(mm_dtype), whh_t,
                          preferred_element_type=jnp.float32)
                + bias)
            i_g = jax.nn.sigmoid(gates[:, 0:H])
            f_g = jax.nn.sigmoid(gates[:, H:2 * H])
            g_g = jnp.tanh(gates[:, 2 * H:3 * H])
            o_g = jax.nn.sigmoid(gates[:, 3 * H:4 * H])
            c = f_g * c + i_g * g_g
            h = o_g * jnp.tanh(c)
            outs.append(h)
        layer_in = jnp.stack(outs, axis=1)
    y = (jnp.dot(layer_in[:, -1, :].astype(mm_dtype), w_out.T.astype(mm_dtype),
                 preferred_element_type=jnp.float32) + b_out[None, :])
    return y.reshape(B, 1, 1)


if __name__ == "__main__":
    # Small shapes consistent with the module: batch=2, seq=8, input_dim=16,
    # hidden_dim=32, num_layers=2 (dropout inactive at inference).
    B, T, INPUT_DIM, HIDDEN_DIM, NUM_LAYERS = 2, 8, 16, 32, 2

    key = jax.random.PRNGKey(0)
    key, xkey, pkey = jax.random.split(key, 3)
    x = jax.random.normal(xkey, (B, T, INPUT_DIM), dtype=jnp.float32)

    raw_layers, w_out, b_out = init_params(pkey, INPUT_DIM, HIDDEN_DIM, NUM_LAYERS)
    layer_params, wout_p, bout_p = prepare_params(raw_layers, w_out, b_out)

    y = lstms_forward(x, layer_params, wout_p, bout_p)
    y = jax.block_until_ready(y)
    assert y.shape == (B, 1, 1)

    # Check vs. a reference that uses the same matmul dtype / f32 state
    # (kernel additionally uses the EUP approx reciprocal in its sigmoids).
    y_match = reference_forward(x, raw_layers, w_out, b_out, mm_dtype=MM_DTYPE)
    assert jnp.allclose(y, y_match, atol=1e-2, rtol=1e-2), (y, y_match)

    # Semantics check vs. the full-f32 PyTorch-equivalent math.
    y_f32 = reference_forward(x, raw_layers, w_out, b_out, mm_dtype=jnp.float32)
    assert jnp.allclose(y, y_f32, atol=5e-2, rtol=5e-2), (y, y_f32)

    print("KERNEL_OK")
</pallas_src>

<mosaic_0001>
module attributes {stable_mosaic.version = 11 : i64} {
  func.func @kernel(%arg0: memref<128x128xbf16, #tpu.memory_space<vmem>>, %arg1: memref<128x512xbf16, #tpu.memory_space<vmem>>, %arg2: memref<128x512xbf16, #tpu.memory_space<vmem>>, %arg3: memref<1x512xf32, #tpu.memory_space<vmem>>, %arg4: memref<128x512xbf16, #tpu.memory_space<vmem>>, %arg5: memref<128x512xbf16, #tpu.memory_space<vmem>>, %arg6: memref<1x512xf32, #tpu.memory_space<vmem>>, %arg7: memref<128x128xbf16, #tpu.memory_space<vmem>>, %arg8: memref<1x128xf32, #tpu.memory_space<vmem>>, %arg9: memref<16x128xf32, #tpu.memory_space<vmem>>, %arg10: memref<128x512xf32, #tpu.memory_space<vmem>>, %arg11: memref<128x128xbf16, #tpu.memory_space<vmem>>) attributes {dimension_semantics = [], scalar_prefetch = 0 : i64, scratch_operands = 2 : i64, tpu.core_type = #tpu.core_type<tc>} {
    %c0 = arith.constant 0 : index
    %c0_0 = arith.constant 0 : index
    %0 = vector.load %arg0[%c0, %c0_0] : memref<128x128xbf16, #tpu.memory_space<vmem>>, vector<128x128xbf16>
    %c0_1 = arith.constant 0 : index
    %c0_2 = arith.constant 0 : index
    %1 = vector.load %arg1[%c0_1, %c0_2] : memref<128x512xbf16, #tpu.memory_space<vmem>>, vector<128x512xbf16>
    %cst = arith.constant dense<0.000000e+00> : vector<128x512xf32>
    %2 = tpu.matmul %0, %1, %cst {dimension_numbers = #tpu.dot_dimension_numbers<[1], [0], [0], [1], [0, 0, 1, 1], [], []>} : vector<128x128xbf16>, vector<128x512xbf16>, vector<128x512xf32> -> vector<128x512xf32>
    %c0_3 = arith.constant 0 : index
    %c0_4 = arith.constant 0 : index
    %3 = vector.load %arg3[%c0_3, %c0_4] : memref<1x512xf32, #tpu.memory_space<vmem>>, vector<1x512xf32>
    %4 = vector.broadcast %3 : vector<1x512xf32> to vector<128x512xf32>
    %5 = arith.addf %2, %4 : vector<128x512xf32>
    %c0_5 = arith.constant 0 : index
    %c0_6 = arith.constant 0 : index
    %6 = vector.load %arg10[%c0_5, %c0_6] : memref<128x512xf32, #tpu.memory_space<vmem>>, vector<128x512xf32>
    tpu.vector_store %arg10[%c0_5, %c0_6], %5 {strides = array<i32>} : memref<128x512xf32, #tpu.memory_space<vmem>>, vector<128x512xf32>,
    %cst_7 = arith.constant 0.000000e+00 : f32
    %7 = vector.broadcast %cst_7 : f32 to vector<16x128xf32>
    %cst_8 = arith.constant 0.000000e+00 : f32
    %8 = vector.broadcast %cst_8 : f32 to vector<16x128xf32>
    %c0_9 = arith.constant 0 : index
    %c0_10 = arith.constant 0 : index
    %9 = vector.load %arg10[%c0_9, %c0_10] : memref<128x512xf32, #tpu.memory_space<vmem>>, vector<16x512xf32>
    %10 = arith.truncf %7 : vector<16x128xf32> to vector<16x128xbf16>
    %c0_11 = arith.constant 0 : index
    %c0_12 = arith.constant 0 : index
    %11 = vector.load %arg2[%c0_11, %c0_12] : memref<128x512xbf16, #tpu.memory_space<vmem>>, vector<128x512xbf16>
    %cst_13 = arith.constant dense<0.000000e+00> : vector<16x512xf32>
    %12 = tpu.matmul %10, %11, %cst_13 {dimension_numbers = #tpu.dot_dimension_numbers<[1], [0], [0], [1], [0, 0, 1, 1], [], []>} : vector<16x128xbf16>, vector<128x512xbf16>, vector<16x512xf32> -> vector<16x512xf32>
    %13 = arith.addf %9, %12 : vector<16x512xf32>
    %14 = vector.extract_strided_slice %13 {offsets = [0, 0], sizes = [16, 128], strides = [1, 1]} : vector<16x512xf32> to vector<16x128xf32>
    %cst_14 = arith.constant 0.000000e+00 : f32
    %15 = vector.broadcast %cst_14 : f32 to vector<16x128xf32>
    %16 = arith.subf %15, %14 : vector<16x128xf32>
    %17 = math.exp %16 : vector<16x128xf32>
    %cst_15 = arith.constant 1.000000e+00 : f32
    %18 = vector.broadcast %cst_15 : f32 to vector<16x128xf32>
    %19 = arith.addf %18, %17 : vector<16x128xf32>
    %20 = tpu.reciprocal %19 {approx = true} : vector<16x128xf32> -> vector<16x128xf32>
    %21 = vector.extract_strided_slice %13 {offsets = [0, 128], sizes = [16, 128], strides = [1, 1]} : vector<16x512xf32> to vector<16x128xf32>
    %cst_16 = arith.constant 0.000000e+00 : f32
    %22 = vector.broadcast %cst_16 : f32 to vector<16x128xf32>
    %23 = arith.subf %22, %21 : vector<16x128xf32>
    %24 = math.exp %23 : vector<16x128xf32>
    %cst_17 = arith.constant 1.000000e+00 : f32
    %25 = vector.broadcast %cst_17 : f32 to vector<16x128xf32>
    %26 = arith.addf %25, %24 : vector<16x128xf32>
    %27 = tpu.reciprocal %26 {approx = true} : vector<16x128xf32> -> vector<16x128xf32>
    %28 = vector.extract_strided_slice %13 {offsets = [0, 256], sizes = [16, 128], strides = [1, 1]} : vector<16x512xf32> to vector<16x128xf32>
    %29 = math.tanh %28 : vector<16x128xf32>
    %30 = vector.extract_strided_slice %13 {offsets = [0, 384], sizes = [16, 128], strides = [1, 1]} : vector<16x512xf32> to vector<16x128xf32>
    %cst_18 = arith.constant 0.000000e+00 : f32
    %31 = vector.broadcast %cst_18 : f32 to vector<16x128xf32>
    %32 = arith.subf %31, %30 : vector<16x128xf32>
    %33 = math.exp %32 : vector<16x128xf32>
    %cst_19 = arith.constant 1.000000e+00 : f32
    %34 = vector.broadcast %cst_19 : f32 to vector<16x128xf32>
    %35 = arith.addf %34, %33 : vector<16x128xf32>
    %36 = tpu.reciprocal %35 {approx = true} : vector<16x128xf32> -> vector<16x128xf32>
    %37 = arith.mulf %27, %8 : vector<16x128xf32>
    %38 = arith.mulf %20, %29 : vector<16x128xf32>
    %39 = arith.addf %37, %38 : vector<16x128xf32>
    %40 = math.tanh %39 : vector<16x128xf32>
    %41 = arith.mulf %36, %40 : vector<16x128xf32>
    %42 = arith.truncf %41 : vector<16x128xf32> to vector<16x128xbf16>
    %c0_20 = arith.constant 0 : index
    %c0_21 = arith.constant 0 : index
    %43 = vector.load %arg11[%c0_20, %c0_21] : memref<128x128xbf16, #tpu.memory_space<vmem>>, vector<16x128xbf16>
    tpu.vector_store %arg11[%c0_20, %c0_21], %42 {strides = array<i32>} : memref<128x128xbf16, #tpu.memory_space<vmem>>, vector<16x128xbf16>,
    %c16 = arith.constant 16 : index
    %c0_22 = arith.constant 0 : index
    %44 = vector.load %arg10[%c16, %c0_22] : memref<128x512xf32, #tpu.memory_space<vmem>>, vector<16x512xf32>
    %45 = arith.truncf %41 : vector<16x128xf32> to vector<16x128xbf16>
    %c0_23 = arith.constant 0 : index
    %c0_24 = arith.constant 0 : index
    %46 = vector.load %arg2[%c0_23, %c0_24] : memref<128x512xbf16, #tpu.memory_space<vmem>>, vector<128x512xbf16>
    %cst_25 = arith.constant dense<0.000000e+00> : vector<16x512xf32>
    %47 = tpu.matmul %45, %46, %cst_25 {dimension_numbers = #tpu.dot_dimension_numbers<[1], [0], [0], [1], [0, 0, 1, 1], [], []>} : vector<16x128xbf16>, vector<128x512xbf16>, vector<16x512xf32> -> vector<16x512xf32>
    %48 = arith.addf %44, %47 : vector<16x512xf32>
    %49 = vector.extract_strided_slice %48 {offsets = [0, 0], sizes = [16, 128], strides = [1, 1]} : vector<16x512xf32> to vector<16x128xf32>
    %cst_26 = arith.constant 0.000000e+00 : f32
    %50 = vector.broadcast %cst_26 : f32 to vector<16x128xf32>
    %51 = arith.subf %50, %49 : vector<16x128xf32>
    %52 = math.exp %51 : vector<16x128xf32>
    %cst_27 = arith.constant 1.000000e+00 : f32
    %53 = vector.broadcast %cst_27 : f32 to vector<16x128xf32>
    %54 = arith.addf %53, %52 : vector<16x128xf32>
    %55 = tpu.reciprocal %54 {approx = true} : vector<16x128xf32> -> vector<16x128xf32>
    %56 = vector.extract_strided_slice %48 {offsets = [0, 128], sizes = [16, 128], strides = [1, 1]} : vector<16x512xf32> to vector<16x128xf32>
    %cst_28 = arith.constant 0.000000e+00 : f32
    %57 = vector.broadcast %cst_28 : f32 to vector<16x128xf32>
    %58 = arith.subf %57, %56 : vector<16x128xf32>
    %59 = math.exp %58 : vector<16x128xf32>
    %cst_29 = arith.constant 1.000000e+00 : f32
    %60 = vector.broadcast %cst_29 : f32 to vector<16x128xf32>
    %61 = arith.addf %60, %59 : vector<16x128xf32>
    %62 = tpu.reciprocal %61 {approx = true} : vector<16x128xf32> -> vector<16x128xf32>
    %63 = vector.extract_strided_slice %48 {offsets = [0, 256], sizes = [16, 128], strides = [1, 1]} : vector<16x512xf32> to vector<16x128xf32>
    %64 = math.tanh %63 : vector<16x128xf32>
    %65 = vector.extract_strided_slice %48 {offsets = [0, 384], sizes = [16, 128], strides = [1, 1]} : vector<16x512xf32> to vector<16x128xf32>
    %cst_30 = arith.constant 0.000000e+00 : f32
    %66 = vector.broadcast %cst_30 : f32 to vector<16x128xf32>
    %67 = arith.subf %66, %65 : vector<16x128xf32>
    %68 = math.exp %67 : vector<16x128xf32>
    %cst_31 = arith.constant 1.000000e+00 : f32
    %69 = vector.broadcast %cst_31 : f32 to vector<16x128xf32>
    %70 = arith.addf %69, %68 : vector<16x128xf32>
    %71 = tpu.reciprocal %70 {approx = true} : vector<16x128xf32> -> vector<16x128xf32>
    %72 = arith.mulf %62, %39 : vector<16x128xf32>
    %73 = arith.mulf %55, %64 : vector<16x128xf32>
    %74 = arith.addf %72, %73 : vector<16x128xf32>
    %75 = math.tanh %74 : vector<16x128xf32>
    %76 = arith.mulf %71, %75 : vector<16x128xf32>
    %77 = arith.truncf %76 : vector<16x128xf32> to vector<16x128xbf16>
    %c16_32 = arith.constant 16 : index
    %c0_33 = arith.constant 0 : index
    %78 = vector.load %arg11[%c16_32, %c0_33] : memref<128x128xbf16, #tpu.memory_space<vmem>>, vector<16x128xbf16>
    tpu.vector_store %arg11[%c16_32, %c0_33], %77 {strides = array<i32>} : memref<128x128xbf16, #tpu.memory_space<vmem>>, vector<16x128xbf16>,
    %c32 = arith.constant 32 : index
    %c0_34 = arith.constant 0 : index
    %79 = vector.load %arg10[%c32, %c0_34] : memref<128x512xf32, #tpu.memory_space<vmem>>, vector<16x512xf32>
    %80 = arith.truncf %76 : vector<16x128xf32> to vector<16x128xbf16>
    %c0_35 = arith.constant 0 : index
    %c0_36 = arith.constant 0 : index
    %81 = vector.load %arg2[%c0_35, %c0_36] : memref<128x512xbf16, #tpu.memory_space<vmem>>, vector<128x512xbf16>
    %cst_37 = arith.constant dense<0.000000e+00> : vector<16x512xf32>
    %82 = tpu.matmul %80, %81, %cst_37 {dimension_numbers = #tpu.dot_dimension_numbers<[1], [0], [0], [1], [0, 0, 1, 1], [], []>} : vector<16x128xbf16>, vector<128x512xbf16>, vector<16x512xf32> -> vector<16x512xf32>
    %83 = arith.addf %79, %82 : vector<16x512xf32>
    %84 = vector.extract_strided_slice %83 {offsets = [0, 0], sizes = [16, 128], strides = [1, 1]} : vector<16x512xf32> to vector<16x128xf32>
    %cst_38 = arith.constant 0.000000e+00 : f32
    %85 = vector.broadcast %cst_38 : f32 to vector<16x128xf32>
    %86 = arith.subf %85, %84 : vector<16x128xf32>
    %87 = math.exp %86 : vector<16x128xf32>
    %cst_39 = arith.constant 1.000000e+00 : f32
    %88 = vector.broadcast %cst_39 : f32 to vector<16x128xf32>
    %89 = arith.addf %88, %87 : vector<16x128xf32>
    %90 = tpu.reciprocal %89 {approx = true} : vector<16x128xf32> -> vector<16x128xf32>
    %91 = vector.extract_strided_slice %83 {offsets = [0, 128], sizes = [16, 128], strides = [1, 1]} : vector<16x512xf32> to vector<16x128xf32>
    %cst_40 = arith.constant 0.000000e+00 : f32
    %92 = vector.broadcast %cst_40 : f32 to vector<16x128xf32>
    %93 = arith.subf %92, %91 : vector<16x128xf32>
    %94 = math.exp %93 : vector<16x128xf32>
    %cst_41 = arith.constant 1.000000e+00 : f32
    %95 = vector.broadcast %cst_41 : f32 to vector<16x128xf32>
    %96 = arith.addf %95, %94 : vector<16x128xf32>
    %97 = tpu.reciprocal %96 {approx = true} : vector<16x128xf32> -> vector<16x128xf32>
    %98 = vector.extract_strided_slice %83 {offsets = [0, 256], sizes = [16, 128], strides = [1, 1]} : vector<16x512xf32> to vector<16x128xf32>
    %99 = math.tanh %98 : vector<16x128xf32>
    %100 = vector.extract_strided_slice %83 {offsets = [0, 384], sizes = [16, 128], strides = [1, 1]} : vector<16x512xf32> to vector<16x128xf32>
    %cst_42 = arith.constant 0.000000e+00 : f32
    %101 = vector.broadcast %cst_42 : f32 to vector<16x128xf32>
    %102 = arith.subf %101, %100 : vector<16x128xf32>
    %103 = math.exp %102 : vector<16x128xf32>
    %cst_43 = arith.constant 1.000000e+00 : f32
    %104 = vector.broadcast %cst_43 : f32 to vector<16x128xf32>
    %105 = arith.addf %104, %103 : vector<16x128xf32>
    %106 = tpu.reciprocal %105 {approx = true} : vector<16x128xf32> -> vector<16x128xf32>
    %107 = arith.mulf %97, %74 : vector<16x128xf32>
    %108 = arith.mulf %90, %99 : vector<16x128xf32>
    %109 = arith.addf %107, %108 : vector<16x128xf32>
    %110 = math.tanh %109 : vector<16x128xf32>
    %111 = arith.mulf %106, %110 : vector<16x128xf32>
    %112 = arith.truncf %111 : vector<16x128xf32> to vector<16x128xbf16>
    %c32_44 = arith.constant 32 : index
    %c0_45 = arith.constant 0 : index
    %113 = vector.load %arg11[%c32_44, %c0_45] : memref<128x128xbf16, #tpu.memory_space<vmem>>, vector<16x128xbf16>
    tpu.vector_store %arg11[%c32_44, %c0_45], %112 {strides = array<i32>} : memref<128x128xbf16, #tpu.memory_space<vmem>>, vector<16x128xbf16>,
    %c48 = arith.constant 48 : index
    %c0_46 = arith.constant 0 : index
    %114 = vector.load %arg10[%c48, %c0_46] : memref<128x512xf32, #tpu.memory_space<vmem>>, vector<16x512xf32>
    %115 = arith.truncf %111 : vector<16x128xf32> to vector<16x128xbf16>
    %c0_47 = arith.constant 0 : index
    %c0_48 = arith.constant 0 : index
    %116 = vector.load %arg2[%c0_47, %c0_48] : memref<128x512xbf16, #tpu.memory_space<vmem>>, vector<128x512xbf16>
    %cst_49 = arith.constant dense<0.000000e+00> : vector<16x512xf32>
    %117 = tpu.matmul %115, %116, %cst_49 {dimension_numbers = #tpu.dot_dimension_numbers<[1], [0], [0], [1], [0, 0, 1, 1], [], []>} : vector<16x128xbf16>, vector<128x512xbf16>, vector<16x512xf32> -> vector<16x512xf32>
    %118 = arith.addf %114, %117 : vector<16x512xf32>
    %119 = vector.extract_strided_slice %118 {offsets = [0, 0], sizes = [16, 128], strides = [1, 1]} : vector<16x512xf32> to vector<16x128xf32>
    %cst_50 = arith.constant 0.000000e+00 : f32
    %120 = vector.broadcast %cst_50 : f32 to vector<16x128xf32>
    %121 = arith.subf %120, %119 : vector<16x128xf32>
    %122 = math.exp %121 : vector<16x128xf32>
    %cst_51 = arith.constant 1.000000e+00 : f32
    %123 = vector.broadcast %cst_51 : f32 to vector<16x128xf32>
    %124 = arith.addf %123, %122 : vector<16x128xf32>
    %125 = tpu.reciprocal %124 {approx = true} : vector<16x128xf32> -> vector<16x128xf32>
    %126 = vector.extract_strided_slice %118 {offsets = [0, 128], sizes = [16, 128], strides = [1, 1]} : vector<16x512xf32> to vector<16x128xf32>
    %cst_52 = arith.constant 0.000000e+00 : f32
    %127 = vector.broadcast %cst_52 : f32 to vector<16x128xf32>
    %128 = arith.subf %127, %126 : vector<16x128xf32>
    %129 = math.exp %128 : vector<16x128xf32>
    %cst_53 = arith.constant 1.000000e+00 : f32
    %130 = vector.broadcast %cst_53 : f32 to vector<16x128xf32>
    %131 = arith.addf %130, %129 : vector<16x128xf32>
    %132 = tpu.reciprocal %131 {approx = true} : vector<16x128xf32> -> vector<16x128xf32>
    %133 = vector.extract_strided_slice %118 {offsets = [0, 256], sizes = [16, 128], strides = [1, 1]} : vector<16x512xf32> to vector<16x128xf32>
    %134 = math.tanh %133 : vector<16x128xf32>
    %135 = vector.extract_strided_slice %118 {offsets = [0, 384], sizes = [16, 128], strides = [1, 1]} : vector<16x512xf32> to vector<16x128xf32>
    %cst_54 = arith.constant 0.000000e+00 : f32
    %136 = vector.broadcast %cst_54 : f32 to vector<16x128xf32>
    %137 = arith.subf %136, %135 : vector<16x128xf32>
    %138 = math.exp %137 : vector<16x128xf32>
    %cst_55 = arith.constant 1.000000e+00 : f32
    %139 = vector.broadcast %cst_55 : f32 to vector<16x128xf32>
    %140 = arith.addf %139, %138 : vector<16x128xf32>
    %141 = tpu.reciprocal %140 {approx = true} : vector<16x128xf32> -> vector<16x128xf32>
    %142 = arith.mulf %132, %109 : vector<16x128xf32>
    %143 = arith.mulf %125, %134 : vector<16x128xf32>
    %144 = arith.addf %142, %143 : vector<16x128xf32>
    %145 = math.tanh %144 : vector<16x128xf32>
    %146 = arith.mulf %141, %145 : vector<16x128xf32>
    %147 = arith.truncf %146 : vector<16x128xf32> to vector<16x128xbf16>
    %c48_56 = arith.constant 48 : index
    %c0_57 = arith.constant 0 : index
    %148 = vector.load %arg11[%c48_56, %c0_57] : memref<128x128xbf16, #tpu.memory_space<vmem>>, vector<16x128xbf16>
    tpu.vector_store %arg11[%c48_56, %c0_57], %147 {strides = array<i32>} : memref<128x128xbf16, #tpu.memory_space<vmem>>, vector<16x128xbf16>,
    %c64 = arith.constant 64 : index
    %c0_58 = arith.constant 0 : index
    %149 = vector.load %arg10[%c64, %c0_58] : memref<128x512xf32, #tpu.memory_space<vmem>>, vector<16x512xf32>
    %150 = arith.truncf %146 : vector<16x128xf32> to vector<16x128xbf16>
    %c0_59 = arith.constant 0 : index
    %c0_60 = arith.constant 0 : index
    %151 = vector.load %arg2[%c0_59, %c0_60] : memref<128x512xbf16, #tpu.memory_space<vmem>>, vector<128x512xbf16>
    %cst_61 = arith.constant dense<0.000000e+00> : vector<16x512xf32>
    %152 = tpu.matmul %150, %151, %cst_61 {dimension_numbers = #tpu.dot_dimension_numbers<[1], [0], [0], [1], [0, 0, 1, 1], [], []>} : vector<16x128xbf16>, vector<128x512xbf16>, vector<16x512xf32> -> vector<16x512xf32>
    %153 = arith.addf %149, %152 : vector<16x512xf32>
    %154 = vector.extract_strided_slice %153 {offsets = [0, 0], sizes = [16, 128], strides = [1, 1]} : vector<16x512xf32> to vector<16x128xf32>
    %cst_62 = arith.constant 0.000000e+00 : f32
    %155 = vector.broadcast %cst_62 : f32 to vector<16x128xf32>
    %156 = arith.subf %155, %154 : vector<16x128xf32>
    %157 = math.exp %156 : vector<16x128xf32>
    %cst_63 = arith.constant 1.000000e+00 : f32
    %158 = vector.broadcast %cst_63 : f32 to vector<16x128xf32>
    %159 = arith.addf %158, %157 : vector<16x128xf32>
    %160 = tpu.reciprocal %159 {approx = true} : vector<16x128xf32> -> vector<16x128xf32>
    %161 = vector.extract_strided_slice %153 {offsets = [0, 128], sizes = [16, 128], strides = [1, 1]} : vector<16x512xf32> to vector<16x128xf32>
    %cst_64 = arith.constant 0.000000e+00 : f32
    %162 = vector.broadcast %cst_64 : f32 to vector<16x128xf32>
    %163 = arith.subf %162, %161 : vector<16x128xf32>
    %164 = math.exp %163 : vector<16x128xf32>
    %cst_65 = arith.constant 1.000000e+00 : f32
    %165 = vector.broadcast %cst_65 : f32 to vector<16x128xf32>
    %166 = arith.addf %165, %164 : vector<16x128xf32>
    %167 = tpu.reciprocal %166 {approx = true} : vector<16x128xf32> -> vector<16x128xf32>
    %168 = vector.extract_strided_slice %153 {offsets = [0, 256], sizes = [16, 128], strides = [1, 1]} : vector<16x512xf32> to vector<16x128xf32>
    %169 = math.tanh %168 : vector<16x128xf32>
    %170 = vector.extract_strided_slice %153 {offsets = [0, 384], sizes = [16, 128], strides = [1, 1]} : vector<16x512xf32> to vector<16x128xf32>
    %cst_66 = arith.constant 0.000000e+00 : f32
    %171 = vector.broadcast %cst_66 : f32 to vector<16x128xf32>
    %172 = arith.subf %171, %170 : vector<16x128xf32>
    %173 = math.exp %172 : vector<16x128xf32>
    %cst_67 = arith.constant 1.000000e+00 : f32
    %174 = vector.broadcast %cst_67 : f32 to vector<16x128xf32>
    %175 = arith.addf %174, %173 : vector<16x128xf32>
    %176 = tpu.reciprocal %175 {approx = true} : vector<16x128xf32> -> vector<16x128xf32>
    %177 = arith.mulf %167, %144 : vector<16x128xf32>
    %178 = arith.mulf %160, %169 : vector<16x128xf32>
    %179 = arith.addf %177, %178 : vector<16x128xf32>
    %180 = math.tanh %179 : vector<16x128xf32>
    %181 = arith.mulf %176, %180 : vector<16x128xf32>
    %182 = arith.truncf %181 : vector<16x128xf32> to vector<16x128xbf16>
    %c64_68 = arith.constant 64 : index
    %c0_69 = arith.constant 0 : index
    %183 = vector.load %arg11[%c64_68, %c0_69] : memref<128x128xbf16, #tpu.memory_space<vmem>>, vector<16x128xbf16>
    tpu.vector_store %arg11[%c64_68, %c0_69], %182 {strides = array<i32>} : memref<128x128xbf16, #tpu.memory_space<vmem>>, vector<16x128xbf16>,
    %c80 = arith.constant 80 : index
    %c0_70 = arith.constant 0 : index
    %184 = vector.load %arg10[%c80, %c0_70] : memref<128x512xf32, #tpu.memory_space<vmem>>, vector<16x512xf32>
    %185 = arith.truncf %181 : vector<16x128xf32> to vector<16x128xbf16>
    %c0_71 = arith.constant 0 : index
    %c0_72 = arith.constant 0 : index
    %186 = vector.load %arg2[%c0_71, %c0_72] : memref<128x512xbf16, #tpu.memory_space<vmem>>, vector<128x512xbf16>
    %cst_73 = arith.constant dense<0.000000e+00> : vector<16x512xf32>
    %187 = tpu.matmul %185, %186, %cst_73 {dimension_numbers = #tpu.dot_dimension_numbers<[1], [0], [0], [1], [0, 0, 1, 1], [], []>} : vector<16x128xbf16>, vector<128x512xbf16>, vector<16x512xf32> -> vector<16x512xf32>
    %188 = arith.addf %184, %187 : vector<16x512xf32>
    %189 = vector.extract_strided_slice %188 {offsets = [0, 0], sizes = [16, 128], strides = [1, 1]} : vector<16x512xf32> to vector<16x128xf32>
    %cst_74 = arith.constant 0.000000e+00 : f32
    %190 = vector.broadcast %cst_74 : f32 to vector<16x128xf32>
    %191 = arith.subf %190, %189 : vector<16x128xf32>
    %192 = math.exp %191 : vector<16x128xf32>
    %cst_75 = arith.constant 1.000000e+00 : f32
    %193 = vector.broadcast %cst_75 : f32 to vector<16x128xf32>
    %194 = arith.addf %193, %192 : vector<16x128xf32>
    %195 = tpu.reciprocal %194 {approx = true} : vector<16x128xf32> -> vector<16x128xf32>
    %196 = vector.extract_strided_slice %188 {offsets = [0, 128], sizes = [16, 128], strides = [1, 1]} : vector<16x512xf32> to vector<16x128xf32>
    %cst_76 = arith.constant 0.000000e+00 : f32
    %197 = vector.broadcast %cst_76 : f32 to vector<16x128xf32>
    %198 = arith.subf %197, %196 : vector<16x128xf32>
    %199 = math.exp %198 : vector<16x128xf32>
    %cst_77 = arith.constant 1.000000e+00 : f32
    %200 = vector.broadcast %cst_77 : f32 to vector<16x128xf32>
    %201 = arith.addf %200, %199 : vector<16x128xf32>
    %202 = tpu.reciprocal %201 {approx = true} : vector<16x128xf32> -> vector<16x128xf32>
    %203 = vector.extract_strided_slice %188 {offsets = [0, 256], sizes = [16, 128], strides = [1, 1]} : vector<16x512xf32> to vector<16x128xf32>
    %204 = math.tanh %203 : vector<16x128xf32>
    %205 = vector.extract_strided_slice %188 {offsets = [0, 384], sizes = [16, 128], strides = [1, 1]} : vector<16x512xf32> to vector<16x128xf32>
    %cst_78 = arith.constant 0.000000e+00 : f32
    %206 = vector.broadcast %cst_78 : f32 to vector<16x128xf32>
    %207 = arith.subf %206, %205 : vector<16x128xf32>
    %208 = math.exp %207 : vector<16x128xf32>
    %cst_79 = arith.constant 1.000000e+00 : f32
    %209 = vector.broadcast %cst_79 : f32 to vector<16x128xf32>
    %210 = arith.addf %209, %208 : vector<16x128xf32>
    %211 = tpu.reciprocal %210 {approx = true} : vector<16x128xf32> -> vector<16x128xf32>
    %212 = arith.mulf %202, %179 : vector<16x128xf32>
    %213 = arith.mulf %195, %204 : vector<16x128xf32>
    %214 = arith.addf %212, %213 : vector<16x128xf32>
    %215 = math.tanh %214 : vector<16x128xf32>
    %216 = arith.mulf %211, %215 : vector<16x128xf32>
    %217 = arith.truncf %216 : vector<16x128xf32> to vector<16x128xbf16>
    %c80_80 = arith.constant 80 : index
    %c0_81 = arith.constant 0 : index
    %218 = vector.load %arg11[%c80_80, %c0_81] : memref<128x128xbf16, #tpu.memory_space<vmem>>, vector<16x128xbf16>
    tpu.vector_store %arg11[%c80_80, %c0_81], %217 {strides = array<i32>} : memref<128x128xbf16, #tpu.memory_space<vmem>>, vector<16x128xbf16>,
    %c96 = arith.constant 96 : index
    %c0_82 = arith.constant 0 : index
    %219 = vector.load %arg10[%c96, %c0_82] : memref<128x512xf32, #tpu.memory_space<vmem>>, vector<16x512xf32>
    %220 = arith.truncf %216 : vector<16x128xf32> to vector<16x128xbf16>
    %c0_83 = arith.constant 0 : index
    %c0_84 = arith.constant 0 : index
    %221 = vector.load %arg2[%c0_83, %c0_84] : memref<128x512xbf16, #tpu.memory_space<vmem>>, vector<128x512xbf16>
    %cst_85 = arith.constant dense<0.000000e+00> : vector<16x512xf32>
    %222 = tpu.matmul %220, %221, %cst_85 {dimension_numbers = #tpu.dot_dimension_numbers<[1], [0], [0], [1], [0, 0, 1, 1], [], []>} : vector<16x128xbf16>, vector<128x512xbf16>, vector<16x512xf32> -> vector<16x512xf32>
    %223 = arith.addf %219, %222 : vector<16x512xf32>
    %224 = vector.extract_strided_slice %223 {offsets = [0, 0], sizes = [16, 128], strides = [1, 1]} : vector<16x512xf32> to vector<16x128xf32>
    %cst_86 = arith.constant 0.000000e+00 : f32
    %225 = vector.broadcast %cst_86 : f32 to vector<16x128xf32>
    %226 = arith.subf %225, %224 : vector<16x128xf32>
    %227 = math.exp %226 : vector<16x128xf32>
    %cst_87 = arith.constant 1.000000e+00 : f32
    %228 = vector.broadcast %cst_87 : f32 to vector<16x128xf32>
    %229 = arith.addf %228, %227 : vector<16x128xf32>
    %230 = tpu.reciprocal %229 {approx = true} : vector<16x128xf32> -> vector<16x128xf32>
    %231 = vector.extract_strided_slice %223 {offsets = [0, 128], sizes = [16, 128], strides = [1, 1]} : vector<16x512xf32> to vector<16x128xf32>
    %cst_88 = arith.constant 0.000000e+00 : f32
    %232 = vector.broadcast %cst_88 : f32 to vector<16x128xf32>
    %233 = arith.subf %232, %231 : vector<16x128xf32>
    %234 = math.exp %233 : vector<16x128xf32>
    %cst_89 = arith.constant 1.000000e+00 : f32
    %235 = vector.broadcast %cst_89 : f32 to vector<16x128xf32>
    %236 = arith.addf %235, %234 : vector<16x128xf32>
    %237 = tpu.reciprocal %236 {approx = true} : vector<16x128xf32> -> vector<16x128xf32>
    %238 = vector.extract_strided_slice %223 {offsets = [0, 256], sizes = [16, 128], strides = [1, 1]} : vector<16x512xf32> to vector<16x128xf32>
    %239 = math.tanh %238 : vector<16x128xf32>
    %240 = vector.extract_strided_slice %223 {offsets = [0, 384], sizes = [16, 128], strides = [1, 1]} : vector<16x512xf32> to vector<16x128xf32>
    %cst_90 = arith.constant 0.000000e+00 : f32
    %241 = vector.broadcast %cst_90 : f32 to vector<16x128xf32>
    %242 = arith.subf %241, %240 : vector<16x128xf32>
    %243 = math.exp %242 : vector<16x128xf32>
    %cst_91 = arith.constant 1.000000e+00 : f32
    %244 = vector.broadcast %cst_91 : f32 to vector<16x128xf32>
    %245 = arith.addf %244, %243 : vector<16x128xf32>
    %246 = tpu.reciprocal %245 {approx = true} : vector<16x128xf32> -> vector<16x128xf32>
    %247 = arith.mulf %237, %214 : vector<16x128xf32>
    %248 = arith.mulf %230, %239 : vector<16x128xf32>
    %249 = arith.addf %247, %248 : vector<16x128xf32>
    %250 = math.tanh %249 : vector<16x128xf32>
    %251 = arith.mulf %246, %250 : vector<16x128xf32>
    %252 = arith.truncf %251 : vector<16x128xf32> to vector<16x128xbf16>
    %c96_92 = arith.constant 96 : index
    %c0_93 = arith.constant 0 : index
    %253 = vector.load %arg11[%c96_92, %c0_93] : memref<128x128xbf16, #tpu.memory_space<vmem>>, vector<16x128xbf16>
    tpu.vector_store %arg11[%c96_92, %c0_93], %252 {strides = array<i32>} : memref<128x128xbf16, #tpu.memory_space<vmem>>, vector<16x128xbf16>,
    %c112 = arith.constant 112 : index
    %c0_94 = arith.constant 0 : index
    %254 = vector.load %arg10[%c112, %c0_94] : memref<128x512xf32, #tpu.memory_space<vmem>>, vector<16x512xf32>
    %255 = arith.truncf %251 : vector<16x128xf32> to vector<16x128xbf16>
    %c0_95 = arith.constant 0 : index
    %c0_96 = arith.constant 0 : index
    %256 = vector.load %arg2[%c0_95, %c0_96] : memref<128x512xbf16, #tpu.memory_space<vmem>>, vector<128x512xbf16>
    %cst_97 = arith.constant dense<0.000000e+00> : vector<16x512xf32>
    %257 = tpu.matmul %255, %256, %cst_97 {dimension_numbers = #tpu.dot_dimension_numbers<[1], [0], [0], [1], [0, 0, 1, 1], [], []>} : vector<16x128xbf16>, vector<128x512xbf16>, vector<16x512xf32> -> vector<16x512xf32>
    %258 = arith.addf %254, %257 : vector<16x512xf32>
    %259 = vector.extract_strided_slice %258 {offsets = [0, 0], sizes = [16, 128], strides = [1, 1]} : vector<16x512xf32> to vector<16x128xf32>
    %cst_98 = arith.constant 0.000000e+00 : f32
    %260 = vector.broadcast %cst_98 : f32 to vector<16x128xf32>
    %261 = arith.subf %260, %259 : vector<16x128xf32>
    %262 = math.exp %261 : vector<16x128xf32>
    %cst_99 = arith.constant 1.000000e+00 : f32
    %263 = vector.broadcast %cst_99 : f32 to vector<16x128xf32>
    %264 = arith.addf %263, %262 : vector<16x128xf32>
    %265 = tpu.reciprocal %264 {approx = true} : vector<16x128xf32> -> vector<16x128xf32>
    %266 = vector.extract_strided_slice %258 {offsets = [0, 128], sizes = [16, 128], strides = [1, 1]} : vector<16x512xf32> to vector<16x128xf32>
    %cst_100 = arith.constant 0.000000e+00 : f32
    %267 = vector.broadcast %cst_100 : f32 to vector<16x128xf32>
    %268 = arith.subf %267, %266 : vector<16x128xf32>
    %269 = math.exp %268 : vector<16x128xf32>
    %cst_101 = arith.constant 1.000000e+00 : f32
    %270 = vector.broadcast %cst_101 : f32 to vector<16x128xf32>
    %271 = arith.addf %270, %269 : vector<16x128xf32>
    %272 = tpu.reciprocal %271 {approx = true} : vector<16x128xf32> -> vector<16x128xf32>
    %273 = vector.extract_strided_slice %258 {offsets = [0, 256], sizes = [16, 128], strides = [1, 1]} : vector<16x512xf32> to vector<16x128xf32>
    %274 = math.tanh %273 : vector<16x128xf32>
    %275 = vector.extract_strided_slice %258 {offsets = [0, 384], sizes = [16, 128], strides = [1, 1]} : vector<16x512xf32> to vector<16x128xf32>
    %cst_102 = arith.constant 0.000000e+00 : f32
    %276 = vector.broadcast %cst_102 : f32 to vector<16x128xf32>
    %277 = arith.subf %276, %275 : vector<16x128xf32>
    %278 = math.exp %277 : vector<16x128xf32>
    %cst_103 = arith.constant 1.000000e+00 : f32
    %279 = vector.broadcast %cst_103 : f32 to vector<16x128xf32>
    %280 = arith.addf %279, %278 : vector<16x128xf32>
    %281 = tpu.reciprocal %280 {approx = true} : vector<16x128xf32> -> vector<16x128xf32>
    %282 = arith.mulf %272, %249 : vector<16x128xf32>
    %283 = arith.mulf %265, %274 : vector<16x128xf32>
    %284 = arith.addf %282, %283 : vector<16x128xf32>
    %285 = math.tanh %284 : vector<16x128xf32>
    %286 = arith.mulf %281, %285 : vector<16x128xf32>
    %287 = arith.truncf %286 : vector<16x128xf32> to vector<16x128xbf16>
    %c112_104 = arith.constant 112 : index
    %c0_105 = arith.constant 0 : index
    %288 = vector.load %arg11[%c112_104, %c0_105] : memref<128x128xbf16, #tpu.memory_space<vmem>>, vector<16x128xbf16>
    tpu.vector_store %arg11[%c112_104, %c0_105], %287 {strides = array<i32>} : memref<128x128xbf16, #tpu.memory_space<vmem>>, vector<16x128xbf16>,
    %c0_106 = arith.constant 0 : index
    %c0_107 = arith.constant 0 : index
    %289 = vector.load %arg11[%c0_106, %c0_107] : memref<128x128xbf16, #tpu.memory_space<vmem>>, vector<128x128xbf16>
    %c0_108 = arith.constant 0 : index
    %c0_109 = arith.constant 0 : index
    %290 = vector.load %arg4[%c0_108, %c0_109] : memref<128x512xbf16, #tpu.memory_space<vmem>>, vector<128x512xbf16>
    %cst_110 = arith.constant dense<0.000000e+00> : vector<128x512xf32>
    %291 = tpu.matmul %289, %290, %cst_110 {dimension_numbers = #tpu.dot_dimension_numbers<[1], [0], [0], [1], [0, 0, 1, 1], [], []>} : vector<128x128xbf16>, vector<128x512xbf16>, vector<128x512xf32> -> vector<128x512xf32>
    %c0_111 = arith.constant 0 : index
    %c0_112 = arith.constant 0 : index
    %292 = vector.load %arg6[%c0_111, %c0_112] : memref<1x512xf32, #tpu.memory_space<vmem>>, vector<1x512xf32>
    %293 = vector.broadcast %292 : vector<1x512xf32> to vector<128x512xf32>
    %294 = arith.addf %291, %293 : vector<128x512xf32>
    %c0_113 = arith.constant 0 : index
    %c0_114 = arith.constant 0 : index
    %295 = vector.load %arg10[%c0_113, %c0_114] : memref<128x512xf32, #tpu.memory_space<vmem>>, vector<128x512xf32>
    tpu.vector_store %arg10[%c0_113, %c0_114], %294 {strides = array<i32>} : memref<128x512xf32, #tpu.memory_space<vmem>>, vector<128x512xf32>,
    %cst_115 = arith.constant 0.000000e+00 : f32
    %296 = vector.broadcast %cst_115 : f32 to vector<16x128xf32>
    %cst_116 = arith.constant 0.000000e+00 : f32
    %297 = vector.broadcast %cst_116 : f32 to vector<16x128xf32>
    %c0_117 = arith.constant 0 : index
    %c0_118 = arith.constant 0 : index
    %298 = vector.load %arg10[%c0_117, %c0_118] : memref<128x512xf32, #tpu.memory_space<vmem>>, vector<16x512xf32>
    %299 = arith.truncf %296 : vector<16x128xf32> to vector<16x128xbf16>
    %c0_119 = arith.constant 0 : index
    %c0_120 = arith.constant 0 : index
    %300 = vector.load %arg5[%c0_119, %c0_120] : memref<128x512xbf16, #tpu.memory_space<vmem>>, vector<128x512xbf16>
    %cst_121 = arith.constant dense<0.000000e+00> : vector<16x512xf32>
    %301 = tpu.matmul %299, %300, %cst_121 {dimension_numbers = #tpu.dot_dimension_numbers<[1], [0], [0], [1], [0, 0, 1, 1], [], []>} : vector<16x128xbf16>, vector<128x512xbf16>, vector<16x512xf32> -> vector<16x512xf32>
    %302 = arith.addf %298, %301 : vector<16x512xf32>
    %303 = vector.extract_strided_slice %302 {offsets = [0, 0], sizes = [16, 128], strides = [1, 1]} : vector<16x512xf32> to vector<16x128xf32>
    %cst_122 = arith.constant 0.000000e+00 : f32
    %304 = vector.broadcast %cst_122 : f32 to vector<16x128xf32>
    %305 = arith.subf %304, %303 : vector<16x128xf32>
    %306 = math.exp %305 : vector<16x128xf32>
    %cst_123 = arith.constant 1.000000e+00 : f32
    %307 = vector.broadcast %cst_123 : f32 to vector<16x128xf32>
    %308 = arith.addf %307, %306 : vector<16x128xf32>
    %309 = tpu.reciprocal %308 {approx = true} : vector<16x128xf32> -> vector<16x128xf32>
    %310 = vector.extract_strided_slice %302 {offsets = [0, 128], sizes = [16, 128], strides = [1, 1]} : vector<16x512xf32> to vector<16x128xf32>
    %cst_124 = arith.constant 0.000000e+00 : f32
    %311 = vector.broadcast %cst_124 : f32 to vector<16x128xf32>
    %312 = arith.subf %311, %310 : vector<16x128xf32>
    %313 = math.exp %312 : vector<16x128xf32>
    %cst_125 = arith.constant 1.000000e+00 : f32
    %314 = vector.broadcast %cst_125 : f32 to vector<16x128xf32>
    %315 = arith.addf %314, %313 : vector<16x128xf32>
    %316 = tpu.reciprocal %315 {approx = true} : vector<16x128xf32> -> vector<16x128xf32>
    %317 = vector.extract_strided_slice %302 {offsets = [0, 256], sizes = [16, 128], strides = [1, 1]} : vector<16x512xf32> to vector<16x128xf32>
    %318 = math.tanh %317 : vector<16x128xf32>
    %319 = vector.extract_strided_slice %302 {offsets = [0, 384], sizes = [16, 128], strides = [1, 1]} : vector<16x512xf32> to vector<16x128xf32>
    %cst_126 = arith.constant 0.000000e+00 : f32
    %320 = vector.broadcast %cst_126 : f32 to vector<16x128xf32>
    %321 = arith.subf %320, %319 : vector<16x128xf32>
    %322 = math.exp %321 : vector<16x128xf32>
    %cst_127 = arith.constant 1.000000e+00 : f32
    %323 = vector.broadcast %cst_127 : f32 to vector<16x128xf32>
    %324 = arith.addf %323, %322 : vector<16x128xf32>
    %325 = tpu.reciprocal %324 {approx = true} : vector<16x128xf32> -> vector<16x128xf32>
    %326 = arith.mulf %316, %297 : vector<16x128xf32>
    %327 = arith.mulf %309, %318 : vector<16x128xf32>
    %328 = arith.addf %326, %327 : vector<16x128xf32>
    %329 = math.tanh %328 : vector<16x128xf32>
    %330 = arith.mulf %325, %329 : vector<16x128xf32>
    %c16_128 = arith.constant 16 : index
    %c0_129 = arith.constant 0 : index
    %331 = vector.load %arg10[%c16_128, %c0_129] : memref<128x512xf32, #tpu.memory_space<vmem>>, vector<16x512xf32>
    %332 = arith.truncf %330 : vector<16x128xf32> to vector<16x128xbf16>
    %c0_130 = arith.constant 0 : index
    %c0_131 = arith.constant 0 : index
    %333 = vector.load %arg5[%c0_130, %c0_131] : memref<128x512xbf16, #tpu.memory_space<vmem>>, vector<128x512xbf16>
    %cst_132 = arith.constant dense<0.000000e+00> : vector<16x512xf32>
    %334 = tpu.matmul %332, %333, %cst_132 {dimension_numbers = #tpu.dot_dimension_numbers<[1], [0], [0], [1], [0, 0, 1, 1], [], []>} : vector<16x128xbf16>, vector<128x512xbf16>, vector<16x512xf32> -> vector<16x512xf32>
    %335 = arith.addf %331, %334 : vector<16x512xf32>
    %336 = vector.extract_strided_slice %335 {offsets = [0, 0], sizes = [16, 128], strides = [1, 1]} : vector<16x512xf32> to vector<16x128xf32>
    %cst_133 = arith.constant 0.000000e+00 : f32
    %337 = vector.broadcast %cst_133 : f32 to vector<16x128xf32>
    %338 = arith.subf %337, %336 : vector<16x128xf32>
    %339 = math.exp %338 : vector<16x128xf32>
    %cst_134 = arith.constant 1.000000e+00 : f32
    %340 = vector.broadcast %cst_134 : f32 to vector<16x128xf32>
    %341 = arith.addf %340, %339 : vector<16x128xf32>
    %342 = tpu.reciprocal %341 {approx = true} : vector<16x128xf32> -> vector<16x128xf32>
    %343 = vector.extract_strided_slice %335 {offsets = [0, 128], sizes = [16, 128], strides = [1, 1]} : vector<16x512xf32> to vector<16x128xf32>
    %cst_135 = arith.constant 0.000000e+00 : f32
    %344 = vector.broadcast %cst_135 : f32 to vector<16x128xf32>
    %345 = arith.subf %344, %343 : vector<16x128xf32>
    %346 = math.exp %345 : vector<16x128xf32>
    %cst_136 = arith.constant 1.000000e+00 : f32
    %347 = vector.broadcast %cst_136 : f32 to vector<16x128xf32>
    %348 = arith.addf %347, %346 : vector<16x128xf32>
    %349 = tpu.reciprocal %348 {approx = true} : vector<16x128xf32> -> vector<16x128xf32>
    %350 = vector.extract_strided_slice %335 {offsets = [0, 256], sizes = [16, 128], strides = [1, 1]} : vector<16x512xf32> to vector<16x128xf32>
    %351 = math.tanh %350 : vector<16x128xf32>
    %352 = vector.extract_strided_slice %335 {offsets = [0, 384], sizes = [16, 128], strides = [1, 1]} : vector<16x512xf32> to vector<16x128xf32>
    %cst_137 = arith.constant 0.000000e+00 : f32
    %353 = vector.broadcast %cst_137 : f32 to vector<16x128xf32>
    %354 = arith.subf %353, %352 : vector<16x128xf32>
    %355 = math.exp %354 : vector<16x128xf32>
    %cst_138 = arith.constant 1.000000e+00 : f32
    %356 = vector.broadcast %cst_138 : f32 to vector<16x128xf32>
    %357 = arith.addf %356, %355 : vector<16x128xf32>
    %358 = tpu.reciprocal %357 {approx = true} : vector<16x128xf32> -> vector<16x128xf32>
    %359 = arith.mulf %349, %328 : vector<16x128xf32>
    %360 = arith.mulf %342, %351 : vector<16x128xf32>
    %361 = arith.addf %359, %360 : vector<16x128xf32>
    %362 = math.tanh %361 : vector<16x128xf32>
    %363 = arith.mulf %358, %362 : vector<16x128xf32>
    %c32_139 = arith.constant 32 : index
    %c0_140 = arith.constant 0 : index
    %364 = vector.load %arg10[%c32_139, %c0_140] : memref<128x512xf32, #tpu.memory_space<vmem>>, vector<16x512xf32>
    %365 = arith.truncf %363 : vector<16x128xf32> to vector<16x128xbf16>
    %c0_141 = arith.constant 0 : index
    %c0_142 = arith.constant 0 : index
    %366 = vector.load %arg5[%c0_141, %c0_142] : memref<128x512xbf16, #tpu.memory_space<vmem>>, vector<128x512xbf16>
    %cst_143 = arith.constant dense<0.000000e+00> : vector<16x512xf32>
    %367 = tpu.matmul %365, %366, %cst_143 {dimension_numbers = #tpu.dot_dimension_numbers<[1], [0], [0], [1], [0, 0, 1, 1], [], []>} : vector<16x128xbf16>, vector<128x512xbf16>, vector<16x512xf32> -> vector<16x512xf32>
    %368 = arith.addf %364, %367 : vector<16x512xf32>
    %369 = vector.extract_strided_slice %368 {offsets = [0, 0], sizes = [16, 128], strides = [1, 1]} : vector<16x512xf32> to vector<16x128xf32>
    %cst_144 = arith.constant 0.000000e+00 : f32
    %370 = vector.broadcast %cst_144 : f32 to vector<16x128xf32>
    %371 = arith.subf %370, %369 : vector<16x128xf32>
    %372 = math.exp %371 : vector<16x128xf32>
    %cst_145 = arith.constant 1.000000e+00 : f32
    %373 = vector.broadcast %cst_145 : f32 to vector<16x128xf32>
    %374 = arith.addf %373, %372 : vector<16x128xf32>
    %375 = tpu.reciprocal %374 {approx = true} : vector<16x128xf32> -> vector<16x128xf32>
    %376 = vector.extract_strided_slice %368 {offsets = [0, 128], sizes = [16, 128], strides = [1, 1]} : vector<16x512xf32> to vector<16x128xf32>
    %cst_146 = arith.constant 0.000000e+00 : f32
    %377 = vector.broadcast %cst_146 : f32 to vector<16x128xf32>
    %378 = arith.subf %377, %376 : vector<16x128xf32>
    %379 = math.exp %378 : vector<16x128xf32>
    %cst_147 = arith.constant 1.000000e+00 : f32
    %380 = vector.broadcast %cst_147 : f32 to vector<16x128xf32>
    %381 = arith.addf %380, %379 : vector<16x128xf32>
    %382 = tpu.reciprocal %381 {approx = true} : vector<16x128xf32> -> vector<16x128xf32>
    %383 = vector.extract_strided_slice %368 {offsets = [0, 256], sizes = [16, 128], strides = [1, 1]} : vector<16x512xf32> to vector<16x128xf32>
    %384 = math.tanh %383 : vector<16x128xf32>
    %385 = vector.extract_strided_slice %368 {offsets = [0, 384], sizes = [16, 128], strides = [1, 1]} : vector<16x512xf32> to vector<16x128xf32>
    %cst_148 = arith.constant 0.000000e+00 : f32
    %386 = vector.broadcast %cst_148 : f32 to vector<16x128xf32>
    %387 = arith.subf %386, %385 : vector<16x128xf32>
    %388 = math.exp %387 : vector<16x128xf32>
    %cst_149 = arith.constant 1.000000e+00 : f32
    %389 = vector.broadcast %cst_149 : f32 to vector<16x128xf32>
    %390 = arith.addf %389, %388 : vector<16x128xf32>
    %391 = tpu.reciprocal %390 {approx = true} : vector<16x128xf32> -> vector<16x128xf32>
    %392 = arith.mulf %382, %361 : vector<16x128xf32>
    %393 = arith.mulf %375, %384 : vector<16x128xf32>
    %394 = arith.addf %392, %393 : vector<16x128xf32>
    %395 = math.tanh %394 : vector<16x128xf32>
    %396 = arith.mulf %391, %395 : vector<16x128xf32>
    %c48_150 = arith.constant 48 : index
    %c0_151 = arith.constant 0 : index
    %397 = vector.load %arg10[%c48_150, %c0_151] : memref<128x512xf32, #tpu.memory_space<vmem>>, vector<16x512xf32>
    %398 = arith.truncf %396 : vector<16x128xf32> to vector<16x128xbf16>
    %c0_152 = arith.constant 0 : index
    %c0_153 = arith.constant 0 : index
    %399 = vector.load %arg5[%c0_152, %c0_153] : memref<128x512xbf16, #tpu.memory_space<vmem>>, vector<128x512xbf16>
    %cst_154 = arith.constant dense<0.000000e+00> : vector<16x512xf32>
    %400 = tpu.matmul %398, %399, %cst_154 {dimension_numbers = #tpu.dot_dimension_numbers<[1], [0], [0], [1], [0, 0, 1, 1], [], []>} : vector<16x128xbf16>, vector<128x512xbf16>, vector<16x512xf32> -> vector<16x512xf32>
    %401 = arith.addf %397, %400 : vector<16x512xf32>
    %402 = vector.extract_strided_slice %401 {offsets = [0, 0], sizes = [16, 128], strides = [1, 1]} : vector<16x512xf32> to vector<16x128xf32>
    %cst_155 = arith.constant 0.000000e+00 : f32
    %403 = vector.broadcast %cst_155 : f32 to vector<16x128xf32>
    %404 = arith.subf %403, %402 : vector<16x128xf32>
    %405 = math.exp %404 : vector<16x128xf32>
    %cst_156 = arith.constant 1.000000e+00 : f32
    %406 = vector.broadcast %cst_156 : f32 to vector<16x128xf32>
    %407 = arith.addf %406, %405 : vector<16x128xf32>
    %408 = tpu.reciprocal %407 {approx = true} : vector<16x128xf32> -> vector<16x128xf32>
    %409 = vector.extract_strided_slice %401 {offsets = [0, 128], sizes = [16, 128], strides = [1, 1]} : vector<16x512xf32> to vector<16x128xf32>
    %cst_157 = arith.constant 0.000000e+00 : f32
    %410 = vector.broadcast %cst_157 : f32 to vector<16x128xf32>
    %411 = arith.subf %410, %409 : vector<16x128xf32>
    %412 = math.exp %411 : vector<16x128xf32>
    %cst_158 = arith.constant 1.000000e+00 : f32
    %413 = vector.broadcast %cst_158 : f32 to vector<16x128xf32>
    %414 = arith.addf %413, %412 : vector<16x128xf32>
    %415 = tpu.reciprocal %414 {approx = true} : vector<16x128xf32> -> vector<16x128xf32>
    %416 = vector.extract_strided_slice %401 {offsets = [0, 256], sizes = [16, 128], strides = [1, 1]} : vector<16x512xf32> to vector<16x128xf32>
    %417 = math.tanh %416 : vector<16x128xf32>
    %418 = vector.extract_strided_slice %401 {offsets = [0, 384], sizes = [16, 128], strides = [1, 1]} : vector<16x512xf32> to vector<16x128xf32>
    %cst_159 = arith.constant 0.000000e+00 : f32
    %419 = vector.broadcast %cst_159 : f32 to vector<16x128xf32>
    %420 = arith.subf %419, %418 : vector<16x128xf32>
    %421 = math.exp %420 : vector<16x128xf32>
    %cst_160 = arith.constant 1.000000e+00 : f32
    %422 = vector.broadcast %cst_160 : f32 to vector<16x128xf32>
    %423 = arith.addf %422, %421 : vector<16x128xf32>
    %424 = tpu.reciprocal %423 {approx = true} : vector<16x128xf32> -> vector<16x128xf32>
    %425 = arith.mulf %415, %394 : vector<16x128xf32>
    %426 = arith.mulf %408, %417 : vector<16x128xf32>
    %427 = arith.addf %425, %426 : vector<16x128xf32>
    %428 = math.tanh %427 : vector<16x128xf32>
    %429 = arith.mulf %424, %428 : vector<16x128xf32>
    %c64_161 = arith.constant 64 : index
    %c0_162 = arith.constant 0 : index
    %430 = vector.load %arg10[%c64_161, %c0_162] : memref<128x512xf32, #tpu.memory_space<vmem>>, vector<16x512xf32>
    %431 = arith.truncf %429 : vector<16x128xf32> to vector<16x128xbf16>
    %c0_163 = arith.constant 0 : index
    %c0_164 = arith.constant 0 : index
    %432 = vector.load %arg5[%c0_163, %c0_164] : memref<128x512xbf16, #tpu.memory_space<vmem>>, vector<128x512xbf16>
    %cst_165 = arith.constant dense<0.000000e+00> : vector<16x512xf32>
    %433 = tpu.matmul %431, %432, %cst_165 {dimension_numbers = #tpu.dot_dimension_numbers<[1], [0], [0], [1], [0, 0, 1, 1], [], []>} : vector<16x128xbf16>, vector<128x512xbf16>, vector<16x512xf32> -> vector<16x512xf32>
    %434 = arith.addf %430, %433 : vector<16x512xf32>
    %435 = vector.extract_strided_slice %434 {offsets = [0, 0], sizes = [16, 128], strides = [1, 1]} : vector<16x512xf32> to vector<16x128xf32>
    %cst_166 = arith.constant 0.000000e+00 : f32
    %436 = vector.broadcast %cst_166 : f32 to vector<16x128xf32>
    %437 = arith.subf %436, %435 : vector<16x128xf32>
    %438 = math.exp %437 : vector<16x128xf32>
    %cst_167 = arith.constant 1.000000e+00 : f32
    %439 = vector.broadcast %cst_167 : f32 to vector<16x128xf32>
    %440 = arith.addf %439, %438 : vector<16x128xf32>
    %441 = tpu.reciprocal %440 {approx = true} : vector<16x128xf32> -> vector<16x128xf32>
    %442 = vector.extract_strided_slice %434 {offsets = [0, 128], sizes = [16, 128], strides = [1, 1]} : vector<16x512xf32> to vector<16x128xf32>
    %cst_168 = arith.constant 0.000000e+00 : f32
    %443 = vector.broadcast %cst_168 : f32 to vector<16x128xf32>
    %444 = arith.subf %443, %442 : vector<16x128xf32>
    %445 = math.exp %444 : vector<16x128xf32>
    %cst_169 = arith.constant 1.000000e+00 : f32
    %446 = vector.broadcast %cst_169 : f32 to vector<16x128xf32>
    %447 = arith.addf %446, %445 : vector<16x128xf32>
    %448 = tpu.reciprocal %447 {approx = true} : vector<16x128xf32> -> vector<16x128xf32>
    %449 = vector.extract_strided_slice %434 {offsets = [0, 256], sizes = [16, 128], strides = [1, 1]} : vector<16x512xf32> to vector<16x128xf32>
    %450 = math.tanh %449 : vector<16x128xf32>
    %451 = vector.extract_strided_slice %434 {offsets = [0, 384], sizes = [16, 128], strides = [1, 1]} : vector<16x512xf32> to vector<16x128xf32>
    %cst_170 = arith.constant 0.000000e+00 : f32
    %452 = vector.broadcast %cst_170 : f32 to vector<16x128xf32>
    %453 = arith.subf %452, %451 : vector<16x128xf32>
    %454 = math.exp %453 : vector<16x128xf32>
    %cst_171 = arith.constant 1.000000e+00 : f32
    %455 = vector.broadcast %cst_171 : f32 to vector<16x128xf32>
    %456 = arith.addf %455, %454 : vector<16x128xf32>
    %457 = tpu.reciprocal %456 {approx = true} : vector<16x128xf32> -> vector<16x128xf32>
    %458 = arith.mulf %448, %427 : vector<16x128xf32>
    %459 = arith.mulf %441, %450 : vector<16x128xf32>
    %460 = arith.addf %458, %459 : vector<16x128xf32>
    %461 = math.tanh %460 : vector<16x128xf32>
    %462 = arith.mulf %457, %461 : vector<16x128xf32>
    %c80_172 = arith.constant 80 : index
    %c0_173 = arith.constant 0 : index
    %463 = vector.load %arg10[%c80_172, %c0_173] : memref<128x512xf32, #tpu.memory_space<vmem>>, vector<16x512xf32>
    %464 = arith.truncf %462 : vector<16x128xf32> to vector<16x128xbf16>
    %c0_174 = arith.constant 0 : index
    %c0_175 = arith.constant 0 : index
    %465 = vector.load %arg5[%c0_174, %c0_175] : memref<128x512xbf16, #tpu.memory_space<vmem>>, vector<128x512xbf16>
    %cst_176 = arith.constant dense<0.000000e+00> : vector<16x512xf32>
    %466 = tpu.matmul %464, %465, %cst_176 {dimension_numbers = #tpu.dot_dimension_numbers<[1], [0], [0], [1], [0, 0, 1, 1], [], []>} : vector<16x128xbf16>, vector<128x512xbf16>, vector<16x512xf32> -> vector<16x512xf32>
    %467 = arith.addf %463, %466 : vector<16x512xf32>
    %468 = vector.extract_strided_slice %467 {offsets = [0, 0], sizes = [16, 128], strides = [1, 1]} : vector<16x512xf32> to vector<16x128xf32>
    %cst_177 = arith.constant 0.000000e+00 : f32
    %469 = vector.broadcast %cst_177 : f32 to vector<16x128xf32>
    %470 = arith.subf %469, %468 : vector<16x128xf32>
    %471 = math.exp %470 : vector<16x128xf32>
    %cst_178 = arith.constant 1.000000e+00 : f32
    %472 = vector.broadcast %cst_178 : f32 to vector<16x128xf32>
    %473 = arith.addf %472, %471 : vector<16x128xf32>
    %474 = tpu.reciprocal %473 {approx = true} : vector<16x128xf32> -> vector<16x128xf32>
    %475 = vector.extract_strided_slice %467 {offsets = [0, 128], sizes = [16, 128], strides = [1, 1]} : vector<16x512xf32> to vector<16x128xf32>
    %cst_179 = arith.constant 0.000000e+00 : f32
    %476 = vector.broadcast %cst_179 : f32 to vector<16x128xf32>
    %477 = arith.subf %476, %475 : vector<16x128xf32>
    %478 = math.exp %477 : vector<16x128xf32>
    %cst_180 = arith.constant 1.000000e+00 : f32
    %479 = vector.broadcast %cst_180 : f32 to vector<16x128xf32>
    %480 = arith.addf %479, %478 : vector<16x128xf32>
    %481 = tpu.reciprocal %480 {approx = true} : vector<16x128xf32> -> vector<16x128xf32>
    %482 = vector.extract_strided_slice %467 {offsets = [0, 256], sizes = [16, 128], strides = [1, 1]} : vector<16x512xf32> to vector<16x128xf32>
    %483 = math.tanh %482 : vector<16x128xf32>
    %484 = vector.extract_strided_slice %467 {offsets = [0, 384], sizes = [16, 128], strides = [1, 1]} : vector<16x512xf32> to vector<16x128xf32>
    %cst_181 = arith.constant 0.000000e+00 : f32
    %485 = vector.broadcast %cst_181 : f32 to vector<16x128xf32>
    %486 = arith.subf %485, %484 : vector<16x128xf32>
    %487 = math.exp %486 : vector<16x128xf32>
    %cst_182 = arith.constant 1.000000e+00 : f32
    %488 = vector.broadcast %cst_182 : f32 to vector<16x128xf32>
    %489 = arith.addf %488, %487 : vector<16x128xf32>
    %490 = tpu.reciprocal %489 {approx = true} : vector<16x128xf32> -> vector<16x128xf32>
    %491 = arith.mulf %481, %460 : vector<16x128xf32>
    %492 = arith.mulf %474, %483 : vector<16x128xf32>
    %493 = arith.addf %491, %492 : vector<16x128xf32>
    %494 = math.tanh %493 : vector<16x128xf32>
    %495 = arith.mulf %490, %494 : vector<16x128xf32>
    %c96_183 = arith.constant 96 : index
    %c0_184 = arith.constant 0 : index
    %496 = vector.load %arg10[%c96_183, %c0_184] : memref<128x512xf32, #tpu.memory_space<vmem>>, vector<16x512xf32>
    %497 = arith.truncf %495 : vector<16x128xf32> to vector<16x128xbf16>
    %c0_185 = arith.constant 0 : index
    %c0_186 = arith.constant 0 : index
    %498 = vector.load %arg5[%c0_185, %c0_186] : memref<128x512xbf16, #tpu.memory_space<vmem>>, vector<128x512xbf16>
    %cst_187 = arith.constant dense<0.000000e+00> : vector<16x512xf32>
    %499 = tpu.matmul %497, %498, %cst_187 {dimension_numbers = #tpu.dot_dimension_numbers<[1], [0], [0], [1], [0, 0, 1, 1], [], []>} : vector<16x128xbf16>, vector<128x512xbf16>, vector<16x512xf32> -> vector<16x512xf32>
    %500 = arith.addf %496, %499 : vector<16x512xf32>
    %501 = vector.extract_strided_slice %500 {offsets = [0, 0], sizes = [16, 128], strides = [1, 1]} : vector<16x512xf32> to vector<16x128xf32>
    %cst_188 = arith.constant 0.000000e+00 : f32
    %502 = vector.broadcast %cst_188 : f32 to vector<16x128xf32>
    %503 = arith.subf %502, %501 : vector<16x128xf32>
    %504 = math.exp %503 : vector<16x128xf32>
    %cst_189 = arith.constant 1.000000e+00 : f32
    %505 = vector.broadcast %cst_189 : f32 to vector<16x128xf32>
    %506 = arith.addf %505, %504 : vector<16x128xf32>
    %507 = tpu.reciprocal %506 {approx = true} : vector<16x128xf32> -> vector<16x128xf32>
    %508 = vector.extract_strided_slice %500 {offsets = [0, 128], sizes = [16, 128], strides = [1, 1]} : vector<16x512xf32> to vector<16x128xf32>
    %cst_190 = arith.constant 0.000000e+00 : f32
    %509 = vector.broadcast %cst_190 : f32 to vector<16x128xf32>
    %510 = arith.subf %509, %508 : vector<16x128xf32>
    %511 = math.exp %510 : vector<16x128xf32>
    %cst_191 = arith.constant 1.000000e+00 : f32
    %512 = vector.broadcast %cst_191 : f32 to vector<16x128xf32>
    %513 = arith.addf %512, %511 : vector<16x128xf32>
    %514 = tpu.reciprocal %513 {approx = true} : vector<16x128xf32> -> vector<16x128xf32>
    %515 = vector.extract_strided_slice %500 {offsets = [0, 256], sizes = [16, 128], strides = [1, 1]} : vector<16x512xf32> to vector<16x128xf32>
    %516 = math.tanh %515 : vector<16x128xf32>
    %517 = vector.extract_strided_slice %500 {offsets = [0, 384], sizes = [16, 128], strides = [1, 1]} : vector<16x512xf32> to vector<16x128xf32>
    %cst_192 = arith.constant 0.000000e+00 : f32
    %518 = vector.broadcast %cst_192 : f32 to vector<16x128xf32>
    %519 = arith.subf %518, %517 : vector<16x128xf32>
    %520 = math.exp %519 : vector<16x128xf32>
    %cst_193 = arith.constant 1.000000e+00 : f32
    %521 = vector.broadcast %cst_193 : f32 to vector<16x128xf32>
    %522 = arith.addf %521, %520 : vector<16x128xf32>
    %523 = tpu.reciprocal %522 {approx = true} : vector<16x128xf32> -> vector<16x128xf32>
    %524 = arith.mulf %514, %493 : vector<16x128xf32>
    %525 = arith.mulf %507, %516 : vector<16x128xf32>
    %526 = arith.addf %524, %525 : vector<16x128xf32>
    %527 = math.tanh %526 : vector<16x128xf32>
    %528 = arith.mulf %523, %527 : vector<16x128xf32>
    %c112_194 = arith.constant 112 : index
    %c0_195 = arith.constant 0 : index
    %529 = vector.load %arg10[%c112_194, %c0_195] : memref<128x512xf32, #tpu.memory_space<vmem>>, vector<16x512xf32>
    %530 = arith.truncf %528 : vector<16x128xf32> to vector<16x128xbf16>
    %c0_196 = arith.constant 0 : index
    %c0_197 = arith.constant 0 : index
    %531 = vector.load %arg5[%c0_196, %c0_197] : memref<128x512xbf16, #tpu.memory_space<vmem>>, vector<128x512xbf16>
    %cst_198 = arith.constant dense<0.000000e+00> : vector<16x512xf32>
    %532 = tpu.matmul %530, %531, %cst_198 {dimension_numbers = #tpu.dot_dimension_numbers<[1], [0], [0], [1], [0, 0, 1, 1], [], []>} : vector<16x128xbf16>, vector<128x512xbf16>, vector<16x512xf32> -> vector<16x512xf32>
    %533 = arith.addf %529, %532 : vector<16x512xf32>
    %534 = vector.extract_strided_slice %533 {offsets = [0, 0], sizes = [16, 128], strides = [1, 1]} : vector<16x512xf32> to vector<16x128xf32>
    %cst_199 = arith.constant 0.000000e+00 : f32
    %535 = vector.broadcast %cst_199 : f32 to vector<16x128xf32>
    %536 = arith.subf %535, %534 : vector<16x128xf32>
    %537 = math.exp %536 : vector<16x128xf32>
    %cst_200 = arith.constant 1.000000e+00 : f32
    %538 = vector.broadcast %cst_200 : f32 to vector<16x128xf32>
    %539 = arith.addf %538, %537 : vector<16x128xf32>
    %540 = tpu.reciprocal %539 {approx = true} : vector<16x128xf32> -> vector<16x128xf32>
    %541 = vector.extract_strided_slice %533 {offsets = [0, 128], sizes = [16, 128], strides = [1, 1]} : vector<16x512xf32> to vector<16x128xf32>
    %cst_201 = arith.constant 0.000000e+00 : f32
    %542 = vector.broadcast %cst_201 : f32 to vector<16x128xf32>
    %543 = arith.subf %542, %541 : vector<16x128xf32>
    %544 = math.exp %543 : vector<16x128xf32>
    %cst_202 = arith.constant 1.000000e+00 : f32
    %545 = vector.broadcast %cst_202 : f32 to vector<16x128xf32>
    %546 = arith.addf %545, %544 : vector<16x128xf32>
    %547 = tpu.reciprocal %546 {approx = true} : vector<16x128xf32> -> vector<16x128xf32>
    %548 = vector.extract_strided_slice %533 {offsets = [0, 256], sizes = [16, 128], strides = [1, 1]} : vector<16x512xf32> to vector<16x128xf32>
    %549 = math.tanh %548 : vector<16x128xf32>
    %550 = vector.extract_strided_slice %533 {offsets = [0, 384], sizes = [16, 128], strides = [1, 1]} : vector<16x512xf32> to vector<16x128xf32>
    %cst_203 = arith.constant 0.000000e+00 : f32
    %551 = vector.broadcast %cst_203 : f32 to vector<16x128xf32>
    %552 = arith.subf %551, %550 : vector<16x128xf32>
    %553 = math.exp %552 : vector<16x128xf32>
    %cst_204 = arith.constant 1.000000e+00 : f32
    %554 = vector.broadcast %cst_204 : f32 to vector<16x128xf32>
    %555 = arith.addf %554, %553 : vector<16x128xf32>
    %556 = tpu.reciprocal %555 {approx = true} : vector<16x128xf32> -> vector<16x128xf32>
    %557 = arith.mulf %547, %526 : vector<16x128xf32>
    %558 = arith.mulf %540, %549 : vector<16x128xf32>
    %559 = arith.addf %557, %558 : vector<16x128xf32>
    %560 = math.tanh %559 : vector<16x128xf32>
    %561 = arith.mulf %556, %560 : vector<16x128xf32>
    %562 = arith.truncf %561 : vector<16x128xf32> to vector<16x128xbf16>
    %c0_205 = arith.constant 0 : index
    %c0_206 = arith.constant 0 : index
    %563 = vector.load %arg7[%c0_205, %c0_206] : memref<128x128xbf16, #tpu.memory_space<vmem>>, vector<128x128xbf16>
    %cst_207 = arith.constant dense<0.000000e+00> : vector<16x128xf32>
    %564 = tpu.matmul %562, %563, %cst_207 {dimension_numbers = #tpu.dot_dimension_numbers<[1], [0], [0], [1], [0, 0, 1, 1], [], []>} : vector<16x128xbf16>, vector<128x128xbf16>, vector<16x128xf32> -> vector<16x128xf32>
    %c0_208 = arith.constant 0 : index
    %c0_209 = arith.constant 0 : index
    %565 = vector.load %arg8[%c0_208, %c0_209] : memref<1x128xf32, #tpu.memory_space<vmem>>, vector<1x128xf32>
    %566 = vector.broadcast %565 : vector<1x128xf32> to vector<16x128xf32>
    %567 = arith.addf %564, %566 : vector<16x128xf32>
    %c0_210 = arith.constant 0 : index
    %c0_211 = arith.constant 0 : index
    %568 = vector.load %arg9[%c0_210, %c0_211] : memref<16x128xf32, #tpu.memory_space<vmem>>, vector<16x128xf32>
    tpu.vector_store %arg9[%c0_210, %c0_211], %567 {strides = array<i32>} : memref<16x128xf32, #tpu.memory_space<vmem>>, vector<16x128xf32>,
    return
  }
}

</mosaic_0001>

<bundles_post_ra>
// kernel: lstms_forward.1
= control target key start
LH: loop header
LB: loop body
LE: loop exit
PB: predicated region body
PF: predicated region fallthrough
CT: control target
= control target key end

     0   :  { %14 = vsyncpa [#allocation5], 0  ;;  %s8260_s0 = inlined_call_operand.vmem [shape: bf16[128,128], index: 0, kind: input, shape index: {}]   ;;  %s8261_s1 = inlined_call_operand.hbm [shape: bf16[128,512], index: 1, kind: input, shape index: {}]   ;;  %s8262_s2 = inlined_call_operand.hbm [shape: bf16[128,512], index: 2, kind: input, shape index: {}]   ;;  %s8263_s3 = inlined_call_operand.vmem [shape: f32[1,512], index: 3, kind: input, shape index: {}]   ;;  %s8264_s4 = inlined_call_operand.hbm [shape: bf16[128,512], index: 4, kind: input, shape index: {}]   ;;  %s8265_s5 = inlined_call_operand.hbm [shape: bf16[128,512], index: 5, kind: input, shape index: {}]   ;;  %s8266_s6 = inlined_call_operand.vmem [shape: f32[1,512], index: 6, kind: input, shape index: {}]   ;;  %s8267_s7 = inlined_call_operand.vmem [shape: bf16[128,128], index: 7, kind: input, shape index: {}]   ;;  %s8268_s8 = inlined_call_operand.vmem [shape: f32[1,128], index: 8, kind: input, shape index: {}]   ;;  %s8269_s9 = inlined_call_operand.vmem [shape: f32[16,128], index: 9, kind: output, shape index: {}]  }
   0x1   :  { %15 = vsyncpa [#allocation7], 0 }
   0x2   :  { %16 = vsyncpa [#allocation10], 0  ;;  %s6920_s30 = smov [#allocation6]   ;;  %s6921_s11 = smov [#allocation4]  }
   0x3   :  { %s36_s10 = sshll.u32 %s6920_s30, 4  ;;  %s24_s12 = sshll.u32 %s6921_s11, 4  ;;  %s37_s10 = int_to_ptr.vmem [resolvable:$true] %s36_s10  ;;  %s6979_s12 = int_to_ptr.vmem [resolvable:$true] %s24_s12 }
   0x4   :  { %s6826_s15 = scalar_lea.hbm %s8262_s2, 4096 }
   0x5   :  { %p6827_p0 = scmp.ne.s32.totalorder %s8262_s2, %s6826_s15  ;;  %p6830_p1 = scmp.lt.u32.totalorder %s6826_s15, %s8262_s2 }
   0x7   :  { %p6832_p2 = pnand %p6830_p1, %p6827_p0 }
   0x9   :  { %6835 = shalt.err (!%p6832_p2)
}
   0xa   :  { %s6836_s20 = scalar_lea.vmem %s37_s10, 4096  ;;  %p6841_p4 = scmp.lt.s32.totalorder %s37_s10, %s37_s10 }
   0xb   :  { %p6837_p3 = scmp.ne.s32.totalorder %s37_s10, %s6836_s20  ;;  %p6842_p5 = scmp.lt.s32.totalorder %s6836_s20, %s6836_s20 }
   0xd   :  { %p6843_p6 = por %p6842_p5, %p6841_p4 }
   0xf   :  { %p6844_p7 = pnand %p6843_p6, %p6837_p3 }
  0x11   :  { %6847 = shalt.err (!%p6844_p7)
}
  0x12   :  { %s6922_s21 = smov 256   ;;  %s6923_s22 = smov 16  }
  0x13   :  { %42 = dma.hbm_to_vmem [thread:$0]  %s8262_s2, 4096, %s37_s10, [#allocation7], %s6922_s21, %s6922_s21, %s6923_s22  }
  0x14   :  { %s6848_s27 = scalar_lea.hbm %s8261_s1, 4096 }
  0x15   :  { %p6849_p8 = scmp.ne.s32.totalorder %s8261_s1, %s6848_s27  ;;  %p6852_p9 = scmp.lt.u32.totalorder %s6848_s27, %s8261_s1 }
  0x17   :  { %p6854_p10 = pnand %p6852_p9, %p6849_p8 }
  0x19   :  { %6857 = shalt.err (!%p6854_p10)
}
  0x1a   :  { %s6858_s13 = scalar_lea.vmem %s6979_s12, 4096  ;;  %p6863_p12 = scmp.lt.s32.totalorder %s6979_s12, %s6979_s12 }
  0x1b   :  { %p6859_p11 = scmp.ne.s32.totalorder %s6979_s12, %s6858_s13  ;;  %p6864_p13 = scmp.lt.s32.totalorder %s6858_s13, %s6858_s13 }
  0x1d   :  { %p6865_p0 = por %p6864_p13, %p6863_p12 }
  0x1f   :  { %p6866_p1 = pnand %p6865_p0, %p6859_p11 }
  0x21   :  { %6869 = shalt.err (!%p6866_p1)
}
  0x22   :  { %30 = dma.hbm_to_vmem [thread:$0]  %s8261_s1, 4096, %s6979_s12, [#allocation5], %s6922_s21, %s6922_s21, %s6923_s22  }
  0x23   :  { %s6924_s14 = smov [#allocation8]   ;;  %s6925_s16 = smov [#allocation9]  }
  0x24   :  { %s50_s15 = sshll.u32 %s6924_s14, 4  ;;  %s62_s17 = sshll.u32 %s6925_s16, 4  ;;  %s51_s15 = int_to_ptr.vmem [resolvable:$true] %s50_s15  ;;  %s7016_s17 = int_to_ptr.vmem [resolvable:$true] %s62_s17 }
  0x25   :  { %s6870_s20 = scalar_lea.hbm %s8264_s4, 4096 }
  0x26   :  { %p6871_p2 = scmp.ne.s32.totalorder %s8264_s4, %s6870_s20  ;;  %p6874_p3 = scmp.lt.u32.totalorder %s6870_s20, %s8264_s4 }
  0x28   :  { %p6876_p4 = pnand %p6874_p3, %p6871_p2 }
  0x2a   :  { %6879 = shalt.err (!%p6876_p4)
}
  0x2b   :  { %s6880_s1 = scalar_lea.vmem %s51_s15, 4096  ;;  %p6885_p6 = scmp.lt.s32.totalorder %s51_s15, %s51_s15 }
  0x2c   :  { %p6881_p5 = scmp.ne.s32.totalorder %s51_s15, %s6880_s1  ;;  %p6886_p7 = scmp.lt.s32.totalorder %s6880_s1, %s6880_s1 }
  0x2e   :  { %p6887_p8 = por %p6886_p7, %p6885_p6 }
  0x30   :  { %p6888_p9 = pnand %p6887_p8, %p6881_p5 }
  0x32   :  { %6891 = shalt.err (!%p6888_p9)
}
  0x33   :  { %56 = dma.hbm_to_vmem [thread:$0]  %s8264_s4, 4096, %s51_s15, [#allocation7], %s6922_s21, %s6922_s21, %s6923_s22  }
  0x34   :  { %s6892_s30 = scalar_lea.hbm %s8265_s5, 4096 }
  0x35   :  { %p6893_p10 = scmp.ne.s32.totalorder %s8265_s5, %s6892_s30  ;;  %p6896_p11 = scmp.lt.u32.totalorder %s6892_s30, %s8265_s5 }
  0x37   :  { %p6898_p12 = pnand %p6896_p11, %p6893_p10 }
  0x39   :  { %6901 = shalt.err (!%p6898_p12)
}
  0x3a   :  { %s6902_s14 = scalar_lea.vmem %s7016_s17, 4096  ;;  %p6907_p0 = scmp.lt.s32.totalorder %s7016_s17, %s7016_s17 }
  0x3b   :  { %p6903_p13 = scmp.ne.s32.totalorder %s7016_s17, %s6902_s14  ;;  %p6908_p1 = scmp.lt.s32.totalorder %s6902_s14, %s6902_s14 }
  0x3d   :  { %p6909_p2 = por %p6908_p1, %p6907_p0 }
  0x3f   :  { %p6910_p3 = pnand %p6909_p2, %p6903_p13 }
  0x41   :  { %6913 = shalt.err (!%p6910_p3)
}
  0x42   :  { %68 = dma.hbm_to_vmem [thread:$0]  %s8265_s5, 4096, %s7016_s17, [#allocation10], %s6922_s21, %s6922_s21, %s6923_s22  }
  0x43   :  { %6914 = dma.done.wait [#allocation5], 4096  }
  0x44   :  { %6915 = vsyncadd [#allocation5], 4294963200 }
  0x45   :  { %6916 = dma.done.wait [#allocation7], 8192  }
  0x46   :  { %6917 = vsyncadd [#allocation7], 4294959104 }
  0x47   :  { %6918 = dma.done.wait [#allocation10], 4096  }
  0x48   :  { %6919 = vsyncadd [#allocation10], 4294963200  ;;  %v6926_v0 = vmov 0   ;;  %v6008_v1 = vld [vmem:[#allocation4 + $0x4] ss:$16 sps:$4 sm:$0xff]   ;;  %v6060_v43 = vld [vmem:[%s8260_s0 + $0x8] sm:$0xff]  }
  0x49   :  { %398 = vmatprep.mubr.bf16.mxu0 %v6926_v0  ;;  %511 = vmatprep.mubr.bf16.mxu1 %v6926_v0  ;;  %v6010_v2 = vld [vmem:[#allocation4 + $0xc] ss:$16 sps:$4 sm:$0xff]   ;;  %v6012_v3 = vld [vmem:[#allocation4] ss:$16 sps:$4 sm:$0xff]   ;;  %v6013_v4 = vld [vmem:[#allocation4 + $0x8] ss:$16 sps:$4 sm:$0xff]  }
  0x4a   :  { %366 = vmatprep.subr.bf16.mxu0 %v6008_v1  ;;  %479 = vmatprep.subr.bf16.mxu1 %v6010_v2  ;;  %v6014_v5 = vld [vmem:[#allocation4 + $0x24] ss:$16 sps:$4 sm:$0xff]   ;;  %v6016_v6 = vld [vmem:[#allocation4 + $0x2c] ss:$16 sps:$4 sm:$0xff]   ;;  %v6018_v7 = vld [vmem:[#allocation4 + $0x20] ss:$16 sps:$4 sm:$0xff]  }
  0x4b   :  { %367 = vmatpush1.bf16.msra.mxu0 %v6012_v3  ;;  %480 = vmatpush1.bf16.msra.mxu1 %v6013_v4  ;;  %v6019_v8 = vld [vmem:[#allocation4 + $0x28] ss:$16 sps:$4 sm:$0xff]   ;;  %v6020_v9 = vld [vmem:[#allocation4 + $0x44] ss:$16 sps:$4 sm:$0xff]   ;;  %v6022_v10 = vld [vmem:[#allocation4 + $0x4c] ss:$16 sps:$4 sm:$0xff]  }
  0x4c   :  { %368 = vmatprep.subr.bf16.mxu0 %v6014_v5  ;;  %481 = vmatprep.subr.bf16.mxu1 %v6016_v6  ;;  %v6024_v11 = vld [vmem:[#allocation4 + $0x40] ss:$16 sps:$4 sm:$0xff]   ;;  %v6025_v12 = vld [vmem:[#allocation4 + $0x48] ss:$16 sps:$4 sm:$0xff]   ;;  %v6026_v13 = vld [vmem:[#allocation4 + $0x64] ss:$16 sps:$4 sm:$0xff]  }
  0x4d   :  { %v6028_v14 = vld [vmem:[#allocation4 + $0x6c] ss:$16 sps:$4 sm:$0xff]   ;;  %v6030_v15 = vld [vmem:[#allocation4 + $0x60] ss:$16 sps:$4 sm:$0xff]   ;;  %v6031_v16 = vld [vmem:[#allocation4 + $0x68] ss:$16 sps:$4 sm:$0xff]  }
  0x4e   :  { %v6032_v17 = vld [vmem:[#allocation4 + $0x84] ss:$16 sps:$4 sm:$0xff]   ;;  %v6034_v18 = vld [vmem:[#allocation4 + $0x8c] ss:$16 sps:$4 sm:$0xff]   ;;  %v6036_v19 = vld [vmem:[#allocation4 + $0x80] ss:$16 sps:$4 sm:$0xff]  }
  0x4f   :  { %369 = vmatpush1.bf16.msra.mxu0 %v6018_v7  ;;  %482 = vmatpush1.bf16.msra.mxu1 %v6019_v8  ;;  %v6037_v20 = vld [vmem:[#allocation4 + $0x88] ss:$16 sps:$4 sm:$0xff]   ;;  %v6038_v21 = vld [vmem:[#allocation4 + $0xa4] ss:$16 sps:$4 sm:$0xff]   ;;  %v6040_v22 = vld [vmem:[#allocation4 + $0xac] ss:$16 sps:$4 sm:$0xff]  }
  0x50   :  { %370 = vmatprep.subr.bf16.mxu0 %v6020_v9  ;;  %483 = vmatprep.subr.bf16.mxu1 %v6022_v10  ;;  %v6042_v23 = vld [vmem:[#allocation4 + $0xa0] ss:$16 sps:$4 sm:$0xff]   ;;  %v6043_v24 = vld [vmem:[#allocation4 + $0xa8] ss:$16 sps:$4 sm:$0xff]   ;;  %v6044_v25 = vld [vmem:[#allocation4 + $0xc4] ss:$16 sps:$4 sm:$0xff]   ;;  %v138_v10 = vlaneseq }
  0x51   :  { %v6046_v26 = vld [vmem:[#allocation4 + $0xcc] ss:$16 sps:$4 sm:$0xff]   ;;  %v6048_v27 = vld [vmem:[#allocation4 + $0xc0] ss:$16 sps:$4 sm:$0xff]   ;;  %v6049_v28 = vld [vmem:[#allocation4 + $0xc8] ss:$16 sps:$4 sm:$0xff]  }
  0x52   :  { %v6050_v29 = vld [vmem:[#allocation4 + $0xe4] ss:$16 sps:$4 sm:$0xff]   ;;  %v6052_v30 = vld [vmem:[#allocation4 + $0xec] ss:$16 sps:$4 sm:$0xff]   ;;  %v6054_v31 = vld [vmem:[#allocation4 + $0xe0] ss:$16 sps:$4 sm:$0xff]  }
  0x53   :  { %371 = vmatpush1.bf16.msra.mxu0 %v6024_v11  ;;  %484 = vmatpush1.bf16.msra.mxu1 %v6025_v12  ;;  %v6055_v32 = vld [vmem:[#allocation4 + $0xe8] ss:$16 sps:$4 sm:$0xff]   ;;  %v7055_v33 = vld [vmem:[#allocation6 + $0x4] ss:$16 sps:$4 sm:$0xff]   ;;  %v7057_v34 = vld [vmem:[#allocation6 + $0xc] ss:$16 sps:$4 sm:$0xff]  }
  0x54   :  { %372 = vmatprep.subr.bf16.mxu0 %v6026_v13  ;;  %485 = vmatprep.subr.bf16.mxu1 %v6028_v14  ;;  %v6056_v35 = vld [vmem:[%s8260_s0] sm:$0xff]   ;;  %v7068_v38 = vld [vmem:[#allocation6 + $0x8] ss:$16 sps:$4 sm:$0xff]   ;;  %v7070_v39 = vld [vmem:[#allocation6 + $0x2c] ss:$16 sps:$4 sm:$0xff]   ;;  %v7229_v11 = vshrl.u32 %v138_v10, 7 }
  0x55   :  { %v7062_v36 = vld [vmem:[#allocation6] ss:$16 sps:$4 sm:$0xff]   ;;  %v7065_v37 = vld [vmem:[#allocation6 + $0x24] ss:$16 sps:$4 sm:$0xff]   ;;  %v7081_v42 = vld [vmem:[#allocation6 + $0x28] ss:$16 sps:$4 sm:$0xff]  }
  0x56   :  { %v7074_v40 = vld [vmem:[#allocation6 + $0x20] ss:$16 sps:$4 sm:$0xff]   ;;  %v7078_v41 = vld [vmem:[#allocation6 + $0x44] ss:$16 sps:$4 sm:$0xff]   ;;  %v7093_v46 = vld [vmem:[#allocation6 + $0x4c] ss:$16 sps:$4 sm:$0xff]  }
  0x57   :  { %373 = vmatpush1.bf16.msra.mxu0 %v6030_v15  ;;  %486 = vmatpush1.bf16.msra.mxu1 %v6031_v16  ;;  %v7088_v44 = vld [vmem:[#allocation6 + $0x40] ss:$16 sps:$4 sm:$0xff]   ;;  %v7091_v45 = vld [vmem:[#allocation6 + $0x64] ss:$16 sps:$4 sm:$0xff]   ;;  %v7096_v47 = vld [vmem:[#allocation6 + $0x48] ss:$16 sps:$4 sm:$0xff]  }
  0x58   :  { %374 = vmatprep.subr.bf16.mxu0 %v6032_v17  ;;  %487 = vmatprep.subr.bf16.mxu1 %v6034_v18  ;;  %v7098_v48 = vld [vmem:[#allocation6 + $0x6c] ss:$16 sps:$4 sm:$0xff]   ;;  %v7103_v49 = vld [vmem:[#allocation6 + $0x60] ss:$16 sps:$4 sm:$0xff]   ;;  %v7106_v50 = vld [vmem:[#allocation6 + $0x84] ss:$16 sps:$4 sm:$0xff]  }
  0x59   :  { %v7110_v51 = vld [vmem:[#allocation6 + $0x68] ss:$16 sps:$4 sm:$0xff]   ;;  %v6067_v52 = vld [vmem:[%s8260_s0 + $0x10] sm:$0xff]   ;;  %v7119_v54 = vld [vmem:[#allocation6 + $0x8c] ss:$16 sps:$4 sm:$0xff]   ;;  %v8273_v12 = vsub.s32 0, %v7229_v11 }
  0x5a   :  { %v7116_v53 = vld [vmem:[#allocation6 + $0x80] ss:$16 sps:$4 sm:$0xff]   ;;  %v7122_v55 = vld [vmem:[#allocation6 + $0xa4] ss:$16 sps:$4 sm:$0xff]   ;;  %v7125_v56 = vld [vmem:[#allocation6 + $0x88] ss:$16 sps:$4 sm:$0xff]  }
  0x5b   :  { %375 = vmatpush1.bf16.msra.mxu0 %v6036_v19  ;;  %488 = vmatpush1.bf16.msra.mxu1 %v6037_v20  ;;  %v7127_v57 = vld [vmem:[#allocation6 + $0xac] ss:$16 sps:$4 sm:$0xff]   ;;  %v7129_v58 = vld [vmem:[#allocation6 + $0xa0] ss:$16 sps:$4 sm:$0xff]   ;;  %v7133_v59 = vld [vmem:[#allocation6 + $0xc4] ss:$16 sps:$4 sm:$0xff]  }
  0x5c   :  { %376 = vmatprep.subr.bf16.mxu0 %v6038_v21  ;;  %489 = vmatprep.subr.bf16.mxu1 %v6040_v22  ;;  %v7135_v60 = vld [vmem:[#allocation6 + $0xa8] ss:$16 sps:$4 sm:$0xff]   ;;  %v7144_v62 = vld [vmem:[#allocation6 + $0xc0] ss:$16 sps:$4 sm:$0xff]   ;;  %v7147_v63 = vld [vmem:[#allocation6 + $0xcc] ss:$16 sps:$4 sm:$0xff]  }
  0x5d   :  { %v6074_v61 = vld [vmem:[%s8260_s0 + $0x18] sm:$0xff]   ;;  %v7149_v1 = vld [vmem:[#allocation6 + $0xe4] ss:$16 sps:$4 sm:$0xff]   ;;  %v7158_v4 = vld [vmem:[#allocation6 + $0xe0] ss:$16 sps:$4 sm:$0xff]   ;;  %v8272_v14 = vsub.s32 1, %v7229_v11 }
  0x5e   :  { %v7151_v2 = vld [vmem:[#allocation6 + $0xc8] ss:$16 sps:$4 sm:$0xff]   ;;  %v7154_v3 = vld [vmem:[#allocation6 + $0xec] ss:$16 sps:$4 sm:$0xff]   ;;  %v6081_v6 = vld [vmem:[%s8260_s0 + $0x20] sm:$0xff]   ;;  %v8271_v17 = vsub.s32 3, %v7229_v11 }
  0x5f   :  { %377 = vmatpush1.bf16.msra.mxu0 %v6042_v23  ;;  %490 = vmatpush1.bf16.msra.mxu1 %v6043_v24  ;;  %v7162_v5 = vld [vmem:[#allocation6 + $0xe8] ss:$16 sps:$4 sm:$0xff]   ;;  %v6095_v8 = vld [vmem:[%s8260_s0 + $0x30] sm:$0xff]   ;;  %v136_v13 = vld [vmem:[%s8263_s3] sm:$0xf]  ;;  %vm6928_vm0 = vmmov 0  }
  0x60   :  { %378 = vmatprep.subr.bf16.mxu0 %v6044_v25  ;;  %491 = vmatprep.subr.bf16.mxu1 %v6046_v26  ;;  %v6088_v7 = vld [vmem:[%s8260_s0 + $0x28] sm:$0xff]   ;;  %v6102_v9 = vld [vmem:[%s8260_s0 + $0x38] sm:$0xff]   ;;  %v7238_v15 = vrot.slane %v136_v13, %v8273_v12  ;;  %v7242_v16 = vrot.slane %v136_v13, %v8272_v14  ;;  %v7249_v24 = vrot.slane %v136_v13, %v8271_v17 }
  0x63   :  { %379 = vmatpush1.bf16.msra.mxu0 %v6048_v27  ;;  %492 = vmatpush1.bf16.msra.mxu1 %v6049_v28 }
  0x64   :  { %380 = vmatprep.subr.bf16.mxu0 %v6050_v29  ;;  %493 = vmatprep.subr.bf16.mxu1 %v6052_v30 }
  0x67   :  { %381 = vmatpush1.bf16.msra.mxu0 %v6054_v31  ;;  %494 = vmatpush1.bf16.msra.mxu1 %v6055_v32 }
  0x68   :  { %856 = vmatprep.subr.bf16.mxu0 %v7055_v33  ;;  %899 = vmatprep.subr.bf16.mxu1 %v7057_v34 }
  0x6a   :  { %399 = vmatmul.mubr.bf16.vlgmr.msra.gmra.mrb[0].mxu0 %v6056_v35  ;;  %512 = vmatmul.mubr.bf16.vlgmr.msra.gmra.mrb[0].mxu1 %v6056_v35 }
  0x6b   :  { %857 = vmatpush1.bf16.msra.mxu0 %v7062_v36  ;;  %408 = vmatprep.mubr.bf16.mxu0 %v6926_v0 }
  0x6c   :  { %521 = vmatprep.mubr.bf16.mxu1 %v6926_v0  ;;  %858 = vmatprep.subr.bf16.mxu0 %v7065_v37 }
  0x6d   :  { %900 = vmatpush1.bf16.msra.mxu1 %v7068_v38 }
  0x6e   :  { %901 = vmatprep.subr.bf16.mxu1 %v7070_v39 }
  0x6f   :  { %859 = vmatpush1.bf16.msra.mxu0 %v7074_v40 }
  0x70   :  { %860 = vmatprep.subr.bf16.mxu0 %v7078_v41 }
  0x71   :  { %902 = vmatpush1.bf16.msra.mxu1 %v7081_v42 }
  0x72   :  { %409 = vmatmul.mubr.bf16.gmra.mrb[4].mxu0 %v6060_v43  ;;  %522 = vmatmul.mubr.bf16.gmra.mrb[4].mxu1 %v6060_v43 }
  0x73   :  { %418 = vmatprep.mubr.bf16.mxu0 %v6926_v0  ;;  %531 = vmatprep.mubr.bf16.mxu1 %v6926_v0 }
  0x74   :  { %861 = vmatpush1.bf16.msra.mxu0 %v7088_v44  ;;  %903 = vmatprep.subr.bf16.mxu1 %v7093_v46 }
  0x75   :  { %862 = vmatprep.subr.bf16.mxu0 %v7091_v45  ;;  %904 = vmatpush1.bf16.msra.mxu1 %v7096_v47 }
  0x76   :  { %905 = vmatprep.subr.bf16.mxu1 %v7098_v48 }
  0x78   :  { %863 = vmatpush1.bf16.msra.mxu0 %v7103_v49 }
  0x79   :  { %864 = vmatprep.subr.bf16.mxu0 %v7106_v50  ;;  %906 = vmatpush1.bf16.msra.mxu1 %v7110_v51 }
  0x7a   :  { %419 = vmatmul.mubr.bf16.gmra.mrb[8].mxu0 %v6067_v52  ;;  %532 = vmatmul.mubr.bf16.gmra.mrb[8].mxu1 %v6067_v52 }
  0x7b   :  { %428 = vmatprep.mubr.bf16.mxu0 %v6926_v0  ;;  %541 = vmatprep.mubr.bf16.mxu1 %v6926_v0 }
  0x7c   :  { %865 = vmatpush1.bf16.msra.mxu0 %v7116_v53  ;;  %907 = vmatprep.subr.bf16.mxu1 %v7119_v54 }
  0x7d   :  { %866 = vmatprep.subr.bf16.mxu0 %v7122_v55  ;;  %908 = vmatpush1.bf16.msra.mxu1 %v7125_v56 }
  0x7e   :  { %909 = vmatprep.subr.bf16.mxu1 %v7127_v57 }
  0x80   :  { %867 = vmatpush1.bf16.msra.mxu0 %v7129_v58 }
  0x81   :  { %868 = vmatprep.subr.bf16.mxu0 %v7133_v59  ;;  %910 = vmatpush1.bf16.msra.mxu1 %v7135_v60 }
  0x82   :  { %429 = vmatmul.mubr.bf16.gmra.mrb[12].mxu0 %v6074_v61  ;;  %542 = vmatmul.mubr.bf16.gmra.mrb[12].mxu1 %v6074_v61 }
  0x83   :  { %438 = vmatprep.mubr.bf16.mxu0 %v6926_v0  ;;  %551 = vmatprep.mubr.bf16.mxu1 %v6926_v0 }
  0x84   :  { %869 = vmatpush1.bf16.msra.mxu0 %v7144_v62  ;;  %911 = vmatprep.subr.bf16.mxu1 %v7147_v63 }
  0x85   :  { %870 = vmatprep.subr.bf16.mxu0 %v7149_v1  ;;  %912 = vmatpush1.bf16.msra.mxu1 %v7151_v2 }
  0x86   :  { %913 = vmatprep.subr.bf16.mxu1 %v7154_v3 }
  0x88   :  { %871 = vmatpush1.bf16.msra.mxu0 %v7158_v4 }
  0x89   :  { %914 = vmatpush1.bf16.msra.mxu1 %v7162_v5  ;;  %1194 = vmatprep.subr.bf16.mxu0 %v7055_v33 }
  0x8a   :  { %439 = vmatmul.mubr.bf16.gmra.mrb[16].mxu0 %v6081_v6  ;;  %552 = vmatmul.mubr.bf16.gmra.mrb[16].mxu1 %v6081_v6 }
  0x8b   :  { %448 = vmatprep.mubr.bf16.mxu0 %v6926_v0  ;;  %561 = vmatprep.mubr.bf16.mxu1 %v6926_v0 }
  0x8c   :  { %1237 = vmatprep.subr.bf16.mxu1 %v7057_v34 }
  0x92   :  { %449 = vmatmul.mubr.bf16.gmra.mrb[20].mxu0 %v6088_v7  ;;  %562 = vmatmul.mubr.bf16.gmra.mrb[20].mxu1 %v6088_v7 }
  0x93   :  { %458 = vmatprep.mubr.bf16.mxu0 %v6926_v0  ;;  %571 = vmatprep.mubr.bf16.mxu1 %v6926_v0 }
  0x9a   :  { %459 = vmatmul.mubr.bf16.gmra.mrb[24].mxu0 %v6095_v8  ;;  %572 = vmatmul.mubr.bf16.gmra.mrb[24].mxu1 %v6095_v8 }
  0x9b   :  { %468 = vmatprep.mubr.bf16.mxu0 %v6926_v0  ;;  %581 = vmatprep.mubr.bf16.mxu1 %v6926_v0 }
  0xa2   :  { %469 = vmatmul.mubr.bf16.gmra.mrb[28].mxu0 %v6102_v9  ;;  %582 = vmatmul.mubr.bf16.gmra.mrb[28].mxu1 %v6102_v9 }
  0xa3   :  { %888 = vmatprep.mubr.bf16.mxu0 %v6926_v0  ;;  %931 = vmatprep.mubr.bf16.mxu1 %v6926_v0 }
  0xaa   :  { %889 = vmatmul.mubr.bf16.vlgmr.msra.gmra.mrb[0].mxu0 %v6926_v0  ;;  %932 = vmatmul.mubr.bf16.vlgmr.msra.gmra.mrb[0].mxu1 %v6926_v0 }
  0xab   :  { %1195 = vmatpush1.bf16.msra.mxu0 %v7062_v36  ;;  %1238 = vmatpush1.bf16.msra.mxu1 %v7068_v38 }
  0xac   :  { %1196 = vmatprep.subr.bf16.mxu0 %v7065_v37  ;;  %1239 = vmatprep.subr.bf16.mxu1 %v7070_v39 }
  0xad   :  { %1226 = vmatprep.mubr.bf16.mxu0 %v6926_v0  ;;  %1269 = vmatprep.mubr.bf16.mxu1 %v6926_v0 }
  0xaf   :  { %1197 = vmatpush1.bf16.msra.mxu0 %v7074_v40  ;;  %1240 = vmatpush1.bf16.msra.mxu1 %v7081_v42 }
  0xb0   :  { %1198 = vmatprep.subr.bf16.mxu0 %v7078_v41  ;;  %1241 = vmatprep.subr.bf16.mxu1 %v7093_v46 }
  0xb3   :  { %1199 = vmatpush1.bf16.msra.mxu0 %v7088_v44  ;;  %1242 = vmatpush1.bf16.msra.mxu1 %v7096_v47 }
  0xb4   :  { %1200 = vmatprep.subr.bf16.mxu0 %v7091_v45  ;;  %1243 = vmatprep.subr.bf16.mxu1 %v7098_v48 }
  0xb7   :  { %1201 = vmatpush1.bf16.msra.mxu0 %v7103_v49  ;;  %1244 = vmatpush1.bf16.msra.mxu1 %v7110_v51 }
  0xb8   :  { %1202 = vmatprep.subr.bf16.mxu0 %v7106_v50  ;;  %1245 = vmatprep.subr.bf16.mxu1 %v7119_v54 }
  0xbb   :  { %1203 = vmatpush1.bf16.msra.mxu0 %v7116_v53  ;;  %1246 = vmatpush1.bf16.msra.mxu1 %v7125_v56 }
  0xbc   :  { %1204 = vmatprep.subr.bf16.mxu0 %v7122_v55  ;;  %1247 = vmatprep.subr.bf16.mxu1 %v7127_v57 }
  0xbf   :  { %1205 = vmatpush1.bf16.msra.mxu0 %v7129_v58  ;;  %1248 = vmatpush1.bf16.msra.mxu1 %v7135_v60 }
  0xc0   :  { %1206 = vmatprep.subr.bf16.mxu0 %v7133_v59  ;;  %1249 = vmatprep.subr.bf16.mxu1 %v7147_v63 }
  0xc3   :  { %1207 = vmatpush1.bf16.msra.mxu0 %v7144_v62  ;;  %1250 = vmatpush1.bf16.msra.mxu1 %v7151_v2 }
  0xc4   :  { %1208 = vmatprep.subr.bf16.mxu0 %v7149_v1  ;;  %1251 = vmatprep.subr.bf16.mxu1 %v7154_v3 }
  0xc7   :  { %1209 = vmatpush1.bf16.msra.mxu0 %v7158_v4  ;;  %1252 = vmatpush1.bf16.msra.mxu1 %v7162_v5 }
  0xc8   :  { %1532 = vmatprep.subr.bf16.mxu0 %v7055_v33  ;;  %1575 = vmatprep.subr.bf16.mxu1 %v7057_v34  ;;  %v8270_v34 = vsub.s32 2, %v7229_v11 }
  0xca   :  { %v7258_v9 = vrot.slane %v136_v13, %v8270_v34 }
 0x17d   :  { %v890_v18 = vpop.f32.mrb[0].mxu0  ;;  %v933_v19 = vpop.f32.mrb[0].mxu1 }
 0x17e   :  { %v5743_v20 = vadd.f32 %v890_v18, %v7238_v15  ;;  %v892_v21 = vpop.f32.mrb[1].mxu0  ;;  %v935_v22 = vpop.f32.mrb[1].mxu1 }
 0x17f   :  { %v5744_v23 = vadd.f32 %v892_v21, %v7242_v16  ;;  %v894_v25 = vpop.f32.mrb[2].mxu0  ;;  %v937_v26 = vpop.f32.mrb[2].mxu1  ;;  %v5776_v52 = vadd.f32 %v935_v22, %v7249_v24 }
 0x180   :  { %v950_v27 = vsub.f32 0.0, %v5743_v20  ;;  %v5745_v28 = vadd.f32 %v894_v25, %v7238_v15  ;;  %v896_v29 = vpop.f32.mrb[3].mxu0  ;;  %v939_v30 = vpop.f32.mrb[3].mxu1  ;;  %v5775_v20 = vadd.f32 %v933_v19, %v7258_v9 }
 0x181   :  { %v960_v31 = vsub.f32 0.0, %v5744_v23  ;;  %v5746_v32 = vadd.f32 %v896_v29, %v7242_v16  ;;  %v5778_v7 = vadd.f32 %v939_v30, %v7249_v24  ;;  %v972_v10 = vsub.f32 0.0, %v5776_v52 }
 0x182   :  { %v952_v33 = vmul.f32 1.442695, %v950_v27  ;;  %v951_v35 = vsub.f32 0.0, %v5745_v28  ;;  %v5777_v28 = vadd.f32 %v937_v26, %v7258_v9 }
 0x183   :  { %v962_v43 = vmul.f32 1.442695, %v960_v31  ;;  %v961_v61 = vsub.f32 0.0, %v5746_v32  ;;  %v973_v18 = vsub.f32 0.0, %v5778_v7  ;;  %v974_v21 = vmul.f32 1.442695, %v972_v10 }
 0x184   :  { %6282 = vpow2.f32 %v952_v33  ;;  %v954_v6 = vmul.f32 1.442695, %v951_v35 }
 0x185   :  { %6284 = vpow2.f32 %v962_v43  ;;  %v964_v8 = vmul.f32 1.442695, %v961_v61  ;;  %v976_v23 = vmul.f32 1.442695, %v973_v18 }
 0x186   :  { %6286 = vpow2.f32 %v954_v6 }
 0x187   :  { %6288 = vpow2.f32 %v964_v8 }
 0x188   :  { %6290 = vtanh.f32 %v5775_v20 }
 0x189   :  { %6292 = vpow2.f32 %v974_v21 }
 0x18a   :  { %6294 = vpow2.f32 %v976_v23 }
 0x18e   :  { %v6283_v22 = vpop.eup %6282 }
 0x18f   :  { %v6285_v25 = vpop.eup %6284  ;;  %v956_v27 = vadd.f32 1.0, %v6283_v22 }
 0x190   :  { %v966_v29 = vadd.f32 1.0, %v6285_v25  ;;  %v6287_v30 = vpop.eup %6286 }
 0x191   :  { %6296 = vrcp.f32 %v956_v27  ;;  %v6289_v13 = vpop.eup %6288  ;;  %v957_v31 = vadd.f32 1.0, %v6287_v30 }
 0x192   :  { %6298 = vrcp.f32 %v966_v29  ;;  %v967_v32 = vadd.f32 1.0, %v6289_v13  ;;  %v6291_v19 = vpop.eup %6290 }
 0x193   :  { %6300 = vtanh.f32 %v5777_v28  ;;  %v6293_v33 = vpop.eup %6292 }
 0x194   :  { %6302 = vrcp.f32 %v957_v31  ;;  %v6295_v35 = vpop.eup %6294  ;;  %v978_v26 = vadd.f32 1.0, %v6293_v33 }
 0x195   :  { %6304 = vrcp.f32 %v967_v32  ;;  %v979_v21 = vadd.f32 1.0, %v6295_v35 }
 0x196   :  { %6306 = vrcp.f32 %v978_v26 }
 0x19b   :  { %v6297_v43 = vpop.eup %6296 }
 0x19c   :  { %v6299_v52 = vpop.eup %6298  ;;  %v984_v61 = vmul.f32 %v6297_v43, %v6291_v19 }
 0x19d   :  { %v6301_v6 = vpop.eup %6300  ;;  %v982_v7 = vmul.f32 0.0, %v6299_v52 }
 0x19e   :  { %v6303_v8 = vpop.eup %6302 }
 0x19f   :  { %v6305_v10 = vpop.eup %6304  ;;  %v7262_v18 = vadd.f32 %v984_v61, %v982_v7  ;;  %v985_v20 = vmul.f32 %v6303_v8, %v6301_v6 }
 0x1a0   :  { %v983_v23 = vmul.f32 0.0, %v6305_v10  ;;  %v6307_v25 = vpop.eup %6306 }
 0x1a1   :  { %6308 = vtanh.f32 %v7262_v18 }
 0x1a2   :  { %v7265_v22 = vadd.f32 %v985_v20, %v983_v23  ;;  %6310 = vrcp.f32 %v979_v21 }
 0x1a4   :  { %6312 = vtanh.f32 %v7265_v22 }
 0x1ab   :  { %v6309_v27 = vpop.eup %6308 }
 0x1ac   :  { %v6311_v28 = vpop.eup %6310  ;;  %v990_v30 = vmul.f32 %v6309_v27, %v6307_v25 }
 0x1ae   :  { %v6313_v29 = vpop.eup %6312 }
 0x1af   :  { %v991_v13 = vmul.f32 %v6313_v29, %v6311_v28 }
 0x1b1   :  { %v7268_v31 = vpack.c.bf16 %v991_v13, %v990_v30 }
 0x1b3   :  { %1227 = vmatmul.mubr.bf16.vlgmr.msra.gmra.mrb[4].mxu0 %v7268_v31  ;;  %1270 = vmatmul.mubr.bf16.vlgmr.msra.gmra.mrb[4].mxu1 %v7268_v31 }
 0x1b4   :  { %1533 = vmatpush1.bf16.msra.mxu0 %v7062_v36  ;;  %1576 = vmatpush1.bf16.msra.mxu1 %v7068_v38 }
 0x1b5   :  { %1534 = vmatprep.subr.bf16.mxu0 %v7065_v37  ;;  %1577 = vmatprep.subr.bf16.mxu1 %v7070_v39 }
 0x1b6   :  { %1564 = vmatprep.mubr.bf16.mxu0 %v6926_v0  ;;  %1607 = vmatprep.mubr.bf16.mxu1 %v6926_v0 }
 0x1b8   :  { %1535 = vmatpush1.bf16.msra.mxu0 %v7074_v40  ;;  %1578 = vmatpush1.bf16.msra.mxu1 %v7081_v42 }
 0x1b9   :  { %1536 = vmatprep.subr.bf16.mxu0 %v7078_v41  ;;  %1579 = vmatprep.subr.bf16.mxu1 %v7093_v46 }
 0x1bc   :  { %1537 = vmatpush1.bf16.msra.mxu0 %v7088_v44  ;;  %1580 = vmatpush1.bf16.msra.mxu1 %v7096_v47 }
 0x1bd   :  { %1538 = vmatprep.subr.bf16.mxu0 %v7091_v45  ;;  %1581 = vmatprep.subr.bf16.mxu1 %v7098_v48 }
 0x1c0   :  { %1539 = vmatpush1.bf16.msra.mxu0 %v7103_v49  ;;  %1582 = vmatpush1.bf16.msra.mxu1 %v7110_v51 }
 0x1c1   :  { %1540 = vmatprep.subr.bf16.mxu0 %v7106_v50  ;;  %1583 = vmatprep.subr.bf16.mxu1 %v7119_v54 }
 0x1c4   :  { %1541 = vmatpush1.bf16.msra.mxu0 %v7116_v53  ;;  %1584 = vmatpush1.bf16.msra.mxu1 %v7125_v56 }
 0x1c5   :  { %1542 = vmatprep.subr.bf16.mxu0 %v7122_v55  ;;  %1585 = vmatprep.subr.bf16.mxu1 %v7127_v57 }
 0x1c8   :  { %1543 = vmatpush1.bf16.msra.mxu0 %v7129_v58  ;;  %1586 = vmatpush1.bf16.msra.mxu1 %v7135_v60 }
 0x1c9   :  { %1544 = vmatprep.subr.bf16.mxu0 %v7133_v59  ;;  %1587 = vmatprep.subr.bf16.mxu1 %v7147_v63 }
 0x1cc   :  { %1545 = vmatpush1.bf16.msra.mxu0 %v7144_v62  ;;  %1588 = vmatpush1.bf16.msra.mxu1 %v7151_v2 }
 0x1cd   :  { %1546 = vmatprep.subr.bf16.mxu0 %v7149_v1  ;;  %1589 = vmatprep.subr.bf16.mxu1 %v7154_v3 }
 0x1d0   :  { %1547 = vmatpush1.bf16.msra.mxu0 %v7158_v4  ;;  %1590 = vmatpush1.bf16.msra.mxu1 %v7162_v5 }
 0x286   :  { %v1228_v36 = vpop.f32.mrb[4].mxu0  ;;  %v1271_v37 = vpop.f32.mrb[4].mxu1 }
 0x287   :  { %v5747_v38 = vadd.f32 %v1228_v36, %v7238_v15  ;;  %v1230_v40 = vpop.f32.mrb[5].mxu0  ;;  %v1273_v41 = vpop.f32.mrb[5].mxu1  ;;  %v5779_v23 = vadd.f32 %v1271_v37, %v7258_v9 }
 0x288   :  { %v5748_v44 = vadd.f32 %v1230_v40, %v7242_v16  ;;  %v1232_v45 = vpop.f32.mrb[6].mxu0  ;;  %v1275_v49 = vpop.f32.mrb[6].mxu1  ;;  %v5780_v6 = vadd.f32 %v1273_v41, %v7249_v24 }
 0x289   :  { %v1288_v50 = vsub.f32 0.0, %v5747_v38  ;;  %v5749_v53 = vadd.f32 %v1232_v45, %v7238_v15  ;;  %v1234_v32 = vpop.f32.mrb[7].mxu0  ;;  %v1277_v19 = vpop.f32.mrb[7].mxu1  ;;  %v5781_v13 = vadd.f32 %v1275_v49, %v7258_v9 }
 0x28a   :  { %v1298_v33 = vsub.f32 0.0, %v5748_v44  ;;  %v5750_v35 = vadd.f32 %v1234_v32, %v7242_v16  ;;  %v5782_v8 = vadd.f32 %v1277_v19, %v7249_v24  ;;  %v1310_v20 = vsub.f32 0.0, %v5780_v6 }
 0x28b   :  { %v1290_v43 = vmul.f32 1.442695, %v1288_v50  ;;  %v1289_v52 = vsub.f32 0.0, %v5749_v53 }
 0x28c   :  { %v1300_v61 = vmul.f32 1.442695, %v1298_v33  ;;  %v1299_v7 = vsub.f32 0.0, %v5750_v35  ;;  %v1311_v21 = vsub.f32 0.0, %v5782_v8  ;;  %v1312_v25 = vmul.f32 1.442695, %v1310_v20 }
 0x28d   :  { %6314 = vpow2.f32 %v1290_v43  ;;  %v1292_v26 = vmul.f32 1.442695, %v1289_v52 }
 0x28e   :  { %6316 = vpow2.f32 %v1300_v61  ;;  %v1302_v10 = vmul.f32 1.442695, %v1299_v7  ;;  %v1314_v27 = vmul.f32 1.442695, %v1311_v21 }
 0x28f   :  { %6318 = vpow2.f32 %v1292_v26 }
 0x290   :  { %6320 = vpow2.f32 %v1302_v10 }
 0x291   :  { %6322 = vtanh.f32 %v5779_v23 }
 0x292   :  { %6324 = vpow2.f32 %v1312_v25 }
 0x293   :  { %6326 = vpow2.f32 %v1314_v27 }
 0x297   :  { %v6315_v28 = vpop.eup %6314 }
 0x298   :  { %v6317_v29 = vpop.eup %6316  ;;  %v1294_v30 = vadd.f32 1.0, %v6315_v28  ;;  %v7328_v28 = vld [vmem:[#allocation6 + $0xc] ss:$16 sps:$4 sm:$0xff]  }
 0x299   :  { %v1304_v36 = vadd.f32 1.0, %v6317_v29  ;;  %v6319_v38 = vpop.eup %6318  ;;  %v7330_v29 = vld [vmem:[#allocation6] ss:$16 sps:$4 sm:$0xff]   ;;  %1913 = vmatprep.subr.bf16.mxu1 %v7328_v28 }
 0x29a   :  { %6328 = vrcp.f32 %v1294_v30  ;;  %v6321_v40 = vpop.eup %6320  ;;  %v1295_v41 = vadd.f32 1.0, %v6319_v38  ;;  %v7332_v30 = vld [vmem:[#allocation6 + $0x8] ss:$16 sps:$4 sm:$0xff]   ;;  %v7346_v38 = vld [vmem:[#allocation6 + $0x44] ss:$16 sps:$4 sm:$0xff]  }
 0x29b   :  { %6330 = vrcp.f32 %v1304_v36  ;;  %v1305_v44 = vadd.f32 1.0, %v6321_v40  ;;  %v6323_v37 = vpop.eup %6322  ;;  %v7341_v36 = vld [vmem:[#allocation6 + $0x20] ss:$16 sps:$4 sm:$0xff]  }
 0x29c   :  { %6332 = vtanh.f32 %v5781_v13  ;;  %v6325_v45 = vpop.eup %6324  ;;  %v7338_v13 = vld [vmem:[#allocation6 + $0x24] ss:$16 sps:$4 sm:$0xff]   ;;  %v7349_v40 = vld [vmem:[#allocation6 + $0x40] ss:$16 sps:$4 sm:$0xff]  }
 0x29d   :  { %6334 = vrcp.f32 %v1295_v41  ;;  %v6327_v50 = vpop.eup %6326  ;;  %v1316_v35 = vadd.f32 1.0, %v6325_v45  ;;  %v7357_v41 = vld [vmem:[#allocation6 + $0x60] ss:$16 sps:$4 sm:$0xff]  }
 0x29e   :  { %6336 = vrcp.f32 %v1305_v44  ;;  %v1317_v7 = vadd.f32 1.0, %v6327_v50 }
 0x29f   :  { %6338 = vrcp.f32 %v1316_v35 }
 0x2a4   :  { %v6329_v53 = vpop.eup %6328 }
 0x2a5   :  { %v6331_v32 = vpop.eup %6330  ;;  %v1322_v19 = vmul.f32 %v6329_v53, %v6323_v37 }
 0x2a6   :  { %v6333_v33 = vpop.eup %6332  ;;  %v1320_v49 = vmul.f32 %v6331_v32, %v7262_v18 }
 0x2a7   :  { %v6335_v43 = vpop.eup %6334 }
 0x2a8   :  { %v6337_v52 = vpop.eup %6336  ;;  %v7313_v61 = vadd.f32 %v1322_v19, %v1320_v49  ;;  %v1323_v6 = vmul.f32 %v6335_v43, %v6333_v33 }
 0x2a9   :  { %v1321_v26 = vmul.f32 %v6337_v52, %v7265_v22  ;;  %v6339_v10 = vpop.eup %6338  ;;  %v7326_v22 = vld [vmem:[#allocation6 + $0x4] ss:$16 sps:$4 sm:$0xff]  }
 0x2aa   :  { %6340 = vtanh.f32 %v7313_v61  ;;  %1870 = vmatprep.subr.bf16.mxu0 %v7326_v22 }
 0x2ab   :  { %v7317_v8 = vadd.f32 %v1323_v6, %v1321_v26  ;;  %6342 = vrcp.f32 %v1317_v7 }
 0x2ad   :  { %6344 = vtanh.f32 %v7317_v8 }
 0x2b4   :  { %v6341_v20 = vpop.eup %6340 }
 0x2b5   :  { %v6343_v18 = vpop.eup %6342  ;;  %v1328_v23 = vmul.f32 %v6341_v20, %v6339_v10 }
 0x2b7   :  { %v6345_v21 = vpop.eup %6344 }
 0x2b8   :  { %v1329_v25 = vmul.f32 %v6345_v21, %v6343_v18 }
 0x2ba   :  { %v7320_v27 = vpack.c.bf16 %v1329_v25, %v1328_v23 }
 0x2bc   :  { %1565 = vmatmul.mubr.bf16.vlgmr.msra.gmra.mrb[8].mxu0 %v7320_v27  ;;  %1608 = vmatmul.mubr.bf16.vlgmr.msra.gmra.mrb[8].mxu1 %v7320_v27 }
 0x2bd   :  { %1902 = vmatprep.mubr.bf16.mxu0 %v6926_v0  ;;  %1945 = vmatprep.mubr.bf16.mxu1 %v6926_v0 }
 0x2be   :  { %1871 = vmatpush1.bf16.msra.mxu0 %v7330_v29  ;;  %1914 = vmatpush1.bf16.msra.mxu1 %v7332_v30 }
 0x2bf   :  { %1915 = vmatprep.subr.bf16.mxu1 %v7070_v39  ;;  %1872 = vmatprep.subr.bf16.mxu0 %v7338_v13  ;;  %v7354_v39 = vld [vmem:[#allocation6 + $0x64] ss:$16 sps:$4 sm:$0xff]  }
 0x2c2   :  { %1873 = vmatpush1.bf16.msra.mxu0 %v7341_v36  ;;  %1916 = vmatpush1.bf16.msra.mxu1 %v7081_v42  ;;  %v7362_v42 = vld [vmem:[#allocation6 + $0x84] ss:$16 sps:$4 sm:$0xff]  }
 0x2c3   :  { %1917 = vmatprep.subr.bf16.mxu1 %v7093_v46  ;;  %1874 = vmatprep.subr.bf16.mxu0 %v7346_v38  ;;  %v7365_v46 = vld [vmem:[#allocation6 + $0x80] ss:$16 sps:$4 sm:$0xff]  }
 0x2c6   :  { %1875 = vmatpush1.bf16.msra.mxu0 %v7349_v40  ;;  %1918 = vmatpush1.bf16.msra.mxu1 %v7096_v47 }
 0x2c7   :  { %1919 = vmatprep.subr.bf16.mxu1 %v7098_v48  ;;  %1876 = vmatprep.subr.bf16.mxu0 %v7354_v39 }
 0x2ca   :  { %1877 = vmatpush1.bf16.msra.mxu0 %v7357_v41  ;;  %1920 = vmatpush1.bf16.msra.mxu1 %v7110_v51 }
 0x2cb   :  { %1921 = vmatprep.subr.bf16.mxu1 %v7119_v54  ;;  %1878 = vmatprep.subr.bf16.mxu0 %v7362_v42 }
 0x2ce   :  { %1879 = vmatpush1.bf16.msra.mxu0 %v7365_v46  ;;  %1922 = vmatpush1.bf16.msra.mxu1 %v7125_v56 }
 0x2cf   :  { %1880 = vmatprep.subr.bf16.mxu0 %v7122_v55  ;;  %1923 = vmatprep.subr.bf16.mxu1 %v7127_v57 }
 0x2d2   :  { %1881 = vmatpush1.bf16.msra.mxu0 %v7129_v58  ;;  %1924 = vmatpush1.bf16.msra.mxu1 %v7135_v60 }
 0x2d3   :  { %1882 = vmatprep.subr.bf16.mxu0 %v7133_v59  ;;  %1925 = vmatprep.subr.bf16.mxu1 %v7147_v63 }
 0x2d6   :  { %1883 = vmatpush1.bf16.msra.mxu0 %v7144_v62  ;;  %1926 = vmatpush1.bf16.msra.mxu1 %v7151_v2 }
 0x2d7   :  { %1884 = vmatprep.subr.bf16.mxu0 %v7149_v1  ;;  %1927 = vmatprep.subr.bf16.mxu1 %v7154_v3 }
 0x2da   :  { %1885 = vmatpush1.bf16.msra.mxu0 %v7158_v4  ;;  %1928 = vmatpush1.bf16.msra.mxu1 %v7162_v5 }
 0x2db   :  { %2208 = vmatprep.subr.bf16.mxu0 %v7326_v22  ;;  %2251 = vmatprep.subr.bf16.mxu1 %v7328_v28 }
 0x38f   :  { %v1566_v47 = vpop.f32.mrb[8].mxu0  ;;  %v1609_v48 = vpop.f32.mrb[8].mxu1 }
 0x390   :  { %v5751_v51 = vadd.f32 %v1566_v47, %v7238_v15  ;;  %v1568_v54 = vpop.f32.mrb[9].mxu0  ;;  %v1611_v55 = vpop.f32.mrb[9].mxu1  ;;  %v5783_v33 = vadd.f32 %v1609_v48, %v7258_v9 }
 0x391   :  { %v5752_v56 = vadd.f32 %v1568_v54, %v7242_v16  ;;  %v1570_v57 = vpop.f32.mrb[10].mxu0  ;;  %v1613_v58 = vpop.f32.mrb[10].mxu1  ;;  %v5784_v44 = vadd.f32 %v1611_v55, %v7249_v24 }
 0x392   :  { %v1626_v59 = vsub.f32 0.0, %v5751_v51  ;;  %v5753_v60 = vadd.f32 %v1570_v57, %v7238_v15  ;;  %v1572_v62 = vpop.f32.mrb[11].mxu0  ;;  %v1615_v63 = vpop.f32.mrb[11].mxu1  ;;  %v5785_v7 = vadd.f32 %v1613_v58, %v7258_v9 }
 0x393   :  { %v1636_v1 = vsub.f32 0.0, %v5752_v56  ;;  %v5754_v2 = vadd.f32 %v1572_v62, %v7242_v16  ;;  %v5786_v50 = vadd.f32 %v1615_v63, %v7249_v24  ;;  %v1648_v32 = vsub.f32 0.0, %v5784_v44 }
 0x394   :  { %v1628_v3 = vmul.f32 1.442695, %v1626_v59  ;;  %v1627_v4 = vsub.f32 0.0, %v5753_v60 }
 0x395   :  { %v1638_v5 = vmul.f32 1.442695, %v1636_v1  ;;  %v1637_v37 = vsub.f32 0.0, %v5754_v2  ;;  %v1649_v19 = vsub.f32 0.0, %v5786_v50  ;;  %v1650_v49 = vmul.f32 1.442695, %v1648_v32 }
 0x396   :  { %6346 = vpow2.f32 %v1628_v3  ;;  %v1630_v45 = vmul.f32 1.442695, %v1627_v4  ;;  %v7418_v50 = vld [vmem:[#allocation6 + $0x28] ss:$16 sps:$4 sm:$0xff]  }
 0x397   :  { %6348 = vpow2.f32 %v1638_v5  ;;  %v1640_v53 = vmul.f32 1.442695, %v1637_v37  ;;  %v1652_v35 = vmul.f32 1.442695, %v1649_v19  ;;  %v7424_v32 = vld [vmem:[#allocation6 + $0x48] ss:$16 sps:$4 sm:$0xff]  }
 0x398   :  { %6350 = vpow2.f32 %v1630_v45  ;;  %v7428_v19 = vld [vmem:[#allocation6 + $0x6c] ss:$16 sps:$4 sm:$0xff]  }
 0x399   :  { %6352 = vpow2.f32 %v1640_v53  ;;  %v7422_v53 = vld [vmem:[#allocation6 + $0x4c] ss:$16 sps:$4 sm:$0xff]  }
 0x39a   :  { %6354 = vtanh.f32 %v5783_v33  ;;  %v7430_v33 = vld [vmem:[#allocation6 + $0x68] ss:$16 sps:$4 sm:$0xff]  }
 0x39b   :  { %6356 = vpow2.f32 %v1650_v49  ;;  %v7434_v49 = vld [vmem:[#allocation6 + $0x8c] ss:$16 sps:$4 sm:$0xff]  }
 0x39c   :  { %6358 = vpow2.f32 %v1652_v35  ;;  %v7436_v35 = vld [vmem:[#allocation6 + $0x88] ss:$16 sps:$4 sm:$0xff]  }
 0x3a0   :  { %v6347_v43 = vpop.eup %6346 }
 0x3a1   :  { %v6349_v52 = vpop.eup %6348  ;;  %v1632_v6 = vadd.f32 1.0, %v6347_v43  ;;  %v7439_v43 = vld [vmem:[#allocation6 + $0xa0] ss:$16 sps:$4 sm:$0xff]  }
 0x3a2   :  { %v1642_v26 = vadd.f32 1.0, %v6349_v52  ;;  %v6351_v10 = vpop.eup %6350  ;;  %v7441_v52 = vld [vmem:[#allocation6 + $0xa4] ss:$16 sps:$4 sm:$0xff]  }
 0x3a3   :  { %6360 = vrcp.f32 %v1632_v6  ;;  %v6353_v20 = vpop.eup %6352  ;;  %v1633_v18 = vadd.f32 1.0, %v6351_v10  ;;  %v7444_v6 = vld [vmem:[#allocation6 + $0xa8] ss:$16 sps:$4 sm:$0xff]   ;;  %v7451_v10 = vld [vmem:[#allocation6 + $0xcc] ss:$16 sps:$4 sm:$0xff]  }
 0x3a4   :  { %6362 = vrcp.f32 %v1642_v26  ;;  %v1643_v21 = vadd.f32 1.0, %v6353_v20  ;;  %v6355_v23 = vpop.eup %6354  ;;  %v7448_v26 = vld [vmem:[#allocation6 + $0xc4] ss:$16 sps:$4 sm:$0xff]   ;;  %v7455_v20 = vld [vmem:[#allocation6 + $0xc0] ss:$16 sps:$4 sm:$0xff]  }
 0x3a5   :  { %6364 = vtanh.f32 %v5785_v7  ;;  %v6357_v25 = vpop.eup %6356  ;;  %v7446_v7 = vld [vmem:[#allocation6 + $0xac] ss:$16 sps:$4 sm:$0xff]  }
 0x3a6   :  { %6366 = vrcp.f32 %v1633_v18  ;;  %v6359_v47 = vpop.eup %6358  ;;  %v1654_v57 = vadd.f32 1.0, %v6357_v25  ;;  %v7458_v18 = vld [vmem:[#allocation6 + $0xe4] ss:$16 sps:$4 sm:$0xff]   ;;  %v7467_v25 = vld [vmem:[#allocation6 + $0xe0] ss:$16 sps:$4 sm:$0xff]  }
 0x3a7   :  { %6368 = vrcp.f32 %v1643_v21  ;;  %v1655_v63 = vadd.f32 1.0, %v6359_v47  ;;  %v7461_v21 = vld [vmem:[#allocation6 + $0xc8] ss:$16 sps:$4 sm:$0xff]  }
 0x3a8   :  { %6370 = vrcp.f32 %v1654_v57  ;;  %v7471_v47 = vld [vmem:[#allocation6 + $0xe8] ss:$16 sps:$4 sm:$0xff]  }
 0x3ad   :  { %v6361_v48 = vpop.eup %6360 }
 0x3ae   :  { %v6363_v51 = vpop.eup %6362  ;;  %v1660_v54 = vmul.f32 %v6361_v48, %v6355_v23  ;;  %v7464_v23 = vld [vmem:[#allocation6 + $0xec] ss:$16 sps:$4 sm:$0xff]  }
 0x3af   :  { %v6365_v55 = vpop.eup %6364  ;;  %v1658_v56 = vmul.f32 %v6363_v51, %v7313_v61 }
 0x3b0   :  { %v6367_v58 = vpop.eup %6366 }
 0x3b1   :  { %v6369_v59 = vpop.eup %6368  ;;  %v7393_v60 = vadd.f32 %v1660_v54, %v1658_v56  ;;  %v1661_v62 = vmul.f32 %v6367_v58, %v6365_v55 }
 0x3b2   :  { %v1659_v1 = vmul.f32 %v6369_v59, %v7317_v8  ;;  %v6371_v3 = vpop.eup %6370  ;;  %v7416_v8 = vld [vmem:[#allocation6 + $0x2c] ss:$16 sps:$4 sm:$0xff]  }
 0x3b3   :  { %6372 = vtanh.f32 %v7393_v60 }
 0x3b4   :  { %v7397_v2 = vadd.f32 %v1661_v62, %v1659_v1  ;;  %6374 = vrcp.f32 %v1655_v63 }
 0x3b6   :  { %6376 = vtanh.f32 %v7397_v2 }
 0x3bd   :  { %v6373_v4 = vpop.eup %6372 }
 0x3be   :  { %v6375_v61 = vpop.eup %6374  ;;  %v1666_v44 = vmul.f32 %v6373_v4, %v6371_v3 }
 0x3c0   :  { %v6377_v5 = vpop.eup %6376 }
 0x3c1   :  { %v1667_v37 = vmul.f32 %v6377_v5, %v6375_v61 }
 0x3c3   :  { %v7400_v45 = vpack.c.bf16 %v1667_v37, %v1666_v44 }
 0x3c5   :  { %1903 = vmatmul.mubr.bf16.vlgmr.msra.gmra.mrb[12].mxu0 %v7400_v45  ;;  %1946 = vmatmul.mubr.bf16.vlgmr.msra.gmra.mrb[12].mxu1 %v7400_v45 }
 0x3c6   :  { %2209 = vmatpush1.bf16.msra.mxu0 %v7330_v29  ;;  %2252 = vmatpush1.bf16.msra.mxu1 %v7332_v30 }
 0x3c7   :  { %2210 = vmatprep.subr.bf16.mxu0 %v7338_v13  ;;  %2240 = vmatprep.mubr.bf16.mxu0 %v6926_v0 }
 0x3c8   :  { %2283 = vmatprep.mubr.bf16.mxu1 %v6926_v0  ;;  %2253 = vmatprep.subr.bf16.mxu1 %v7416_v8 }
 0x3ca   :  { %2211 = vmatpush1.bf16.msra.mxu0 %v7341_v36  ;;  %2254 = vmatpush1.bf16.msra.mxu1 %v7418_v50 }
 0x3cb   :  { %2212 = vmatprep.subr.bf16.mxu0 %v7346_v38  ;;  %2255 = vmatprep.subr.bf16.mxu1 %v7422_v53 }
 0x3ce   :  { %2213 = vmatpush1.bf16.msra.mxu0 %v7349_v40  ;;  %2256 = vmatpush1.bf16.msra.mxu1 %v7424_v32 }
 0x3cf   :  { %2214 = vmatprep.subr.bf16.mxu0 %v7354_v39  ;;  %2257 = vmatprep.subr.bf16.mxu1 %v7428_v19 }
 0x3d2   :  { %2215 = vmatpush1.bf16.msra.mxu0 %v7357_v41  ;;  %2258 = vmatpush1.bf16.msra.mxu1 %v7430_v33 }
 0x3d3   :  { %2216 = vmatprep.subr.bf16.mxu0 %v7362_v42  ;;  %2259 = vmatprep.subr.bf16.mxu1 %v7434_v49 }
 0x3d6   :  { %2217 = vmatpush1.bf16.msra.mxu0 %v7365_v46  ;;  %2260 = vmatpush1.bf16.msra.mxu1 %v7436_v35 }
 0x3d7   :  { %2218 = vmatprep.subr.bf16.mxu0 %v7441_v52  ;;  %2261 = vmatprep.subr.bf16.mxu1 %v7446_v7 }
 0x3da   :  { %2219 = vmatpush1.bf16.msra.mxu0 %v7439_v43  ;;  %2262 = vmatpush1.bf16.msra.mxu1 %v7444_v6 }
 0x3db   :  { %2220 = vmatprep.subr.bf16.mxu0 %v7448_v26  ;;  %2263 = vmatprep.subr.bf16.mxu1 %v7451_v10 }
 0x3de   :  { %2221 = vmatpush1.bf16.msra.mxu0 %v7455_v20  ;;  %2264 = vmatpush1.bf16.msra.mxu1 %v7461_v21 }
 0x3df   :  { %2222 = vmatprep.subr.bf16.mxu0 %v7458_v18  ;;  %2265 = vmatprep.subr.bf16.mxu1 %v7464_v23 }
 0x3e2   :  { %2223 = vmatpush1.bf16.msra.mxu0 %v7467_v25  ;;  %2266 = vmatpush1.bf16.msra.mxu1 %v7471_v47 }
 0x3e3   :  { %2546 = vmatprep.subr.bf16.mxu0 %v7326_v22  ;;  %2589 = vmatprep.subr.bf16.mxu1 %v7328_v28 }
 0x498   :  { %v1904_v48 = vpop.f32.mrb[12].mxu0  ;;  %v1947_v51 = vpop.f32.mrb[12].mxu1 }
 0x499   :  { %v5755_v54 = vadd.f32 %v1904_v48, %v7238_v15  ;;  %v1906_v55 = vpop.f32.mrb[13].mxu0  ;;  %v1949_v56 = vpop.f32.mrb[13].mxu1 }
 0x49a   :  { %v5756_v57 = vadd.f32 %v1906_v55, %v7242_v16  ;;  %v1908_v58 = vpop.f32.mrb[14].mxu0  ;;  %v1951_v59 = vpop.f32.mrb[14].mxu1  ;;  %v5788_v34 = vadd.f32 %v1949_v56, %v7249_v24 }
 0x49b   :  { %v1964_v62 = vsub.f32 0.0, %v5755_v54  ;;  %v5757_v63 = vadd.f32 %v1908_v58, %v7238_v15  ;;  %v1910_v1 = vpop.f32.mrb[15].mxu0  ;;  %v1953_v3 = vpop.f32.mrb[15].mxu1  ;;  %v5789_v56 = vadd.f32 %v1951_v59, %v7258_v9 }
 0x49c   :  { %v1974_v4 = vsub.f32 0.0, %v5756_v57  ;;  %v5758_v61 = vadd.f32 %v1910_v1, %v7242_v16  ;;  %v5790_v55 = vadd.f32 %v1953_v3, %v7249_v24  ;;  %v1986_v54 = vsub.f32 0.0, %v5788_v34 }
 0x49d   :  { %v1966_v5 = vmul.f32 1.442695, %v1964_v62  ;;  %v1965_v44 = vsub.f32 0.0, %v5757_v63  ;;  %v5787_v57 = vadd.f32 %v1947_v51, %v7258_v9 }
 0x49e   :  { %v1976_v37 = vmul.f32 1.442695, %v1974_v4  ;;  %v1975_v48 = vsub.f32 0.0, %v5758_v61  ;;  %v1987_v58 = vsub.f32 0.0, %v5790_v55  ;;  %v1988_v12 = vmul.f32 1.442695, %v1986_v54 }
 0x49f   :  { %6378 = vpow2.f32 %v1966_v5  ;;  %v1968_v17 = vmul.f32 1.442695, %v1965_v44 }
 0x4a0   :  { %6380 = vpow2.f32 %v1976_v37  ;;  %v1978_v14 = vmul.f32 1.442695, %v1975_v48  ;;  %v1990_v1 = vmul.f32 1.442695, %v1987_v58 }
 0x4a1   :  { %6382 = vpow2.f32 %v1968_v17 }
 0x4a2   :  { %6384 = vpow2.f32 %v1978_v14 }
 0x4a3   :  { %6386 = vtanh.f32 %v5787_v57 }
 0x4a4   :  { %6388 = vpow2.f32 %v1988_v12 }
 0x4a5   :  { %6390 = vpow2.f32 %v1990_v1 }
 0x4a9   :  { %v6379_v62 = vpop.eup %6378 }
 0x4aa   :  { %v6381_v63 = vpop.eup %6380  ;;  %v1970_v4 = vadd.f32 1.0, %v6379_v62 }
 0x4ab   :  { %v1980_v61 = vadd.f32 1.0, %v6381_v63  ;;  %v6383_v3 = vpop.eup %6382 }
 0x4ac   :  { %6392 = vrcp.f32 %v1970_v4  ;;  %v6385_v5 = vpop.eup %6384  ;;  %v1971_v17 = vadd.f32 1.0, %v6383_v3 }
 0x4ad   :  { %6394 = vrcp.f32 %v1980_v61  ;;  %v1981_v14 = vadd.f32 1.0, %v6385_v5  ;;  %v6387_v34 = vpop.eup %6386 }
 0x4ae   :  { %6396 = vtanh.f32 %v5789_v56  ;;  %v6389_v51 = vpop.eup %6388 }
 0x4af   :  { %6398 = vrcp.f32 %v1971_v17  ;;  %v6391_v44 = vpop.eup %6390  ;;  %v1992_v54 = vadd.f32 1.0, %v6389_v51 }
 0x4b0   :  { %6400 = vrcp.f32 %v1981_v14  ;;  %v1993_v63 = vadd.f32 1.0, %v6391_v44 }
 0x4b1   :  { %6402 = vrcp.f32 %v1992_v54 }
 0x4b6   :  { %v6393_v37 = vpop.eup %6392 }
 0x4b7   :  { %v6395_v48 = vpop.eup %6394  ;;  %v1998_v55 = vmul.f32 %v6393_v37, %v6387_v34 }
 0x4b8   :  { %v6397_v12 = vpop.eup %6396  ;;  %v1996_v59 = vmul.f32 %v6395_v48, %v7393_v60 }
 0x4b9   :  { %v6399_v58 = vpop.eup %6398 }
 0x4ba   :  { %v6401_v57 = vpop.eup %6400  ;;  %v7487_v1 = vadd.f32 %v1998_v55, %v1996_v59  ;;  %v1999_v62 = vmul.f32 %v6399_v58, %v6397_v12 }
 0x4bb   :  { %v1997_v4 = vmul.f32 %v6401_v57, %v7397_v2  ;;  %v6403_v61 = vpop.eup %6402 }
 0x4bc   :  { %6404 = vtanh.f32 %v7487_v1 }
 0x4bd   :  { %v7491_v56 = vadd.f32 %v1999_v62, %v1997_v4  ;;  %6406 = vrcp.f32 %v1993_v63 }
 0x4bf   :  { %6408 = vtanh.f32 %v7491_v56 }
 0x4c6   :  { %v6405_v3 = vpop.eup %6404 }
 0x4c7   :  { %v6407_v60 = vpop.eup %6406  ;;  %v2004_v17 = vmul.f32 %v6405_v3, %v6403_v61 }
 0x4c9   :  { %v6409_v5 = vpop.eup %6408 }
 0x4ca   :  { %v2005_v14 = vmul.f32 %v6409_v5, %v6407_v60 }
 0x4cc   :  { %v7494_v34 = vpack.c.bf16 %v2005_v14, %v2004_v17 }
 0x4ce   :  { %2241 = vmatmul.mubr.bf16.vlgmr.msra.gmra.mrb[16].mxu0 %v7494_v34  ;;  %2284 = vmatmul.mubr.bf16.vlgmr.msra.gmra.mrb[16].mxu1 %v7494_v34 }
 0x4cf   :  { %2547 = vmatpush1.bf16.msra.mxu0 %v7330_v29  ;;  %2590 = vmatpush1.bf16.msra.mxu1 %v7332_v30 }
 0x4d0   :  { %2548 = vmatprep.subr.bf16.mxu0 %v7338_v13  ;;  %2591 = vmatprep.subr.bf16.mxu1 %v7416_v8 }
 0x4d1   :  { %2578 = vmatprep.mubr.bf16.mxu0 %v6926_v0  ;;  %2621 = vmatprep.mubr.bf16.mxu1 %v6926_v0 }
 0x4d3   :  { %2549 = vmatpush1.bf16.msra.mxu0 %v7341_v36  ;;  %2592 = vmatpush1.bf16.msra.mxu1 %v7418_v50 }
 0x4d4   :  { %2550 = vmatprep.subr.bf16.mxu0 %v7346_v38  ;;  %2593 = vmatprep.subr.bf16.mxu1 %v7422_v53 }
 0x4d7   :  { %2551 = vmatpush1.bf16.msra.mxu0 %v7349_v40  ;;  %2594 = vmatpush1.bf16.msra.mxu1 %v7424_v32 }
 0x4d8   :  { %2552 = vmatprep.subr.bf16.mxu0 %v7354_v39  ;;  %2595 = vmatprep.subr.bf16.mxu1 %v7428_v19 }
 0x4db   :  { %2553 = vmatpush1.bf16.msra.mxu0 %v7357_v41  ;;  %2596 = vmatpush1.bf16.msra.mxu1 %v7430_v33 }
 0x4dc   :  { %2554 = vmatprep.subr.bf16.mxu0 %v7362_v42  ;;  %2597 = vmatprep.subr.bf16.mxu1 %v7434_v49 }
 0x4df   :  { %2555 = vmatpush1.bf16.msra.mxu0 %v7365_v46  ;;  %2598 = vmatpush1.bf16.msra.mxu1 %v7436_v35 }
 0x4e0   :  { %2556 = vmatprep.subr.bf16.mxu0 %v7441_v52  ;;  %2599 = vmatprep.subr.bf16.mxu1 %v7446_v7 }
 0x4e3   :  { %2557 = vmatpush1.bf16.msra.mxu0 %v7439_v43  ;;  %2600 = vmatpush1.bf16.msra.mxu1 %v7444_v6 }
 0x4e4   :  { %2558 = vmatprep.subr.bf16.mxu0 %v7448_v26  ;;  %2601 = vmatprep.subr.bf16.mxu1 %v7451_v10 }
 0x4e7   :  { %2559 = vmatpush1.bf16.msra.mxu0 %v7455_v20  ;;  %2602 = vmatpush1.bf16.msra.mxu1 %v7461_v21 }
 0x4e8   :  { %2560 = vmatprep.subr.bf16.mxu0 %v7458_v18  ;;  %2603 = vmatprep.subr.bf16.mxu1 %v7464_v23 }
 0x4eb   :  { %2561 = vmatpush1.bf16.msra.mxu0 %v7467_v25  ;;  %2604 = vmatpush1.bf16.msra.mxu1 %v7471_v47 }
 0x4ec   :  { %2884 = vmatprep.subr.bf16.mxu0 %v7326_v22  ;;  %2927 = vmatprep.subr.bf16.mxu1 %v7328_v28 }
 0x5a1   :  { %v2242_v2 = vpop.f32.mrb[16].mxu0  ;;  %v2285_v51 = vpop.f32.mrb[16].mxu1 }
 0x5a2   :  { %v5759_v44 = vadd.f32 %v2242_v2, %v7238_v15  ;;  %v2244_v37 = vpop.f32.mrb[17].mxu0  ;;  %v2287_v48 = vpop.f32.mrb[17].mxu1 }
 0x5a3   :  { %v5760_v55 = vadd.f32 %v2244_v37, %v7242_v16  ;;  %v2246_v12 = vpop.f32.mrb[18].mxu0  ;;  %v2289_v59 = vpop.f32.mrb[18].mxu1  ;;  %v5792_v3 = vadd.f32 %v2287_v48, %v7249_v24  ;;  %v5791_v37 = vadd.f32 %v2285_v51, %v7258_v9 }
 0x5a4   :  { %v2302_v54 = vsub.f32 0.0, %v5759_v44  ;;  %v5761_v58 = vadd.f32 %v2246_v12, %v7238_v15  ;;  %v2248_v57 = vpop.f32.mrb[19].mxu0  ;;  %v2291_v62 = vpop.f32.mrb[19].mxu1  ;;  %v5793_v48 = vadd.f32 %v2289_v59, %v7258_v9 }
 0x5a5   :  { %v2312_v63 = vsub.f32 0.0, %v5760_v55  ;;  %v5762_v22 = vadd.f32 %v2248_v57, %v7242_v16  ;;  %v5794_v17 = vadd.f32 %v2291_v62, %v7249_v24  ;;  %v2324_v2 = vsub.f32 0.0, %v5792_v3 }
 0x5a6   :  { %v2304_v4 = vmul.f32 1.442695, %v2302_v54  ;;  %v2303_v28 = vsub.f32 0.0, %v5761_v58 }
 0x5a7   :  { %v2314_v61 = vmul.f32 1.442695, %v2312_v63  ;;  %v2313_v60 = vsub.f32 0.0, %v5762_v22  ;;  %v2325_v44 = vsub.f32 0.0, %v5794_v17  ;;  %v2326_v55 = vmul.f32 1.442695, %v2324_v2 }
 0x5a8   :  { %6410 = vpow2.f32 %v2304_v4  ;;  %v2306_v5 = vmul.f32 1.442695, %v2303_v28 }
 0x5a9   :  { %6412 = vpow2.f32 %v2314_v61  ;;  %v2316_v14 = vmul.f32 1.442695, %v2313_v60  ;;  %v2328_v12 = vmul.f32 1.442695, %v2325_v44 }
 0x5aa   :  { %6414 = vpow2.f32 %v2306_v5 }
 0x5ab   :  { %6416 = vpow2.f32 %v2316_v14 }
 0x5ac   :  { %6418 = vtanh.f32 %v5791_v37 }
 0x5ad   :  { %6420 = vpow2.f32 %v2326_v55 }
 0x5ae   :  { %6422 = vpow2.f32 %v2328_v12 }
 0x5b2   :  { %v6411_v54 = vpop.eup %6410 }
 0x5b3   :  { %v6413_v58 = vpop.eup %6412  ;;  %v2308_v57 = vadd.f32 1.0, %v6411_v54 }
 0x5b4   :  { %v2318_v63 = vadd.f32 1.0, %v6413_v58  ;;  %v6415_v62 = vpop.eup %6414 }
 0x5b5   :  { %6424 = vrcp.f32 %v2308_v57  ;;  %v6417_v22 = vpop.eup %6416  ;;  %v2309_v4 = vadd.f32 1.0, %v6415_v62 }
 0x5b6   :  { %6426 = vrcp.f32 %v2318_v63  ;;  %v2319_v28 = vadd.f32 1.0, %v6417_v22  ;;  %v6419_v51 = vpop.eup %6418 }
 0x5b7   :  { %6428 = vtanh.f32 %v5793_v48  ;;  %v6421_v61 = vpop.eup %6420 }
 0x5b8   :  { %6430 = vrcp.f32 %v2309_v4  ;;  %v6423_v3 = vpop.eup %6422  ;;  %v2330_v2 = vadd.f32 1.0, %v6421_v61 }
 0x5b9   :  { %6432 = vrcp.f32 %v2319_v28  ;;  %v2331_v54 = vadd.f32 1.0, %v6423_v3 }
 0x5ba   :  { %6434 = vrcp.f32 %v2330_v2 }
 0x5bf   :  { %v6425_v60 = vpop.eup %6424 }
 0x5c0   :  { %v6427_v5 = vpop.eup %6426  ;;  %v2336_v17 = vmul.f32 %v6425_v60, %v6419_v51 }
 0x5c1   :  { %v6429_v14 = vpop.eup %6428  ;;  %v2334_v59 = vmul.f32 %v6427_v5, %v7487_v1 }
 0x5c2   :  { %v6431_v44 = vpop.eup %6430 }
 0x5c3   :  { %v6433_v37 = vpop.eup %6432  ;;  %v7541_v55 = vadd.f32 %v2336_v17, %v2334_v59  ;;  %v2337_v12 = vmul.f32 %v6431_v44, %v6429_v14 }
 0x5c4   :  { %v2335_v58 = vmul.f32 %v6433_v37, %v7491_v56  ;;  %v6435_v48 = vpop.eup %6434 }
 0x5c5   :  { %6436 = vtanh.f32 %v7541_v55 }
 0x5c6   :  { %v7545_v57 = vadd.f32 %v2337_v12, %v2335_v58  ;;  %6438 = vrcp.f32 %v2331_v54 }
 0x5c8   :  { %6440 = vtanh.f32 %v7545_v57 }
 0x5cf   :  { %v6437_v63 = vpop.eup %6436 }
 0x5d0   :  { %v6439_v1 = vpop.eup %6438  ;;  %v2342_v22 = vmul.f32 %v6437_v63, %v6435_v48 }
 0x5d2   :  { %v6441_v62 = vpop.eup %6440 }
 0x5d3   :  { %v2343_v4 = vmul.f32 %v6441_v62, %v6439_v1 }
 0x5d5   :  { %v7548_v28 = vpack.c.bf16 %v2343_v4, %v2342_v22 }
 0x5d7   :  { %2579 = vmatmul.mubr.bf16.vlgmr.msra.gmra.mrb[20].mxu0 %v7548_v28  ;;  %2622 = vmatmul.mubr.bf16.vlgmr.msra.gmra.mrb[20].mxu1 %v7548_v28 }
 0x5d8   :  { %2885 = vmatpush1.bf16.msra.mxu0 %v7330_v29  ;;  %2928 = vmatpush1.bf16.msra.mxu1 %v7332_v30 }
 0x5d9   :  { %2886 = vmatprep.subr.bf16.mxu0 %v7338_v13  ;;  %2929 = vmatprep.subr.bf16.mxu1 %v7416_v8 }
 0x5da   :  { %2916 = vmatprep.mubr.bf16.mxu0 %v6926_v0  ;;  %2959 = vmatprep.mubr.bf16.mxu1 %v6926_v0 }
 0x5dc   :  { %2887 = vmatpush1.bf16.msra.mxu0 %v7341_v36  ;;  %2930 = vmatpush1.bf16.msra.mxu1 %v7418_v50 }
 0x5dd   :  { %2888 = vmatprep.subr.bf16.mxu0 %v7346_v38  ;;  %2931 = vmatprep.subr.bf16.mxu1 %v7422_v53 }
 0x5e0   :  { %2889 = vmatpush1.bf16.msra.mxu0 %v7349_v40  ;;  %2932 = vmatpush1.bf16.msra.mxu1 %v7424_v32 }
 0x5e1   :  { %2890 = vmatprep.subr.bf16.mxu0 %v7354_v39  ;;  %2933 = vmatprep.subr.bf16.mxu1 %v7428_v19 }
 0x5e4   :  { %2891 = vmatpush1.bf16.msra.mxu0 %v7357_v41  ;;  %2934 = vmatpush1.bf16.msra.mxu1 %v7430_v33 }
 0x5e5   :  { %2892 = vmatprep.subr.bf16.mxu0 %v7362_v42  ;;  %2935 = vmatprep.subr.bf16.mxu1 %v7434_v49 }
 0x5e8   :  { %2893 = vmatpush1.bf16.msra.mxu0 %v7365_v46  ;;  %2936 = vmatpush1.bf16.msra.mxu1 %v7436_v35 }
 0x5e9   :  { %2894 = vmatprep.subr.bf16.mxu0 %v7441_v52  ;;  %2937 = vmatprep.subr.bf16.mxu1 %v7446_v7 }
 0x5ec   :  { %2895 = vmatpush1.bf16.msra.mxu0 %v7439_v43  ;;  %2938 = vmatpush1.bf16.msra.mxu1 %v7444_v6 }
 0x5ed   :  { %2896 = vmatprep.subr.bf16.mxu0 %v7448_v26  ;;  %2939 = vmatprep.subr.bf16.mxu1 %v7451_v10 }
 0x5f0   :  { %2897 = vmatpush1.bf16.msra.mxu0 %v7455_v20  ;;  %2940 = vmatpush1.bf16.msra.mxu1 %v7461_v21 }
 0x5f1   :  { %2898 = vmatprep.subr.bf16.mxu0 %v7458_v18  ;;  %2941 = vmatprep.subr.bf16.mxu1 %v7464_v23 }
 0x5f4   :  { %2899 = vmatpush1.bf16.msra.mxu0 %v7467_v25  ;;  %2942 = vmatpush1.bf16.msra.mxu1 %v7471_v47 }
 0x6aa   :  { %v2580_v29 = vpop.f32.mrb[20].mxu0  ;;  %v2623_v30 = vpop.f32.mrb[20].mxu1 }
 0x6ab   :  { %v5763_v13 = vadd.f32 %v2580_v29, %v7238_v15  ;;  %v2582_v36 = vpop.f32.mrb[21].mxu0  ;;  %v2625_v38 = vpop.f32.mrb[21].mxu1  ;;  %v5795_v58 = vadd.f32 %v2623_v30, %v7258_v9 }
 0x6ac   :  { %v5764_v40 = vadd.f32 %v2582_v36, %v7242_v16  ;;  %v2584_v39 = vpop.f32.mrb[22].mxu0  ;;  %v2627_v41 = vpop.f32.mrb[22].mxu1  ;;  %v5796_v14 = vadd.f32 %v2625_v38, %v7249_v24 }
 0x6ad   :  { %v2640_v42 = vsub.f32 0.0, %v5763_v13  ;;  %v5765_v46 = vadd.f32 %v2584_v39, %v7238_v15  ;;  %v2586_v56 = vpop.f32.mrb[23].mxu0  ;;  %v2629_v51 = vpop.f32.mrb[23].mxu1  ;;  %v5797_v4 = vadd.f32 %v2627_v41, %v7258_v9 }
 0x6ae   :  { %v2650_v61 = vsub.f32 0.0, %v5764_v40  ;;  %v5766_v3 = vadd.f32 %v2586_v56, %v7242_v16  ;;  %v5798_v44 = vadd.f32 %v2629_v51, %v7249_v24  ;;  %v2662_v12 = vsub.f32 0.0, %v5796_v14 }
 0x6af   :  { %v2642_v60 = vmul.f32 1.442695, %v2640_v42  ;;  %v2641_v5 = vsub.f32 0.0, %v5765_v46 }
 0x6b0   :  { %v2652_v17 = vmul.f32 1.442695, %v2650_v61  ;;  %v2651_v59 = vsub.f32 0.0, %v5766_v3  ;;  %v2663_v54 = vsub.f32 0.0, %v5798_v44  ;;  %v2664_v48 = vmul.f32 1.442695, %v2662_v12 }
 0x6b1   :  { %6442 = vpow2.f32 %v2642_v60  ;;  %v2644_v2 = vmul.f32 1.442695, %v2641_v5 }
 0x6b2   :  { %6444 = vpow2.f32 %v2652_v17  ;;  %v2654_v37 = vmul.f32 1.442695, %v2651_v59  ;;  %v2666_v63 = vmul.f32 1.442695, %v2663_v54 }
 0x6b3   :  { %6446 = vpow2.f32 %v2644_v2 }
 0x6b4   :  { %6448 = vpow2.f32 %v2654_v37 }
 0x6b5   :  { %6450 = vtanh.f32 %v5795_v58 }
 0x6b6   :  { %6452 = vpow2.f32 %v2664_v48 }
 0x6b7   :  { %6454 = vpow2.f32 %v2666_v63 }
 0x6bb   :  { %v6443_v1 = vpop.eup %6442 }
 0x6bc   :  { %v6445_v62 = vpop.eup %6444  ;;  %v2646_v22 = vadd.f32 1.0, %v6443_v1  ;;  %v6165_v1 = vld [vmem:[#allocation6 + $0xc] ss:$16 sps:$4 sm:$0xff]  }
 0x6bd   :  { %v2656_v29 = vadd.f32 1.0, %v6445_v62  ;;  %v6447_v13 = vpop.eup %6446  ;;  %v6160_v62 = vld [vmem:[#allocation6] ss:$16 sps:$4 sm:$0xff]   ;;  %3265 = vmatprep.subr.bf16.mxu1 %v6165_v1 }
 0x6be   :  { %6456 = vrcp.f32 %v2646_v22  ;;  %v6449_v36 = vpop.eup %6448  ;;  %v2647_v38 = vadd.f32 1.0, %v6447_v13  ;;  %v6163_v22 = vld [vmem:[#allocation6 + $0x8] ss:$16 sps:$4 sm:$0xff]   ;;  %v6171_v13 = vld [vmem:[#allocation6 + $0x44] ss:$16 sps:$4 sm:$0xff]  }
 0x6bf   :  { %6458 = vrcp.f32 %v2656_v29  ;;  %v2657_v40 = vadd.f32 1.0, %v6449_v36  ;;  %v6451_v30 = vpop.eup %6450  ;;  %v6166_v29 = vld [vmem:[#allocation6 + $0x20] ss:$16 sps:$4 sm:$0xff]  }
 0x6c0   :  { %6460 = vtanh.f32 %v5797_v4  ;;  %v6453_v39 = vpop.eup %6452  ;;  %v6168_v4 = vld [vmem:[#allocation6 + $0x24] ss:$16 sps:$4 sm:$0xff]   ;;  %v6169_v36 = vld [vmem:[#allocation6 + $0x40] ss:$16 sps:$4 sm:$0xff]  }
 0x6c1   :  { %6462 = vrcp.f32 %v2647_v38  ;;  %v6455_v42 = vpop.eup %6454  ;;  %v2668_v3 = vadd.f32 1.0, %v6453_v39  ;;  %v6174_v38 = vld [vmem:[#allocation6 + $0x64] ss:$16 sps:$4 sm:$0xff]  }
 0x6c2   :  { %6464 = vrcp.f32 %v2657_v40  ;;  %v2669_v59 = vadd.f32 1.0, %v6455_v42  ;;  %v6172_v40 = vld [vmem:[#allocation6 + $0x60] ss:$16 sps:$4 sm:$0xff]  }
 0x6c3   :  { %6466 = vrcp.f32 %v2668_v3 }
 0x6c8   :  { %v6457_v46 = vpop.eup %6456 }
 0x6c9   :  { %v6459_v56 = vpop.eup %6458  ;;  %v2674_v51 = vmul.f32 %v6457_v46, %v6451_v30 }
 0x6ca   :  { %v6461_v61 = vpop.eup %6460  ;;  %v2672_v41 = vmul.f32 %v6459_v56, %v7541_v55 }
 0x6cb   :  { %v6463_v60 = vpop.eup %6462 }
 0x6cc   :  { %v6465_v5 = vpop.eup %6464  ;;  %v7593_v17 = vadd.f32 %v2674_v51, %v2672_v41  ;;  %v2675_v14 = vmul.f32 %v6463_v60, %v6461_v61 }
 0x6cd   :  { %v2673_v2 = vmul.f32 %v6465_v5, %v7545_v57  ;;  %v6467_v37 = vpop.eup %6466  ;;  %v6162_v57 = vld [vmem:[#allocation6 + $0x4] ss:$16 sps:$4 sm:$0xff]  }
 0x6ce   :  { %6468 = vtanh.f32 %v7593_v17  ;;  %3222 = vmatprep.subr.bf16.mxu0 %v6162_v57 }
 0x6cf   :  { %v7597_v44 = vadd.f32 %v2675_v14, %v2673_v2  ;;  %6470 = vrcp.f32 %v2669_v59 }
 0x6d1   :  { %6472 = vtanh.f32 %v7597_v44 }
 0x6d8   :  { %v6469_v12 = vpop.eup %6468 }
 0x6d9   :  { %v6471_v55 = vpop.eup %6470  ;;  %v2680_v58 = vmul.f32 %v6469_v12, %v6467_v37 }
 0x6db   :  { %v6473_v54 = vpop.eup %6472 }
 0x6dc   :  { %v2681_v48 = vmul.f32 %v6473_v54, %v6471_v55 }
 0x6de   :  { %v7600_v63 = vpack.c.bf16 %v2681_v48, %v2680_v58 }
 0x6e0   :  { %2917 = vmatmul.mubr.bf16.vlgmr.msra.gmra.mrb[24].mxu0 %v7600_v63  ;;  %2960 = vmatmul.mubr.bf16.vlgmr.msra.gmra.mrb[24].mxu1 %v7600_v63 }
 0x6e1   :  { %3254 = vmatprep.mubr.bf16.mxu0 %v6926_v0  ;;  %3297 = vmatprep.mubr.bf16.mxu1 %v6926_v0 }
 0x6e2   :  { %3223 = vmatpush1.bf16.msra.mxu0 %v6160_v62  ;;  %3266 = vmatpush1.bf16.msra.mxu1 %v6163_v22 }
 0x6e3   :  { %3267 = vmatprep.subr.bf16.mxu1 %v7416_v8  ;;  %3224 = vmatprep.subr.bf16.mxu0 %v6168_v4  ;;  %v6177_v8 = vld [vmem:[#allocation6 + $0x84] ss:$16 sps:$4 sm:$0xff]  }
 0x6e6   :  { %3225 = vmatpush1.bf16.msra.mxu0 %v6166_v29  ;;  %3268 = vmatpush1.bf16.msra.mxu1 %v7418_v50  ;;  %v6175_v50 = vld [vmem:[#allocation6 + $0x80] ss:$16 sps:$4 sm:$0xff]  }
 0x6e7   :  { %3269 = vmatprep.subr.bf16.mxu1 %v7422_v53  ;;  %3226 = vmatprep.subr.bf16.mxu0 %v6171_v13  ;;  %v6180_v53 = vld [vmem:[#allocation8 + $0x4] ss:$16 sps:$4 sm:$0xff]  }
 0x6ea   :  { %3227 = vmatpush1.bf16.msra.mxu0 %v6169_v36  ;;  %3270 = vmatpush1.bf16.msra.mxu1 %v7424_v32  ;;  %v6183_v32 = vld [vmem:[#allocation8 + $0xc] ss:$16 sps:$4 sm:$0xff]  }
 0x6eb   :  { %3271 = vmatprep.subr.bf16.mxu1 %v7428_v19  ;;  %3228 = vmatprep.subr.bf16.mxu0 %v6174_v38 }
 0x6ee   :  { %3229 = vmatpush1.bf16.msra.mxu0 %v6172_v40  ;;  %3272 = vmatpush1.bf16.msra.mxu1 %v7430_v33 }
 0x6ef   :  { %3273 = vmatprep.subr.bf16.mxu1 %v7434_v49  ;;  %3230 = vmatprep.subr.bf16.mxu0 %v6177_v8 }
 0x6f2   :  { %3231 = vmatpush1.bf16.msra.mxu0 %v6175_v50  ;;  %3274 = vmatpush1.bf16.msra.mxu1 %v7436_v35 }
 0x6f3   :  { %3232 = vmatprep.subr.bf16.mxu0 %v7441_v52  ;;  %3275 = vmatprep.subr.bf16.mxu1 %v7446_v7 }
 0x6f6   :  { %3233 = vmatpush1.bf16.msra.mxu0 %v7439_v43  ;;  %3276 = vmatpush1.bf16.msra.mxu1 %v7444_v6 }
 0x6f7   :  { %3234 = vmatprep.subr.bf16.mxu0 %v7448_v26  ;;  %3277 = vmatprep.subr.bf16.mxu1 %v7451_v10 }
 0x6fa   :  { %3235 = vmatpush1.bf16.msra.mxu0 %v7455_v20  ;;  %3278 = vmatpush1.bf16.msra.mxu1 %v7461_v21 }
 0x6fb   :  { %3236 = vmatprep.subr.bf16.mxu0 %v7458_v18  ;;  %3279 = vmatprep.subr.bf16.mxu1 %v7464_v23 }
 0x6fe   :  { %3237 = vmatpush1.bf16.msra.mxu0 %v7467_v25  ;;  %3280 = vmatpush1.bf16.msra.mxu1 %v7471_v47 }
 0x6ff   :  { %3582 = vmatprep.subr.bf16.mxu0 %v6180_v53  ;;  %3695 = vmatprep.subr.bf16.mxu1 %v6183_v32 }
 0x7b3   :  { %v2918_v19 = vpop.f32.mrb[24].mxu0  ;;  %v2961_v33 = vpop.f32.mrb[24].mxu1 }
 0x7b4   :  { %v5767_v49 = vadd.f32 %v2918_v19, %v7238_v15  ;;  %v2920_v35 = vpop.f32.mrb[25].mxu0  ;;  %v2963_v43 = vpop.f32.mrb[25].mxu1  ;;  %v5799_v3 = vadd.f32 %v2961_v33, %v7258_v9 }
 0x7b5   :  { %v5768_v52 = vadd.f32 %v2920_v35, %v7242_v16  ;;  %v2922_v6 = vpop.f32.mrb[26].mxu0  ;;  %v2965_v7 = vpop.f32.mrb[26].mxu1  ;;  %v5800_v39 = vadd.f32 %v2963_v43, %v7249_v24 }
 0x7b6   :  { %v2978_v26 = vsub.f32 0.0, %v5767_v49  ;;  %v5769_v10 = vadd.f32 %v2922_v6, %v7238_v15  ;;  %v2924_v20 = vpop.f32.mrb[27].mxu0  ;;  %v2967_v18 = vpop.f32.mrb[27].mxu1  ;;  %v5801_v37 = vadd.f32 %v2965_v7, %v7258_v9  ;;  %v6178_v7 = vld [vmem:[#allocation8] ss:$16 sps:$4 sm:$0xff]  }
 0x7b7   :  { %v2988_v21 = vsub.f32 0.0, %v5768_v52  ;;  %v5770_v23 = vadd.f32 %v2924_v20, %v7242_v16  ;;  %v5802_v56 = vadd.f32 %v2967_v18, %v7249_v24  ;;  %v3000_v61 = vsub.f32 0.0, %v5800_v39  ;;  %v6186_v20 = vld [vmem:[#allocation8 + $0x24] ss:$16 sps:$4 sm:$0xff]   ;;  %v6184_v18 = vld [vmem:[#allocation8 + $0x20] ss:$16 sps:$4 sm:$0xff]  }
 0x7b8   :  { %v2980_v25 = vmul.f32 1.442695, %v2978_v26  ;;  %v2979_v47 = vsub.f32 0.0, %v5769_v10  ;;  %v6181_v26 = vld [vmem:[#allocation8 + $0x8] ss:$16 sps:$4 sm:$0xff]  }
 0x7b9   :  { %v2990_v30 = vmul.f32 1.442695, %v2988_v21  ;;  %v2989_v42 = vsub.f32 0.0, %v5770_v23  ;;  %v3001_v41 = vsub.f32 0.0, %v5802_v56  ;;  %v3002_v60 = vmul.f32 1.442695, %v3000_v61 }
 0x7ba   :  { %6474 = vpow2.f32 %v2980_v25  ;;  %v2982_v46 = vmul.f32 1.442695, %v2979_v47  ;;  %v6187_v21 = vld [vmem:[#allocation8 + $0x28] ss:$16 sps:$4 sm:$0xff]   ;;  %v6192_v23 = vld [vmem:[#allocation8 + $0x44] ss:$16 sps:$4 sm:$0xff]  }
 0x7bb   :  { %6476 = vpow2.f32 %v2990_v30  ;;  %v2992_v51 = vmul.f32 1.442695, %v2989_v42  ;;  %v3004_v5 = vmul.f32 1.442695, %v3001_v41  ;;  %v6195_v25 = vld [vmem:[#allocation8 + $0x4c] ss:$16 sps:$4 sm:$0xff]  }
 0x7bc   :  { %6478 = vpow2.f32 %v2982_v46  ;;  %v6190_v47 = vld [vmem:[#allocation8 + $0x40] ss:$16 sps:$4 sm:$0xff]   ;;  %v6193_v30 = vld [vmem:[#allocation8 + $0x48] ss:$16 sps:$4 sm:$0xff]   ;;  %v6198_v39 = vld [vmem:[#allocation8 + $0x64] ss:$16 sps:$4 sm:$0xff]  }
 0x7bd   :  { %6480 = vpow2.f32 %v2992_v51  ;;  %v6201_v42 = vld [vmem:[#allocation8 + $0x6c] ss:$16 sps:$4 sm:$0xff]   ;;  %v6196_v46 = vld [vmem:[#allocation8 + $0x60] ss:$16 sps:$4 sm:$0xff]   ;;  %v6199_v56 = vld [vmem:[#allocation8 + $0x68] ss:$16 sps:$4 sm:$0xff]  }
 0x7be   :  { %6482 = vtanh.f32 %v5799_v3  ;;  %v6204_v51 = vld [vmem:[#allocation8 + $0x84] ss:$16 sps:$4 sm:$0xff]   ;;  %v6207_v61 = vld [vmem:[#allocation8 + $0x8c] ss:$16 sps:$4 sm:$0xff]   ;;  %v6202_v41 = vld [vmem:[#allocation8 + $0x80] ss:$16 sps:$4 sm:$0xff]  }
 0x7bf   :  { %6484 = vpow2.f32 %v3002_v60  ;;  %v6205_v3 = vld [vmem:[#allocation8 + $0x88] ss:$16 sps:$4 sm:$0xff]   ;;  %v6210_v60 = vld [vmem:[#allocation8 + $0xa4] ss:$16 sps:$4 sm:$0xff]  }
 0x7c0   :  { %6486 = vpow2.f32 %v3004_v5  ;;  %v6213_v5 = vld [vmem:[#allocation8 + $0xac] ss:$16 sps:$4 sm:$0xff]  }
 0x7c4   :  { %v6475_v14 = vpop.eup %6474 }
 0x7c5   :  { %v6477_v59 = vpop.eup %6476  ;;  %v2984_v2 = vadd.f32 1.0, %v6475_v14  ;;  %v6208_v14 = vld [vmem:[#allocation8 + $0xa0] ss:$16 sps:$4 sm:$0xff]  }
 0x7c6   :  { %v2994_v12 = vadd.f32 1.0, %v6477_v59  ;;  %v6479_v55 = vpop.eup %6478  ;;  %v6211_v59 = vld [vmem:[#allocation8 + $0xa8] ss:$16 sps:$4 sm:$0xff]  }
 0x7c7   :  { %6488 = vrcp.f32 %v2984_v2  ;;  %v6481_v54 = vpop.eup %6480  ;;  %v2985_v58 = vadd.f32 1.0, %v6479_v55  ;;  %v6216_v2 = vld [vmem:[#allocation8 + $0xc4] ss:$16 sps:$4 sm:$0xff]   ;;  %v6217_v55 = vld [vmem:[#allocation8 + $0xc8] ss:$16 sps:$4 sm:$0xff]  }
 0x7c8   :  { %6490 = vrcp.f32 %v2994_v12  ;;  %v2995_v48 = vadd.f32 1.0, %v6481_v54  ;;  %v6483_v57 = vpop.eup %6482  ;;  %v6214_v12 = vld [vmem:[#allocation8 + $0xc0] ss:$16 sps:$4 sm:$0xff]   ;;  %v6222_v54 = vld [vmem:[#allocation8 + $0xe4] ss:$16 sps:$4 sm:$0xff]  }
 0x7c9   :  { %6492 = vtanh.f32 %v5801_v37  ;;  %v6485_v1 = vpop.eup %6484  ;;  %v6219_v37 = vld [vmem:[#allocation8 + $0xcc] ss:$16 sps:$4 sm:$0xff]  }
 0x7ca   :  { %6494 = vrcp.f32 %v2985_v58  ;;  %v6487_v62 = vpop.eup %6486  ;;  %v3006_v38 = vadd.f32 1.0, %v6485_v1  ;;  %v6225_v58 = vld [vmem:[#allocation8 + $0xec] ss:$16 sps:$4 sm:$0xff]   ;;  %v7648_v1 = vld [vmem:[#allocation9 + $0x4] ss:$16 sps:$4 sm:$0xff]  }
 0x7cb   :  { %6496 = vrcp.f32 %v2995_v48  ;;  %v3007_v32 = vadd.f32 1.0, %v6487_v62  ;;  %v6220_v48 = vld [vmem:[#allocation8 + $0xe0] ss:$16 sps:$4 sm:$0xff]  }
 0x7cc   :  { %6498 = vrcp.f32 %v3006_v38  ;;  %v7651_v62 = vld [vmem:[#allocation9] ss:$16 sps:$4 sm:$0xff]   ;;  %v7711_v38 = vld [vmem:[#allocation9 + $0x6c] ss:$16 sps:$4 sm:$0xff]  }
 0x7d1   :  { %v6489_v22 = vpop.eup %6488 }
 0x7d2   :  { %v6491_v4 = vpop.eup %6490  ;;  %v3012_v29 = vmul.f32 %v6489_v22, %v6483_v57  ;;  %v6223_v57 = vld [vmem:[#allocation8 + $0xe8] ss:$16 sps:$4 sm:$0xff]   ;;  %v7697_v22 = vld [vmem:[#allocation9 + $0x44] ss:$16 sps:$4 sm:$0xff]  }
 0x7d3   :  { %v6493_v13 = vpop.eup %6492  ;;  %v3010_v36 = vmul.f32 %v6491_v4, %v7593_v17  ;;  %v7701_v4 = vld [vmem:[#allocation9 + $0x40] ss:$16 sps:$4 sm:$0xff]  }
 0x7d4   :  { %v6495_v40 = vpop.eup %6494 }
 0x7d5   :  { %v6497_v8 = vpop.eup %6496  ;;  %v7635_v50 = vadd.f32 %v3012_v29, %v3010_v36  ;;  %v3013_v53 = vmul.f32 %v6495_v40, %v6493_v13  ;;  %v7704_v29 = vld [vmem:[#allocation9 + $0x4c] ss:$16 sps:$4 sm:$0xff]   ;;  %v7707_v13 = vld [vmem:[#allocation9 + $0x64] ss:$16 sps:$4 sm:$0xff]   ;;  %v7709_v36 = vld [vmem:[#allocation9 + $0x48] ss:$16 sps:$4 sm:$0xff]  }
 0x7d6   :  { %v3011_v19 = vmul.f32 %v6497_v8, %v7597_v44  ;;  %v6499_v49 = vpop.eup %6498  ;;  %v6189_v44 = vld [vmem:[#allocation8 + $0x2c] ss:$16 sps:$4 sm:$0xff]   ;;  %v7715_v40 = vld [vmem:[#allocation9 + $0x60] ss:$16 sps:$4 sm:$0xff]   ;;  %v7718_v8 = vld [vmem:[#allocation9 + $0x68] ss:$16 sps:$4 sm:$0xff]  }
 0x7d7   :  { %6500 = vtanh.f32 %v7635_v50 }
 0x7d8   :  { %v7639_v33 = vadd.f32 %v3013_v53, %v3011_v19  ;;  %6502 = vrcp.f32 %v3007_v32  ;;  %v7721_v53 = vld [vmem:[#allocation9 + $0x84] ss:$16 sps:$4 sm:$0xff]   ;;  %v7724_v32 = vld [vmem:[#allocation9 + $0x8c] ss:$16 sps:$4 sm:$0xff]   ;;  %v7727_v19 = vld [vmem:[#allocation9 + $0x80] ss:$16 sps:$4 sm:$0xff]  }
 0x7da   :  { %6504 = vtanh.f32 %v7639_v33 }
 0x7e1   :  { %v6501_v35 = vpop.eup %6500 }
 0x7e2   :  { %v6503_v17 = vpop.eup %6502  ;;  %v3018_v52 = vmul.f32 %v6501_v35, %v6499_v49  ;;  %v7730_v49 = vld [vmem:[#allocation9 + $0x88] ss:$16 sps:$4 sm:$0xff]   ;;  %v7733_v35 = vld [vmem:[#allocation9 + $0xa4] ss:$16 sps:$4 sm:$0xff]  }
 0x7e4   :  { %v6505_v43 = vpop.eup %6504 }
 0x7e5   :  { %v3019_v6 = vmul.f32 %v6505_v43, %v6503_v17  ;;  %v7736_v17 = vld [vmem:[#allocation9 + $0xac] ss:$16 sps:$4 sm:$0xff]   ;;  %v7739_v43 = vld [vmem:[#allocation9 + $0xa0] ss:$16 sps:$4 sm:$0xff]  }
 0x7e7   :  { %v7642_v10 = vpack.c.bf16 %v3019_v6, %v3018_v52  ;;  %v7742_v52 = vld [vmem:[#allocation9 + $0xa8] ss:$16 sps:$4 sm:$0xff]   ;;  %v7745_v6 = vld [vmem:[#allocation9 + $0xc4] ss:$16 sps:$4 sm:$0xff]  }
 0x7e9   :  { %3255 = vmatmul.mubr.bf16.vlgmr.msra.gmra.mrb[28].mxu0 %v7642_v10  ;;  %3298 = vmatmul.mubr.bf16.vlgmr.msra.gmra.mrb[28].mxu1 %v7642_v10 }
 0x7ea   :  { %3583 = vmatpush1.bf16.msra.mxu0 %v6178_v7  ;;  %3696 = vmatpush1.bf16.msra.mxu1 %v6181_v26  ;;  %v7749_v7 = vld [vmem:[#allocation9 + $0xc0] ss:$16 sps:$4 sm:$0xff]   ;;  %v7753_v26 = vld [vmem:[#allocation9 + $0xcc] ss:$16 sps:$4 sm:$0xff]  }
 0x7eb   :  { %3584 = vmatprep.subr.bf16.mxu0 %v6186_v20  ;;  %3697 = vmatprep.subr.bf16.mxu1 %v6189_v44  ;;  %v7757_v20 = vld [vmem:[#allocation9 + $0xc8] ss:$16 sps:$4 sm:$0xff]   ;;  %v7760_v44 = vld [vmem:[#allocation9 + $0xec] ss:$16 sps:$4 sm:$0xff]  }
 0x7ec   :  { %3614 = vmatprep.mubr.bf16.mxu0 %v6926_v0  ;;  %3727 = vmatprep.mubr.bf16.mxu1 %v6926_v0 }
 0x7ee   :  { %3585 = vmatpush1.bf16.msra.mxu0 %v6184_v18  ;;  %3698 = vmatpush1.bf16.msra.mxu1 %v6187_v21  ;;  %v7763_v18 = vld [vmem:[#allocation9 + $0xe0] ss:$16 sps:$4 sm:$0xff]   ;;  %v7766_v21 = vld [vmem:[#allocation9 + $0xe8] ss:$16 sps:$4 sm:$0xff]  }
 0x7ef   :  { %3586 = vmatprep.subr.bf16.mxu0 %v6192_v23  ;;  %3699 = vmatprep.subr.bf16.mxu1 %v6195_v25 }
 0x7f2   :  { %3587 = vmatpush1.bf16.msra.mxu0 %v6190_v47  ;;  %3700 = vmatpush1.bf16.msra.mxu1 %v6193_v30 }
 0x7f3   :  { %3588 = vmatprep.subr.bf16.mxu0 %v6198_v39  ;;  %3701 = vmatprep.subr.bf16.mxu1 %v6201_v42 }
 0x7f6   :  { %3589 = vmatpush1.bf16.msra.mxu0 %v6196_v46  ;;  %3702 = vmatpush1.bf16.msra.mxu1 %v6199_v56 }
 0x7f7   :  { %3590 = vmatprep.subr.bf16.mxu0 %v6204_v51  ;;  %3703 = vmatprep.subr.bf16.mxu1 %v6207_v61 }
 0x7fa   :  { %3591 = vmatpush1.bf16.msra.mxu0 %v6202_v41  ;;  %3704 = vmatpush1.bf16.msra.mxu1 %v6205_v3 }
 0x7fb   :  { %3592 = vmatprep.subr.bf16.mxu0 %v6210_v60  ;;  %3705 = vmatprep.subr.bf16.mxu1 %v6213_v5 }
 0x7fe   :  { %3593 = vmatpush1.bf16.msra.mxu0 %v6208_v14  ;;  %3706 = vmatpush1.bf16.msra.mxu1 %v6211_v59 }
 0x7ff   :  { %3594 = vmatprep.subr.bf16.mxu0 %v6216_v2  ;;  %3707 = vmatprep.subr.bf16.mxu1 %v6219_v37 }
 0x802   :  { %3595 = vmatpush1.bf16.msra.mxu0 %v6214_v12  ;;  %3708 = vmatpush1.bf16.msra.mxu1 %v6217_v55 }
 0x803   :  { %3596 = vmatprep.subr.bf16.mxu0 %v6222_v54  ;;  %3709 = vmatprep.subr.bf16.mxu1 %v6225_v58 }
 0x806   :  { %3597 = vmatpush1.bf16.msra.mxu0 %v6220_v48  ;;  %3710 = vmatpush1.bf16.msra.mxu1 %v6223_v57 }
 0x807   :  { %4072 = vmatprep.subr.bf16.mxu0 %v7648_v1 }
 0x809   :  { %3615 = vmatmul.mubr.bf16.vlgmr.msra.gmra.mrb[32].mxu0 %v7268_v31  ;;  %3728 = vmatmul.mubr.bf16.vlgmr.msra.gmra.mrb[32].mxu1 %v7268_v31  ;;  %v7682_v31 = vld [vmem:[#allocation9 + $0xc] ss:$16 sps:$4 sm:$0xff]  }
 0x80a   :  { %3624 = vmatprep.mubr.bf16.mxu0 %v6926_v0  ;;  %3737 = vmatprep.mubr.bf16.mxu1 %v6926_v0 }
 0x80b   :  { %4073 = vmatpush1.bf16.msra.mxu0 %v7651_v62  ;;  %4115 = vmatprep.subr.bf16.mxu1 %v7682_v31 }
 0x811   :  { %3625 = vmatmul.mubr.bf16.gmra.mrb[36].mxu0 %v7320_v27  ;;  %3738 = vmatmul.mubr.bf16.gmra.mrb[36].mxu1 %v7320_v27  ;;  %v7684_v27 = vld [vmem:[#allocation9 + $0x8] ss:$16 sps:$4 sm:$0xff]  }
 0x812   :  { %3634 = vmatprep.mubr.bf16.mxu0 %v6926_v0  ;;  %3747 = vmatprep.mubr.bf16.mxu1 %v6926_v0 }
 0x813   :  { %4116 = vmatpush1.bf16.msra.mxu1 %v7684_v27 }
 0x819   :  { %3635 = vmatmul.mubr.bf16.gmra.mrb[40].mxu0 %v7400_v45  ;;  %3748 = vmatmul.mubr.bf16.gmra.mrb[40].mxu1 %v7400_v45  ;;  %v7688_v45 = vld [vmem:[#allocation9 + $0x24] ss:$16 sps:$4 sm:$0xff]  }
 0x81a   :  { %3644 = vmatprep.mubr.bf16.mxu0 %v6926_v0  ;;  %3757 = vmatprep.mubr.bf16.mxu1 %v6926_v0 }
 0x81b   :  { %4074 = vmatprep.subr.bf16.mxu0 %v7688_v45 }
 0x821   :  { %3645 = vmatmul.mubr.bf16.gmra.mrb[44].mxu0 %v7494_v34  ;;  %3758 = vmatmul.mubr.bf16.gmra.mrb[44].mxu1 %v7494_v34  ;;  %v7690_v34 = vld [vmem:[#allocation9 + $0x2c] ss:$16 sps:$4 sm:$0xff]  }
 0x822   :  { %3654 = vmatprep.mubr.bf16.mxu0 %v6926_v0  ;;  %3767 = vmatprep.mubr.bf16.mxu1 %v6926_v0 }
 0x823   :  { %4117 = vmatprep.subr.bf16.mxu1 %v7690_v34 }
 0x829   :  { %3655 = vmatmul.mubr.bf16.gmra.mrb[48].mxu0 %v7548_v28  ;;  %3768 = vmatmul.mubr.bf16.gmra.mrb[48].mxu1 %v7548_v28  ;;  %v7692_v28 = vld [vmem:[#allocation9 + $0x20] ss:$16 sps:$4 sm:$0xff]  }
 0x82a   :  { %3664 = vmatprep.mubr.bf16.mxu0 %v6926_v0  ;;  %3777 = vmatprep.mubr.bf16.mxu1 %v6926_v0 }
 0x82b   :  { %4075 = vmatpush1.bf16.msra.mxu0 %v7692_v28 }
 0x82c   :  { %4076 = vmatprep.subr.bf16.mxu0 %v7697_v22 }
 0x82f   :  { %4077 = vmatpush1.bf16.msra.mxu0 %v7701_v4 }
 0x830   :  { %4078 = vmatprep.subr.bf16.mxu0 %v7707_v13 }
 0x831   :  { %3665 = vmatmul.mubr.bf16.gmra.mrb[52].mxu0 %v7600_v63  ;;  %3778 = vmatmul.mubr.bf16.gmra.mrb[52].mxu1 %v7600_v63  ;;  %v7694_v63 = vld [vmem:[#allocation9 + $0x28] ss:$16 sps:$4 sm:$0xff]  }
 0x832   :  { %3674 = vmatprep.mubr.bf16.mxu0 %v6926_v0  ;;  %3787 = vmatprep.mubr.bf16.mxu1 %v6926_v0 }
 0x833   :  { %4118 = vmatpush1.bf16.msra.mxu1 %v7694_v63  ;;  %4079 = vmatpush1.bf16.msra.mxu0 %v7715_v40 }
 0x834   :  { %4119 = vmatprep.subr.bf16.mxu1 %v7704_v29  ;;  %4080 = vmatprep.subr.bf16.mxu0 %v7721_v53 }
 0x837   :  { %4120 = vmatpush1.bf16.msra.mxu1 %v7709_v36  ;;  %4081 = vmatpush1.bf16.msra.mxu0 %v7727_v19 }
 0x838   :  { %4121 = vmatprep.subr.bf16.mxu1 %v7711_v38  ;;  %4082 = vmatprep.subr.bf16.mxu0 %v7733_v35 }
 0x839   :  { %3675 = vmatmul.mubr.bf16.gmra.mrb[56].mxu0 %v7642_v10  ;;  %3788 = vmatmul.mubr.bf16.gmra.mrb[56].mxu1 %v7642_v10  ;;  %v7755_v10 = vld [vmem:[#allocation9 + $0xe4] ss:$16 sps:$4 sm:$0xff]  }
 0x83a   :  { %3684 = vmatprep.mubr.bf16.mxu0 %v6926_v0  ;;  %3797 = vmatprep.mubr.bf16.mxu1 %v6926_v0 }
 0x83b   :  { %4122 = vmatpush1.bf16.msra.mxu1 %v7718_v8  ;;  %4083 = vmatpush1.bf16.msra.mxu0 %v7739_v43 }
 0x83c   :  { %4123 = vmatprep.subr.bf16.mxu1 %v7724_v32  ;;  %4084 = vmatprep.subr.bf16.mxu0 %v7745_v6 }
 0x83f   :  { %4124 = vmatpush1.bf16.msra.mxu1 %v7730_v49  ;;  %4085 = vmatpush1.bf16.msra.mxu0 %v7749_v7 }
 0x840   :  { %4125 = vmatprep.subr.bf16.mxu1 %v7736_v17  ;;  %4086 = vmatprep.subr.bf16.mxu0 %v7755_v10 }
 0x843   :  { %4126 = vmatpush1.bf16.msra.mxu1 %v7742_v52  ;;  %4087 = vmatpush1.bf16.msra.mxu0 %v7763_v18 }
 0x844   :  { %4127 = vmatprep.subr.bf16.mxu1 %v7753_v26  ;;  %4217 = vmatprep.subr.bf16.mxu0 %v7648_v1 }
 0x847   :  { %4128 = vmatpush1.bf16.msra.mxu1 %v7757_v20 }
 0x848   :  { %4129 = vmatprep.subr.bf16.mxu1 %v7760_v44 }
 0x84b   :  { %4130 = vmatpush1.bf16.msra.mxu1 %v7766_v21 }
 0x84c   :  { %4260 = vmatprep.subr.bf16.mxu1 %v7682_v31 }
 0x8bc   :  { %v3256_v23 = vpop.f32.mrb[28].mxu0  ;;  %v3299_v25 = vpop.f32.mrb[28].mxu1 }
 0x8bd   :  { %v5771_v47 = vadd.f32 %v3256_v23, %v7238_v15  ;;  %v3258_v30 = vpop.f32.mrb[29].mxu0  ;;  %v3301_v39 = vpop.f32.mrb[29].mxu1  ;;  %v5803_v57 = vadd.f32 %v3299_v25, %v7258_v9 }
 0x8be   :  { %v5772_v42 = vadd.f32 %v3258_v30, %v7242_v16  ;;  %v3260_v46 = vpop.f32.mrb[30].mxu0  ;;  %v3303_v56 = vpop.f32.mrb[30].mxu1  ;;  %v5804_v37 = vadd.f32 %v3301_v39, %v7249_v24 }
 0x8bf   :  { %v3316_v51 = vsub.f32 0.0, %v5771_v47  ;;  %v5773_v61 = vadd.f32 %v3260_v46, %v7238_v15  ;;  %v3262_v41 = vpop.f32.mrb[31].mxu0  ;;  %v3305_v3 = vpop.f32.mrb[31].mxu1  ;;  %v5805_v39 = vadd.f32 %v3303_v56, %v7258_v9 }
 0x8c0   :  { %v3326_v60 = vsub.f32 0.0, %v5772_v42  ;;  %v5774_v5 = vadd.f32 %v3262_v41, %v7242_v16  ;;  %v5806_v54 = vadd.f32 %v3305_v3, %v7249_v24  ;;  %v3338_v48 = vsub.f32 0.0, %v5804_v37 }
 0x8c1   :  { %v3318_v14 = vmul.f32 1.442695, %v3316_v51  ;;  %v3317_v59 = vsub.f32 0.0, %v5773_v61 }
 0x8c2   :  { %v3328_v2 = vmul.f32 1.442695, %v3326_v60  ;;  %v3327_v12 = vsub.f32 0.0, %v5774_v5  ;;  %v3339_v15 = vsub.f32 0.0, %v5806_v54  ;;  %v3340_v23 = vmul.f32 1.442695, %v3338_v48 }
 0x8c3   :  { %6506 = vpow2.f32 %v3318_v14  ;;  %v3320_v55 = vmul.f32 1.442695, %v3317_v59 }
 0x8c4   :  { %6508 = vpow2.f32 %v3328_v2  ;;  %v3330_v58 = vmul.f32 1.442695, %v3327_v12  ;;  %v3342_v16 = vmul.f32 1.442695, %v3339_v15 }
 0x8c5   :  { %6510 = vpow2.f32 %v3320_v55 }
 0x8c6   :  { %6512 = vpow2.f32 %v3330_v58 }
 0x8c7   :  { %6514 = vtanh.f32 %v5803_v57 }
 0x8c8   :  { %6516 = vpow2.f32 %v3340_v23 }
 0x8c9   :  { %6518 = vpow2.f32 %v3342_v16 }
 0x8cd   :  { %v6507_v47 = vpop.eup %6506 }
 0x8ce   :  { %v6509_v30 = vpop.eup %6508  ;;  %v3322_v42 = vadd.f32 1.0, %v6507_v47 }
 0x8cf   :  { %v3332_v46 = vadd.f32 1.0, %v6509_v30  ;;  %v6511_v24 = vpop.eup %6510 }
 0x8d0   :  { %6520 = vrcp.f32 %v3322_v42  ;;  %v6513_v51 = vpop.eup %6512  ;;  %v3323_v61 = vadd.f32 1.0, %v6511_v24  ;;  %v8275_v24 = vsub.s32 1, %v7229_v11 }
 0x8d1   :  { %6522 = vrcp.f32 %v3332_v46  ;;  %v3333_v41 = vadd.f32 1.0, %v6513_v51  ;;  %v6515_v25 = vpop.eup %6514 }
 0x8d2   :  { %6524 = vtanh.f32 %v5805_v39  ;;  %v6517_v3 = vpop.eup %6516 }
 0x8d3   :  { %6526 = vrcp.f32 %v3323_v61  ;;  %v6519_v60 = vpop.eup %6518  ;;  %v3344_v2 = vadd.f32 1.0, %v6517_v3 }
 0x8d4   :  { %6528 = vrcp.f32 %v3333_v41  ;;  %v3345_v54 = vadd.f32 1.0, %v6519_v60 }
 0x8d5   :  { %6530 = vrcp.f32 %v3344_v2 }
 0x8da   :  { %v6521_v5 = vpop.eup %6520 }
 0x8db   :  { %v6523_v14 = vpop.eup %6522  ;;  %v3350_v59 = vmul.f32 %v6521_v5, %v6515_v25 }
 0x8dc   :  { %v6525_v37 = vpop.eup %6524  ;;  %v3348_v9 = vmul.f32 %v6523_v14, %v7635_v50  ;;  %v3400_v50 = vld [vmem:[%s8266_s6] sm:$0xf]  ;;  %v8276_v14 = vsub.s32 3, %v7229_v11 }
 0x8dd   :  { %v6527_v56 = vpop.eup %6526  ;;  %v7831_v51 = vrot.slane %v3400_v50, %v8275_v24 }
 0x8de   :  { %v6529_v12 = vpop.eup %6528  ;;  %v3351_v55 = vmul.f32 %v6527_v56, %v6525_v37  ;;  %v3352_v58 = vadd.f32 %v3350_v59, %v3348_v9  ;;  %v7837_v59 = vrot.slane %v3400_v50, %v8276_v14 }
 0x8df   :  { %v3349_v48 = vmul.f32 %v6529_v12, %v7639_v33  ;;  %v6531_v57 = vpop.eup %6530  ;;  %v8274_v33 = vsub.s32 0, %v7229_v11 }
 0x8e0   :  { %6532 = vtanh.f32 %v3352_v58 }
 0x8e1   :  { %v3353_v15 = vadd.f32 %v3351_v55, %v3349_v48  ;;  %6534 = vrcp.f32 %v3345_v54  ;;  %v7827_v46 = vrot.slane %v3400_v50, %v8274_v33 }
 0x8e3   :  { %6536 = vtanh.f32 %v3353_v15 }
 0x8ea   :  { %v6533_v23 = vpop.eup %6532 }
 0x8eb   :  { %v3356_v16 = vmul.f32 %v6533_v23, %v6531_v57  ;;  %v6535_v47 = vpop.eup %6534 }
 0x8ed   :  { %v6537_v30 = vpop.eup %6536 }
 0x8ee   :  { %v3357_v42 = vmul.f32 %v6537_v30, %v6535_v47 }
 0x8f0   :  { %v3358_v39 = vpack.c.bf16 %v3357_v42, %v3356_v16 }
 0x8f2   :  { %3685 = vmatmul.mubr.bf16.gmra.mrb[60].mxu0 %v3358_v39  ;;  %3798 = vmatmul.mubr.bf16.gmra.mrb[60].mxu1 %v3358_v39  ;;  %v8277_v39 = vsub.s32 2, %v7229_v11 }
 0x8f3   :  { %4104 = vmatprep.mubr.bf16.mxu0 %v6926_v0  ;;  %4147 = vmatprep.mubr.bf16.mxu1 %v6926_v0 }
 0x8f4   :  { %v7845_v33 = vrot.slane %v3400_v50, %v8277_v39 }
 0x8fa   :  { %4105 = vmatmul.mubr.bf16.vlgmr.msra.gmra.mrb[32].mxu0 %v6926_v0  ;;  %4148 = vmatmul.mubr.bf16.vlgmr.msra.gmra.mrb[32].mxu1 %v6926_v0 }
 0x8fb   :  { %4218 = vmatpush1.bf16.msra.mxu0 %v7651_v62  ;;  %4261 = vmatpush1.bf16.msra.mxu1 %v7684_v27 }
 0x8fc   :  { %4219 = vmatprep.subr.bf16.mxu0 %v7688_v45  ;;  %4262 = vmatprep.subr.bf16.mxu1 %v7690_v34 }
 0x8fd   :  { %4249 = vmatprep.mubr.bf16.mxu0 %v6926_v0  ;;  %4292 = vmatprep.mubr.bf16.mxu1 %v6926_v0 }
 0x8ff   :  { %4220 = vmatpush1.bf16.msra.mxu0 %v7692_v28  ;;  %4263 = vmatpush1.bf16.msra.mxu1 %v7694_v63 }
 0x900   :  { %4221 = vmatprep.subr.bf16.mxu0 %v7697_v22  ;;  %4264 = vmatprep.subr.bf16.mxu1 %v7704_v29 }
 0x903   :  { %4222 = vmatpush1.bf16.msra.mxu0 %v7701_v4  ;;  %4265 = vmatpush1.bf16.msra.mxu1 %v7709_v36 }
 0x904   :  { %4223 = vmatprep.subr.bf16.mxu0 %v7707_v13  ;;  %4266 = vmatprep.subr.bf16.mxu1 %v7711_v38 }
 0x907   :  { %4224 = vmatpush1.bf16.msra.mxu0 %v7715_v40  ;;  %4267 = vmatpush1.bf16.msra.mxu1 %v7718_v8 }
 0x908   :  { %4225 = vmatprep.subr.bf16.mxu0 %v7721_v53  ;;  %4268 = vmatprep.subr.bf16.mxu1 %v7724_v32 }
 0x90b   :  { %4226 = vmatpush1.bf16.msra.mxu0 %v7727_v19  ;;  %4269 = vmatpush1.bf16.msra.mxu1 %v7730_v49 }
 0x90c   :  { %4227 = vmatprep.subr.bf16.mxu0 %v7733_v35  ;;  %4270 = vmatprep.subr.bf16.mxu1 %v7736_v17 }
 0x90f   :  { %4228 = vmatpush1.bf16.msra.mxu0 %v7739_v43  ;;  %4271 = vmatpush1.bf16.msra.mxu1 %v7742_v52 }
 0x910   :  { %4229 = vmatprep.subr.bf16.mxu0 %v7745_v6  ;;  %4272 = vmatprep.subr.bf16.mxu1 %v7753_v26 }
 0x913   :  { %4230 = vmatpush1.bf16.msra.mxu0 %v7749_v7  ;;  %4273 = vmatpush1.bf16.msra.mxu1 %v7757_v20 }
 0x914   :  { %4231 = vmatprep.subr.bf16.mxu0 %v7755_v10  ;;  %4274 = vmatprep.subr.bf16.mxu1 %v7760_v44 }
 0x917   :  { %4232 = vmatpush1.bf16.msra.mxu0 %v7763_v18  ;;  %4275 = vmatpush1.bf16.msra.mxu1 %v7766_v21 }
 0x918   :  { %4362 = vmatprep.subr.bf16.mxu0 %v7648_v1  ;;  %4405 = vmatprep.subr.bf16.mxu1 %v7682_v31 }
 0x9cd   :  { %v4106_v61 = vpop.f32.mrb[32].mxu0  ;;  %v4149_v41 = vpop.f32.mrb[32].mxu1 }
 0x9ce   :  { %v5807_v25 = vadd.f32 %v4106_v61, %v7827_v46  ;;  %v4108_v3 = vpop.f32.mrb[33].mxu0  ;;  %v4151_v60 = vpop.f32.mrb[33].mxu1 }
 0x9cf   :  { %v5808_v5 = vadd.f32 %v4108_v3, %v7831_v51  ;;  %v4110_v2 = vpop.f32.mrb[34].mxu0  ;;  %v4153_v37 = vpop.f32.mrb[34].mxu1  ;;  %v5840_v23 = vadd.f32 %v4151_v60, %v7837_v59 }
 0x9d0   :  { %v4166_v9 = vsub.f32 0.0, %v5807_v25  ;;  %v5809_v56 = vadd.f32 %v4110_v2, %v7827_v46  ;;  %v4112_v12 = vpop.f32.mrb[35].mxu0  ;;  %v4155_v55 = vpop.f32.mrb[35].mxu1  ;;  %v5839_v25 = vadd.f32 %v4149_v41, %v7845_v33 }
 0x9d1   :  { %v4176_v54 = vsub.f32 0.0, %v5808_v5  ;;  %v5810_v58 = vadd.f32 %v4112_v12, %v7831_v51  ;;  %v5842_v30 = vadd.f32 %v4155_v55, %v7837_v59  ;;  %v4188_v24 = vsub.f32 0.0, %v5840_v23 }
 0x9d2   :  { %v4168_v48 = vmul.f32 1.442695, %v4166_v9  ;;  %v4167_v15 = vsub.f32 0.0, %v5809_v56  ;;  %v5841_v9 = vadd.f32 %v4153_v37, %v7845_v33 }
 0x9d3   :  { %v4178_v57 = vmul.f32 1.442695, %v4176_v54  ;;  %v4177_v16 = vsub.f32 0.0, %v5810_v58  ;;  %v4189_v61 = vsub.f32 0.0, %v5842_v30  ;;  %v4190_v3 = vmul.f32 1.442695, %v4188_v24 }
 0x9d4   :  { %6538 = vpow2.f32 %v4168_v48  ;;  %v4170_v47 = vmul.f32 1.442695, %v4167_v15 }
 0x9d5   :  { %6540 = vpow2.f32 %v4178_v57  ;;  %v4180_v42 = vmul.f32 1.442695, %v4177_v16  ;;  %v4192_v5 = vmul.f32 1.442695, %v4189_v61 }
 0x9d6   :  { %6542 = vpow2.f32 %v4170_v47 }
 0x9d7   :  { %6544 = vpow2.f32 %v4180_v42 }
 0x9d8   :  { %6546 = vtanh.f32 %v5839_v25 }
 0x9d9   :  { %6548 = vpow2.f32 %v4190_v3 }
 0x9da   :  { %6550 = vpow2.f32 %v4192_v5 }
 0x9de   :  { %v6539_v60 = vpop.eup %6538 }
 0x9df   :  { %v6541_v14 = vpop.eup %6540  ;;  %v4172_v2 = vadd.f32 1.0, %v6539_v60 }
 0x9e0   :  { %v4182_v56 = vadd.f32 1.0, %v6541_v14  ;;  %v6543_v11 = vpop.eup %6542 }
 0x9e1   :  { %6552 = vrcp.f32 %v4172_v2  ;;  %v6545_v50 = vpop.eup %6544  ;;  %v4173_v12 = vadd.f32 1.0, %v6543_v11 }
 0x9e2   :  { %6554 = vrcp.f32 %v4182_v56  ;;  %v4183_v55 = vadd.f32 1.0, %v6545_v50  ;;  %v6547_v41 = vpop.eup %6546 }
 0x9e3   :  { %6556 = vtanh.f32 %v5841_v9  ;;  %v6549_v54 = vpop.eup %6548 }
 0x9e4   :  { %6558 = vrcp.f32 %v4173_v12  ;;  %v6551_v58 = vpop.eup %6550  ;;  %v4194_v37 = vadd.f32 1.0, %v6549_v54 }
 0x9e5   :  { %6560 = vrcp.f32 %v4183_v55  ;;  %v4195_v24 = vadd.f32 1.0, %v6551_v58 }
 0x9e6   :  { %6562 = vrcp.f32 %v4194_v37 }
 0x9eb   :  { %v6553_v48 = vpop.eup %6552 }
 0x9ec   :  { %v6555_v15 = vpop.eup %6554  ;;  %v4200_v57 = vmul.f32 %v6553_v48, %v6547_v41 }
 0x9ed   :  { %v6557_v23 = vpop.eup %6556  ;;  %v4198_v16 = vmul.f32 0.0, %v6555_v15 }
 0x9ee   :  { %v6559_v47 = vpop.eup %6558 }
 0x9ef   :  { %v6561_v30 = vpop.eup %6560  ;;  %v7849_v42 = vadd.f32 %v4200_v57, %v4198_v16  ;;  %v4201_v39 = vmul.f32 %v6559_v47, %v6557_v23 }
 0x9f0   :  { %v4199_v61 = vmul.f32 0.0, %v6561_v30  ;;  %v6563_v3 = vpop.eup %6562 }
 0x9f1   :  { %6564 = vtanh.f32 %v7849_v42 }
 0x9f2   :  { %v7852_v25 = vadd.f32 %v4201_v39, %v4199_v61  ;;  %6566 = vrcp.f32 %v4195_v24 }
 0x9f4   :  { %6568 = vtanh.f32 %v7852_v25 }
 0x9fb   :  { %v6565_v5 = vpop.eup %6564 }
 0x9fc   :  { %v6567_v60 = vpop.eup %6566  ;;  %v4206_v2 = vmul.f32 %v6565_v5, %v6563_v3 }
 0x9fe   :  { %v6569_v14 = vpop.eup %6568 }
 0x9ff   :  { %v4207_v9 = vmul.f32 %v6569_v14, %v6567_v60 }
 0xa01   :  { %v4216_v56 = vpack.c.bf16 %v4207_v9, %v4206_v2 }
 0xa03   :  { %4250 = vmatmul.mubr.bf16.vlgmr.msra.gmra.mrb[36].mxu0 %v4216_v56  ;;  %4293 = vmatmul.mubr.bf16.vlgmr.msra.gmra.mrb[36].mxu1 %v4216_v56 }
 0xa04   :  { %4363 = vmatpush1.bf16.msra.mxu0 %v7651_v62  ;;  %4406 = vmatpush1.bf16.msra.mxu1 %v7684_v27 }
 0xa05   :  { %4364 = vmatprep.subr.bf16.mxu0 %v7688_v45  ;;  %4407 = vmatprep.subr.bf16.mxu1 %v7690_v34 }
 0xa06   :  { %4394 = vmatprep.mubr.bf16.mxu0 %v6926_v0  ;;  %4437 = vmatprep.mubr.bf16.mxu1 %v6926_v0 }
 0xa08   :  { %4365 = vmatpush1.bf16.msra.mxu0 %v7692_v28  ;;  %4408 = vmatpush1.bf16.msra.mxu1 %v7694_v63 }
 0xa09   :  { %4366 = vmatprep.subr.bf16.mxu0 %v7697_v22  ;;  %4409 = vmatprep.subr.bf16.mxu1 %v7704_v29 }
 0xa0c   :  { %4367 = vmatpush1.bf16.msra.mxu0 %v7701_v4  ;;  %4410 = vmatpush1.bf16.msra.mxu1 %v7709_v36 }
 0xa0d   :  { %4368 = vmatprep.subr.bf16.mxu0 %v7707_v13  ;;  %4411 = vmatprep.subr.bf16.mxu1 %v7711_v38 }
 0xa10   :  { %4369 = vmatpush1.bf16.msra.mxu0 %v7715_v40  ;;  %4412 = vmatpush1.bf16.msra.mxu1 %v7718_v8 }
 0xa11   :  { %4370 = vmatprep.subr.bf16.mxu0 %v7721_v53  ;;  %4413 = vmatprep.subr.bf16.mxu1 %v7724_v32 }
 0xa14   :  { %4371 = vmatpush1.bf16.msra.mxu0 %v7727_v19  ;;  %4414 = vmatpush1.bf16.msra.mxu1 %v7730_v49 }
 0xa15   :  { %4372 = vmatprep.subr.bf16.mxu0 %v7733_v35  ;;  %4415 = vmatprep.subr.bf16.mxu1 %v7736_v17 }
 0xa18   :  { %4373 = vmatpush1.bf16.msra.mxu0 %v7739_v43  ;;  %4416 = vmatpush1.bf16.msra.mxu1 %v7742_v52 }
 0xa19   :  { %4374 = vmatprep.subr.bf16.mxu0 %v7745_v6  ;;  %4417 = vmatprep.subr.bf16.mxu1 %v7753_v26 }
 0xa1c   :  { %4375 = vmatpush1.bf16.msra.mxu0 %v7749_v7  ;;  %4418 = vmatpush1.bf16.msra.mxu1 %v7757_v20 }
 0xa1d   :  { %4376 = vmatprep.subr.bf16.mxu0 %v7755_v10  ;;  %4419 = vmatprep.subr.bf16.mxu1 %v7760_v44 }
 0xa20   :  { %4377 = vmatpush1.bf16.msra.mxu0 %v7763_v18  ;;  %4420 = vmatpush1.bf16.msra.mxu1 %v7766_v21 }
 0xa21   :  { %4507 = vmatprep.subr.bf16.mxu0 %v7648_v1  ;;  %4550 = vmatprep.subr.bf16.mxu1 %v7682_v31 }
 0xad6   :  { %v4251_v11 = vpop.f32.mrb[36].mxu0  ;;  %v4294_v50 = vpop.f32.mrb[36].mxu1 }
 0xad7   :  { %v5811_v12 = vadd.f32 %v4251_v11, %v7827_v46  ;;  %v4253_v55 = vpop.f32.mrb[37].mxu0  ;;  %v4296_v41 = vpop.f32.mrb[37].mxu1  ;;  %v5843_v56 = vadd.f32 %v4294_v50, %v7845_v33 }
 0xad8   :  { %v5812_v54 = vadd.f32 %v4253_v55, %v7831_v51  ;;  %v4255_v58 = vpop.f32.mrb[38].mxu0  ;;  %v4298_v48 = vpop.f32.mrb[38].mxu1  ;;  %v5844_v61 = vadd.f32 %v4296_v41, %v7837_v59 }
 0xad9   :  { %v4311_v15 = vsub.f32 0.0, %v5811_v12  ;;  %v5813_v57 = vadd.f32 %v4255_v58, %v7827_v46  ;;  %v4257_v23 = vpop.f32.mrb[39].mxu0  ;;  %v4300_v16 = vpop.f32.mrb[39].mxu1  ;;  %v5845_v41 = vadd.f32 %v4298_v48, %v7845_v33 }
 0xada   :  { %v4321_v37 = vsub.f32 0.0, %v5812_v54  ;;  %v5814_v47 = vadd.f32 %v4257_v23, %v7831_v51  ;;  %v5846_v60 = vadd.f32 %v4300_v16, %v7837_v59  ;;  %v4333_v2 = vsub.f32 0.0, %v5844_v61 }
 0xadb   :  { %v4313_v30 = vmul.f32 1.442695, %v4311_v15  ;;  %v4312_v39 = vsub.f32 0.0, %v5813_v57 }
 0xadc   :  { %v4323_v24 = vmul.f32 1.442695, %v4321_v37  ;;  %v4322_v3 = vsub.f32 0.0, %v5814_v47  ;;  %v4334_v9 = vsub.f32 0.0, %v5846_v60  ;;  %v4335_v11 = vmul.f32 1.442695, %v4333_v2 }
 0xadd   :  { %6570 = vpow2.f32 %v4313_v30  ;;  %v4315_v5 = vmul.f32 1.442695, %v4312_v39 }
 0xade   :  { %6572 = vpow2.f32 %v4323_v24  ;;  %v4325_v14 = vmul.f32 1.442695, %v4322_v3  ;;  %v4337_v12 = vmul.f32 1.442695, %v4334_v9 }
 0xadf   :  { %6574 = vpow2.f32 %v4315_v5 }
 0xae0   :  { %6576 = vpow2.f32 %v4325_v14 }
 0xae1   :  { %6578 = vtanh.f32 %v5843_v56 }
 0xae2   :  { %6580 = vpow2.f32 %v4335_v11 }
 0xae3   :  { %6582 = vpow2.f32 %v4337_v12 }
 0xae7   :  { %v6571_v55 = vpop.eup %6570 }
 0xae8   :  { %v6573_v54 = vpop.eup %6572  ;;  %v4317_v58 = vadd.f32 1.0, %v6571_v55 }
 0xae9   :  { %v4327_v15 = vadd.f32 1.0, %v6573_v54  ;;  %v6575_v57 = vpop.eup %6574 }
 0xaea   :  { %6584 = vrcp.f32 %v4317_v58  ;;  %v6577_v23 = vpop.eup %6576  ;;  %v4318_v16 = vadd.f32 1.0, %v6575_v57 }
 0xaeb   :  { %6586 = vrcp.f32 %v4327_v15  ;;  %v4328_v37 = vadd.f32 1.0, %v6577_v23  ;;  %v6579_v50 = vpop.eup %6578 }
 0xaec   :  { %6588 = vtanh.f32 %v5845_v41  ;;  %v6581_v47 = vpop.eup %6580 }
 0xaed   :  { %6590 = vrcp.f32 %v4318_v16  ;;  %v6583_v30 = vpop.eup %6582  ;;  %v4339_v5 = vadd.f32 1.0, %v6581_v47 }
 0xaee   :  { %6592 = vrcp.f32 %v4328_v37  ;;  %v4340_v56 = vadd.f32 1.0, %v6583_v30 }
 0xaef   :  { %6594 = vrcp.f32 %v4339_v5 }
 0xaf4   :  { %v6585_v39 = vpop.eup %6584 }
 0xaf5   :  { %v6587_v24 = vpop.eup %6586  ;;  %v4345_v61 = vmul.f32 %v6585_v39, %v6579_v50 }
 0xaf6   :  { %v6589_v3 = vpop.eup %6588  ;;  %v4343_v48 = vmul.f32 %v6587_v24, %v7849_v42 }
 0xaf7   :  { %v6591_v60 = vpop.eup %6590 }
 0xaf8   :  { %v6593_v14 = vpop.eup %6592  ;;  %v7898_v2 = vadd.f32 %v4345_v61, %v4343_v48  ;;  %v4346_v9 = vmul.f32 %v6591_v60, %v6589_v3 }
 0xaf9   :  { %v4344_v11 = vmul.f32 %v6593_v14, %v7852_v25  ;;  %v6595_v55 = vpop.eup %6594 }
 0xafa   :  { %6596 = vtanh.f32 %v7898_v2 }
 0xafb   :  { %v7902_v12 = vadd.f32 %v4346_v9, %v4344_v11  ;;  %6598 = vrcp.f32 %v4340_v56 }
 0xafd   :  { %6600 = vtanh.f32 %v7902_v12 }
 0xb04   :  { %v6597_v54 = vpop.eup %6596 }
 0xb05   :  { %v6599_v42 = vpop.eup %6598  ;;  %v4351_v41 = vmul.f32 %v6597_v54, %v6595_v55 }
 0xb07   :  { %v6601_v58 = vpop.eup %6600 }
 0xb08   :  { %v4352_v15 = vmul.f32 %v6601_v58, %v6599_v42 }
 0xb0a   :  { %v4361_v57 = vpack.c.bf16 %v4352_v15, %v4351_v41 }
 0xb0c   :  { %4395 = vmatmul.mubr.bf16.vlgmr.msra.gmra.mrb[40].mxu0 %v4361_v57  ;;  %4438 = vmatmul.mubr.bf16.vlgmr.msra.gmra.mrb[40].mxu1 %v4361_v57 }
 0xb0d   :  { %4508 = vmatpush1.bf16.msra.mxu0 %v7651_v62  ;;  %4551 = vmatpush1.bf16.msra.mxu1 %v7684_v27 }
 0xb0e   :  { %4509 = vmatprep.subr.bf16.mxu0 %v7688_v45  ;;  %4552 = vmatprep.subr.bf16.mxu1 %v7690_v34 }
 0xb0f   :  { %4539 = vmatprep.mubr.bf16.mxu0 %v6926_v0  ;;  %4582 = vmatprep.mubr.bf16.mxu1 %v6926_v0 }
 0xb11   :  { %4510 = vmatpush1.bf16.msra.mxu0 %v7692_v28  ;;  %4553 = vmatpush1.bf16.msra.mxu1 %v7694_v63 }
 0xb12   :  { %4511 = vmatprep.subr.bf16.mxu0 %v7697_v22  ;;  %4554 = vmatprep.subr.bf16.mxu1 %v7704_v29 }
 0xb15   :  { %4512 = vmatpush1.bf16.msra.mxu0 %v7701_v4  ;;  %4555 = vmatpush1.bf16.msra.mxu1 %v7709_v36 }
 0xb16   :  { %4513 = vmatprep.subr.bf16.mxu0 %v7707_v13  ;;  %4556 = vmatprep.subr.bf16.mxu1 %v7711_v38 }
 0xb19   :  { %4514 = vmatpush1.bf16.msra.mxu0 %v7715_v40  ;;  %4557 = vmatpush1.bf16.msra.mxu1 %v7718_v8 }
 0xb1a   :  { %4515 = vmatprep.subr.bf16.mxu0 %v7721_v53  ;;  %4558 = vmatprep.subr.bf16.mxu1 %v7724_v32 }
 0xb1d   :  { %4516 = vmatpush1.bf16.msra.mxu0 %v7727_v19  ;;  %4559 = vmatpush1.bf16.msra.mxu1 %v7730_v49 }
 0xb1e   :  { %4517 = vmatprep.subr.bf16.mxu0 %v7733_v35  ;;  %4560 = vmatprep.subr.bf16.mxu1 %v7736_v17 }
 0xb21   :  { %4518 = vmatpush1.bf16.msra.mxu0 %v7739_v43  ;;  %4561 = vmatpush1.bf16.msra.mxu1 %v7742_v52 }
 0xb22   :  { %4519 = vmatprep.subr.bf16.mxu0 %v7745_v6  ;;  %4562 = vmatprep.subr.bf16.mxu1 %v7753_v26 }
 0xb25   :  { %4520 = vmatpush1.bf16.msra.mxu0 %v7749_v7  ;;  %4563 = vmatpush1.bf16.msra.mxu1 %v7757_v20 }
 0xb26   :  { %4521 = vmatprep.subr.bf16.mxu0 %v7755_v10  ;;  %4564 = vmatprep.subr.bf16.mxu1 %v7760_v44 }
 0xb29   :  { %4522 = vmatpush1.bf16.msra.mxu0 %v7763_v18  ;;  %4565 = vmatpush1.bf16.msra.mxu1 %v7766_v21 }
 0xb2a   :  { %4652 = vmatprep.subr.bf16.mxu0 %v7648_v1  ;;  %4695 = vmatprep.subr.bf16.mxu1 %v7682_v31 }
 0xbdf   :  { %v4396_v25 = vpop.f32.mrb[40].mxu0  ;;  %v4439_v23 = vpop.f32.mrb[40].mxu1 }
 0xbe0   :  { %v5815_v16 = vadd.f32 %v4396_v25, %v7827_v46  ;;  %v4398_v37 = vpop.f32.mrb[41].mxu0  ;;  %v4441_v50 = vpop.f32.mrb[41].mxu1  ;;  %v5847_v41 = vadd.f32 %v4439_v23, %v7845_v33 }
 0xbe1   :  { %v5816_v47 = vadd.f32 %v4398_v37, %v7831_v51  ;;  %v4400_v30 = vpop.f32.mrb[42].mxu0  ;;  %v4443_v39 = vpop.f32.mrb[42].mxu1  ;;  %v5848_v9 = vadd.f32 %v4441_v50, %v7837_v59 }
 0xbe2   :  { %v4456_v24 = vsub.f32 0.0, %v5815_v16  ;;  %v5817_v61 = vadd.f32 %v4400_v30, %v7827_v46  ;;  %v4402_v3 = vpop.f32.mrb[43].mxu0  ;;  %v4445_v48 = vpop.f32.mrb[43].mxu1  ;;  %v5849_v50 = vadd.f32 %v4443_v39, %v7845_v33 }
 0xbe3   :  { %v4466_v5 = vsub.f32 0.0, %v5816_v47  ;;  %v5818_v1 = vadd.f32 %v4402_v3, %v7831_v51  ;;  %v5850_v55 = vadd.f32 %v4445_v48, %v7837_v59  ;;  %v4478_v42 = vsub.f32 0.0, %v5848_v9 }
 0xbe4   :  { %v4458_v60 = vmul.f32 1.442695, %v4456_v24  ;;  %v4457_v31 = vsub.f32 0.0, %v5817_v61 }
 0xbe5   :  { %v4468_v14 = vmul.f32 1.442695, %v4466_v5  ;;  %v4467_v56 = vsub.f32 0.0, %v5818_v1  ;;  %v4479_v58 = vsub.f32 0.0, %v5850_v55  ;;  %v4480_v15 = vmul.f32 1.442695, %v4478_v42 }
 0xbe6   :  { %6602 = vpow2.f32 %v4458_v60  ;;  %v4460_v11 = vmul.f32 1.442695, %v4457_v31 }
 0xbe7   :  { %6604 = vpow2.f32 %v4468_v14  ;;  %v4470_v54 = vmul.f32 1.442695, %v4467_v56  ;;  %v4482_v57 = vmul.f32 1.442695, %v4479_v58 }
 0xbe8   :  { %6606 = vpow2.f32 %v4460_v11 }
 0xbe9   :  { %6608 = vpow2.f32 %v4470_v54 }
 0xbea   :  { %6610 = vtanh.f32 %v5847_v41 }
 0xbeb   :  { %6612 = vpow2.f32 %v4480_v15 }
 0xbec   :  { %6614 = vpow2.f32 %v4482_v57 }
 0xbf0   :  { %v6603_v25 = vpop.eup %6602 }
 0xbf1   :  { %v6605_v16 = vpop.eup %6604  ;;  %v4462_v37 = vadd.f32 1.0, %v6603_v25 }
 0xbf2   :  { %v4472_v47 = vadd.f32 1.0, %v6605_v16  ;;  %v6607_v30 = vpop.eup %6606 }
 0xbf3   :  { %6616 = vrcp.f32 %v4462_v37  ;;  %v6609_v24 = vpop.eup %6608  ;;  %v4463_v61 = vadd.f32 1.0, %v6607_v30 }
 0xbf4   :  { %6618 = vrcp.f32 %v4472_v47  ;;  %v4473_v3 = vadd.f32 1.0, %v6609_v24  ;;  %v6611_v23 = vpop.eup %6610 }
 0xbf5   :  { %6620 = vtanh.f32 %v5849_v50  ;;  %v6613_v48 = vpop.eup %6612 }
 0xbf6   :  { %6622 = vrcp.f32 %v4463_v61  ;;  %v6615_v5 = vpop.eup %6614  ;;  %v4484_v9 = vadd.f32 1.0, %v6613_v48 }
 0xbf7   :  { %6624 = vrcp.f32 %v4473_v3  ;;  %v4485_v42 = vadd.f32 1.0, %v6615_v5 }
 0xbf8   :  { %6626 = vrcp.f32 %v4484_v9 }
 0xbfd   :  { %v6617_v1 = vpop.eup %6616 }
 0xbfe   :  { %v6619_v60 = vpop.eup %6618  ;;  %v4490_v31 = vmul.f32 %v6617_v1, %v6611_v23 }
 0xbff   :  { %v6621_v14 = vpop.eup %6620  ;;  %v4488_v39 = vmul.f32 %v6619_v60, %v7898_v2 }
 0xc00   :  { %v6623_v56 = vpop.eup %6622 }
 0xc01   :  { %v6625_v11 = vpop.eup %6624  ;;  %v7948_v55 = vadd.f32 %v4490_v31, %v4488_v39  ;;  %v4491_v54 = vmul.f32 %v6623_v56, %v6621_v14 }
 0xc02   :  { %v4489_v58 = vmul.f32 %v6625_v11, %v7902_v12  ;;  %v6627_v15 = vpop.eup %6626 }
 0xc03   :  { %6628 = vtanh.f32 %v7948_v55 }
 0xc04   :  { %v7952_v41 = vadd.f32 %v4491_v54, %v4489_v58  ;;  %6630 = vrcp.f32 %v4485_v42 }
 0xc06   :  { %6632 = vtanh.f32 %v7952_v41 }
 0xc0d   :  { %v6629_v57 = vpop.eup %6628 }
 0xc0e   :  { %v6631_v2 = vpop.eup %6630  ;;  %v4496_v16 = vmul.f32 %v6629_v57, %v6627_v15 }
 0xc10   :  { %v6633_v25 = vpop.eup %6632 }
 0xc11   :  { %v4497_v37 = vmul.f32 %v6633_v25, %v6631_v2 }
 0xc13   :  { %v4506_v50 = vpack.c.bf16 %v4497_v37, %v4496_v16 }
 0xc15   :  { %4540 = vmatmul.mubr.bf16.vlgmr.msra.gmra.mrb[44].mxu0 %v4506_v50  ;;  %4583 = vmatmul.mubr.bf16.vlgmr.msra.gmra.mrb[44].mxu1 %v4506_v50 }
 0xc16   :  { %4653 = vmatpush1.bf16.msra.mxu0 %v7651_v62  ;;  %4696 = vmatpush1.bf16.msra.mxu1 %v7684_v27  ;;  %v7987_v62 = vld [vmem:[#allocation9 + $0x4] ss:$16 sps:$4 sm:$0xff]   ;;  %v7990_v27 = vld [vmem:[#allocation9 + $0xc] ss:$16 sps:$4 sm:$0xff]  }
 0xc17   :  { %4654 = vmatprep.subr.bf16.mxu0 %v7688_v45  ;;  %4697 = vmatprep.subr.bf16.mxu1 %v7690_v34 }
 0xc18   :  { %4684 = vmatprep.mubr.bf16.mxu0 %v6926_v0  ;;  %4727 = vmatprep.mubr.bf16.mxu1 %v6926_v0 }
 0xc1a   :  { %4655 = vmatpush1.bf16.msra.mxu0 %v7692_v28  ;;  %4698 = vmatpush1.bf16.msra.mxu1 %v7694_v63 }
 0xc1b   :  { %4656 = vmatprep.subr.bf16.mxu0 %v7697_v22  ;;  %4699 = vmatprep.subr.bf16.mxu1 %v7704_v29 }
 0xc1e   :  { %4657 = vmatpush1.bf16.msra.mxu0 %v7701_v4  ;;  %4700 = vmatpush1.bf16.msra.mxu1 %v7709_v36 }
 0xc1f   :  { %4658 = vmatprep.subr.bf16.mxu0 %v7707_v13  ;;  %4701 = vmatprep.subr.bf16.mxu1 %v7711_v38 }
 0xc22   :  { %4659 = vmatpush1.bf16.msra.mxu0 %v7715_v40  ;;  %4702 = vmatpush1.bf16.msra.mxu1 %v7718_v8 }
 0xc23   :  { %4660 = vmatprep.subr.bf16.mxu0 %v7721_v53  ;;  %4703 = vmatprep.subr.bf16.mxu1 %v7724_v32 }
 0xc26   :  { %4661 = vmatpush1.bf16.msra.mxu0 %v7727_v19  ;;  %4704 = vmatpush1.bf16.msra.mxu1 %v7730_v49 }
 0xc27   :  { %4662 = vmatprep.subr.bf16.mxu0 %v7733_v35  ;;  %4705 = vmatprep.subr.bf16.mxu1 %v7736_v17 }
 0xc2a   :  { %4663 = vmatpush1.bf16.msra.mxu0 %v7739_v43  ;;  %4706 = vmatpush1.bf16.msra.mxu1 %v7742_v52 }
 0xc2b   :  { %4664 = vmatprep.subr.bf16.mxu0 %v7745_v6  ;;  %4707 = vmatprep.subr.bf16.mxu1 %v7753_v26 }
 0xc2e   :  { %4665 = vmatpush1.bf16.msra.mxu0 %v7749_v7  ;;  %4708 = vmatpush1.bf16.msra.mxu1 %v7757_v20 }
 0xc2f   :  { %4666 = vmatprep.subr.bf16.mxu0 %v7755_v10  ;;  %4709 = vmatprep.subr.bf16.mxu1 %v7760_v44 }
 0xc32   :  { %4667 = vmatpush1.bf16.msra.mxu0 %v7763_v18  ;;  %4710 = vmatpush1.bf16.msra.mxu1 %v7766_v21 }
 0xc33   :  { %4797 = vmatprep.subr.bf16.mxu0 %v7987_v62  ;;  %4840 = vmatprep.subr.bf16.mxu1 %v7990_v27 }
 0xce8   :  { %v4541_v45 = vpop.f32.mrb[44].mxu0  ;;  %v4584_v34 = vpop.f32.mrb[44].mxu1 }
 0xce9   :  { %v5819_v28 = vadd.f32 %v4541_v45, %v7827_v46  ;;  %v4543_v63 = vpop.f32.mrb[45].mxu0  ;;  %v4586_v22 = vpop.f32.mrb[45].mxu1  ;;  %v5851_v20 = vadd.f32 %v4584_v34, %v7845_v33 }
 0xcea   :  { %v5820_v4 = vadd.f32 %v4543_v63, %v7831_v51  ;;  %v4545_v29 = vpop.f32.mrb[46].mxu0  ;;  %v4588_v13 = vpop.f32.mrb[46].mxu1  ;;  %v5852_v17 = vadd.f32 %v4586_v22, %v7837_v59  ;;  %v8009_v63 = vld [vmem:[#allocation9] ss:$16 sps:$4 sm:$0xff]   ;;  %v8015_v22 = vld [vmem:[#allocation9 + $0x24] ss:$16 sps:$4 sm:$0xff]  }
 0xceb   :  { %v4601_v36 = vsub.f32 0.0, %v5819_v28  ;;  %v5821_v38 = vadd.f32 %v4545_v29, %v7827_v46  ;;  %v4547_v40 = vpop.f32.mrb[47].mxu0  ;;  %v4590_v8 = vpop.f32.mrb[47].mxu1  ;;  %v5853_v30 = vadd.f32 %v4588_v13, %v7845_v33  ;;  %v8023_v29 = vld [vmem:[#allocation9 + $0x20] ss:$16 sps:$4 sm:$0xff]  }
 0xcec   :  { %v4611_v53 = vsub.f32 0.0, %v5820_v4  ;;  %v5822_v32 = vadd.f32 %v4547_v40, %v7831_v51  ;;  %v5854_v6 = vadd.f32 %v4590_v8, %v7837_v59  ;;  %v4623_v26 = vsub.f32 0.0, %v5852_v17  ;;  %v8018_v4 = vld [vmem:[#allocation9 + $0x2c] ss:$16 sps:$4 sm:$0xff]   ;;  %v8026_v13 = vld [vmem:[#allocation9 + $0x28] ss:$16 sps:$4 sm:$0xff]  }
 0xced   :  { %v4603_v19 = vmul.f32 1.442695, %v4601_v36  ;;  %v4602_v49 = vsub.f32 0.0, %v5821_v38  ;;  %v8029_v36 = vld [vmem:[#allocation9 + $0x44] ss:$16 sps:$4 sm:$0xff]  }
 0xcee   :  { %v4613_v35 = vmul.f32 1.442695, %v4611_v53  ;;  %v4612_v43 = vsub.f32 0.0, %v5822_v32  ;;  %v4624_v10 = vsub.f32 0.0, %v5854_v6  ;;  %v4625_v44 = vmul.f32 1.442695, %v4623_v26 }
 0xcef   :  { %6634 = vpow2.f32 %v4603_v19  ;;  %v4605_v52 = vmul.f32 1.442695, %v4602_v49  ;;  %v8032_v38 = vld [vmem:[#allocation9 + $0x4c] ss:$16 sps:$4 sm:$0xff]   ;;  %v8035_v40 = vld [vmem:[#allocation9 + $0x40] ss:$16 sps:$4 sm:$0xff]  }
 0xcf0   :  { %6636 = vpow2.f32 %v4613_v35  ;;  %v4615_v7 = vmul.f32 1.442695, %v4612_v43  ;;  %v4627_v18 = vmul.f32 1.442695, %v4624_v10  ;;  %v8038_v8 = vld [vmem:[#allocation9 + $0x48] ss:$16 sps:$4 sm:$0xff]  }
 0xcf1   :  { %6638 = vpow2.f32 %v4605_v52  ;;  %v8041_v53 = vld [vmem:[#allocation9 + $0x64] ss:$16 sps:$4 sm:$0xff]   ;;  %v8044_v32 = vld [vmem:[#allocation9 + $0x6c] ss:$16 sps:$4 sm:$0xff]   ;;  %v8047_v19 = vld [vmem:[#allocation9 + $0x60] ss:$16 sps:$4 sm:$0xff]  }
 0xcf2   :  { %6640 = vpow2.f32 %v4615_v7  ;;  %v8050_v49 = vld [vmem:[#allocation9 + $0x68] ss:$16 sps:$4 sm:$0xff]   ;;  %v8053_v35 = vld [vmem:[#allocation9 + $0x84] ss:$16 sps:$4 sm:$0xff]   ;;  %v8056_v17 = vld [vmem:[#allocation9 + $0x8c] ss:$16 sps:$4 sm:$0xff]  }
 0xcf3   :  { %6642 = vtanh.f32 %v5851_v20  ;;  %v8059_v43 = vld [vmem:[#allocation9 + $0x80] ss:$16 sps:$4 sm:$0xff]   ;;  %v8062_v52 = vld [vmem:[#allocation9 + $0x88] ss:$16 sps:$4 sm:$0xff]   ;;  %v8065_v6 = vld [vmem:[#allocation9 + $0xa4] ss:$16 sps:$4 sm:$0xff]  }
 0xcf4   :  { %6644 = vpow2.f32 %v4625_v44  ;;  %v8068_v7 = vld [vmem:[#allocation9 + $0xac] ss:$16 sps:$4 sm:$0xff]   ;;  %v8071_v26 = vld [vmem:[#allocation9 + $0xa0] ss:$16 sps:$4 sm:$0xff]   ;;  %v8074_v10 = vld [vmem:[#allocation9 + $0xa8] ss:$16 sps:$4 sm:$0xff]  }
 0xcf5   :  { %6646 = vpow2.f32 %v4627_v18  ;;  %v8077_v20 = vld [vmem:[#allocation9 + $0xc4] ss:$16 sps:$4 sm:$0xff]   ;;  %v8080_v44 = vld [vmem:[#allocation9 + $0xcc] ss:$16 sps:$4 sm:$0xff]   ;;  %v8083_v18 = vld [vmem:[#allocation9 + $0xc0] ss:$16 sps:$4 sm:$0xff]  }
 0xcf9   :  { %v6635_v21 = vpop.eup %6634 }
 0xcfa   :  { %v6637_v12 = vpop.eup %6636  ;;  %v4607_v47 = vadd.f32 1.0, %v6635_v21  ;;  %v8086_v21 = vld [vmem:[#allocation9 + $0xc8] ss:$16 sps:$4 sm:$0xff]  }
 0xcfb   :  { %v4617_v24 = vadd.f32 1.0, %v6637_v12  ;;  %v6639_v61 = vpop.eup %6638  ;;  %v8089_v12 = vld [vmem:[#allocation9 + $0xe4] ss:$16 sps:$4 sm:$0xff]  }
 0xcfc   :  { %6648 = vrcp.f32 %v4607_v47  ;;  %v6641_v3 = vpop.eup %6640  ;;  %v4608_v23 = vadd.f32 1.0, %v6639_v61  ;;  %v8092_v47 = vld [vmem:[#allocation9 + $0xec] ss:$16 sps:$4 sm:$0xff]  }
 0xcfd   :  { %6650 = vrcp.f32 %v4617_v24  ;;  %v4618_v48 = vadd.f32 1.0, %v6641_v3  ;;  %v6643_v5 = vpop.eup %6642  ;;  %v8098_v24 = vld [vmem:[#allocation9 + $0xe8] ss:$16 sps:$4 sm:$0xff]  }
 0xcfe   :  { %6652 = vtanh.f32 %v5853_v30  ;;  %v6645_v1 = vpop.eup %6644  ;;  %v8095_v30 = vld [vmem:[#allocation9 + $0xe0] ss:$16 sps:$4 sm:$0xff]  }
 0xcff   :  { %6654 = vrcp.f32 %v4608_v23  ;;  %v6647_v60 = vpop.eup %6646  ;;  %v4629_v11 = vadd.f32 1.0, %v6645_v1 }
 0xd00   :  { %6656 = vrcp.f32 %v4618_v48  ;;  %v4630_v57 = vadd.f32 1.0, %v6647_v60 }
 0xd01   :  { %6658 = vrcp.f32 %v4629_v11 }
 0xd06   :  { %v6649_v31 = vpop.eup %6648 }
 0xd07   :  { %v6651_v14 = vpop.eup %6650  ;;  %v4635_v39 = vmul.f32 %v6649_v31, %v6643_v5 }
 0xd08   :  { %v6653_v9 = vpop.eup %6652  ;;  %v4633_v56 = vmul.f32 %v6651_v14, %v7948_v55 }
 0xd09   :  { %v6655_v54 = vpop.eup %6654 }
 0xd0a   :  { %v6657_v42 = vpop.eup %6656  ;;  %v8002_v58 = vadd.f32 %v4635_v39, %v4633_v56  ;;  %v4636_v15 = vmul.f32 %v6655_v54, %v6653_v9 }
 0xd0b   :  { %v4634_v2 = vmul.f32 %v6657_v42, %v7952_v41  ;;  %v6659_v16 = vpop.eup %6658  ;;  %v8012_v41 = vld [vmem:[#allocation9 + $0x8] ss:$16 sps:$4 sm:$0xff]  }
 0xd0c   :  { %6660 = vtanh.f32 %v8002_v58 }
 0xd0d   :  { %v8006_v25 = vadd.f32 %v4636_v15, %v4634_v2  ;;  %6662 = vrcp.f32 %v4630_v57 }
 0xd0f   :  { %6664 = vtanh.f32 %v8006_v25 }
 0xd16   :  { %v6661_v37 = vpop.eup %6660 }
 0xd17   :  { %v6663_v55 = vpop.eup %6662  ;;  %v4641_v45 = vmul.f32 %v6661_v37, %v6659_v16 }
 0xd19   :  { %v6665_v50 = vpop.eup %6664 }
 0xd1a   :  { %v4642_v34 = vmul.f32 %v6665_v50, %v6663_v55 }
 0xd1c   :  { %v4651_v28 = vpack.c.bf16 %v4642_v34, %v4641_v45 }
 0xd1e   :  { %4685 = vmatmul.mubr.bf16.vlgmr.msra.gmra.mrb[48].mxu0 %v4651_v28  ;;  %4728 = vmatmul.mubr.bf16.vlgmr.msra.gmra.mrb[48].mxu1 %v4651_v28 }
 0xd1f   :  { %4798 = vmatpush1.bf16.msra.mxu0 %v8009_v63  ;;  %4841 = vmatpush1.bf16.msra.mxu1 %v8012_v41 }
 0xd20   :  { %4799 = vmatprep.subr.bf16.mxu0 %v8015_v22  ;;  %4842 = vmatprep.subr.bf16.mxu1 %v8018_v4 }
 0xd21   :  { %4829 = vmatprep.mubr.bf16.mxu0 %v6926_v0  ;;  %4872 = vmatprep.mubr.bf16.mxu1 %v6926_v0 }
 0xd23   :  { %4800 = vmatpush1.bf16.msra.mxu0 %v8023_v29  ;;  %4843 = vmatpush1.bf16.msra.mxu1 %v8026_v13 }
 0xd24   :  { %4801 = vmatprep.subr.bf16.mxu0 %v8029_v36  ;;  %4844 = vmatprep.subr.bf16.mxu1 %v8032_v38 }
 0xd27   :  { %4802 = vmatpush1.bf16.msra.mxu0 %v8035_v40  ;;  %4845 = vmatpush1.bf16.msra.mxu1 %v8038_v8 }
 0xd28   :  { %4803 = vmatprep.subr.bf16.mxu0 %v8041_v53  ;;  %4846 = vmatprep.subr.bf16.mxu1 %v8044_v32 }
 0xd2b   :  { %4804 = vmatpush1.bf16.msra.mxu0 %v8047_v19  ;;  %4847 = vmatpush1.bf16.msra.mxu1 %v8050_v49 }
 0xd2c   :  { %4805 = vmatprep.subr.bf16.mxu0 %v8053_v35  ;;  %4848 = vmatprep.subr.bf16.mxu1 %v8056_v17 }
 0xd2f   :  { %4806 = vmatpush1.bf16.msra.mxu0 %v8059_v43  ;;  %4849 = vmatpush1.bf16.msra.mxu1 %v8062_v52 }
 0xd30   :  { %4807 = vmatprep.subr.bf16.mxu0 %v8065_v6  ;;  %4850 = vmatprep.subr.bf16.mxu1 %v8068_v7 }
 0xd33   :  { %4808 = vmatpush1.bf16.msra.mxu0 %v8071_v26  ;;  %4851 = vmatpush1.bf16.msra.mxu1 %v8074_v10 }
 0xd34   :  { %4809 = vmatprep.subr.bf16.mxu0 %v8077_v20  ;;  %4852 = vmatprep.subr.bf16.mxu1 %v8080_v44 }
 0xd37   :  { %4810 = vmatpush1.bf16.msra.mxu0 %v8083_v18  ;;  %4853 = vmatpush1.bf16.msra.mxu1 %v8086_v21 }
 0xd38   :  { %4811 = vmatprep.subr.bf16.mxu0 %v8089_v12  ;;  %4854 = vmatprep.subr.bf16.mxu1 %v8092_v47 }
 0xd3b   :  { %4812 = vmatpush1.bf16.msra.mxu0 %v8095_v30  ;;  %4855 = vmatpush1.bf16.msra.mxu1 %v8098_v24 }
 0xd3c   :  { %4942 = vmatprep.subr.bf16.mxu0 %v7987_v62  ;;  %4985 = vmatprep.subr.bf16.mxu1 %v7990_v27 }
 0xdf1   :  { %v4686_v61 = vpop.f32.mrb[48].mxu0  ;;  %v4729_v3 = vpop.f32.mrb[48].mxu1 }
 0xdf2   :  { %v5823_v23 = vadd.f32 %v4686_v61, %v7827_v46  ;;  %v4688_v48 = vpop.f32.mrb[49].mxu0  ;;  %v4731_v5 = vpop.f32.mrb[49].mxu1  ;;  %v5855_v28 = vadd.f32 %v4729_v3, %v7845_v33 }
 0xdf3   :  { %v5824_v1 = vadd.f32 %v4688_v48, %v7831_v51  ;;  %v4690_v60 = vpop.f32.mrb[50].mxu0  ;;  %v4733_v31 = vpop.f32.mrb[50].mxu1  ;;  %v5856_v2 = vadd.f32 %v4731_v5, %v7837_v59 }
 0xdf4   :  { %v4746_v14 = vsub.f32 0.0, %v5823_v23  ;;  %v5825_v39 = vadd.f32 %v4690_v60, %v7827_v46  ;;  %v4692_v9 = vpop.f32.mrb[51].mxu0  ;;  %v4735_v56 = vpop.f32.mrb[51].mxu1  ;;  %v5857_v5 = vadd.f32 %v4733_v31, %v7845_v33 }
 0xdf5   :  { %v4756_v11 = vsub.f32 0.0, %v5824_v1  ;;  %v5826_v54 = vadd.f32 %v4692_v9, %v7831_v51  ;;  %v5858_v55 = vadd.f32 %v4735_v56, %v7837_v59  ;;  %v4768_v45 = vsub.f32 0.0, %v5856_v2 }
 0xdf6   :  { %v4748_v42 = vmul.f32 1.442695, %v4746_v14  ;;  %v4747_v15 = vsub.f32 0.0, %v5825_v39 }
 0xdf7   :  { %v4758_v57 = vmul.f32 1.442695, %v4756_v11  ;;  %v4757_v16 = vsub.f32 0.0, %v5826_v54  ;;  %v4769_v34 = vsub.f32 0.0, %v5858_v55  ;;  %v4770_v61 = vmul.f32 1.442695, %v4768_v45 }
 0xdf8   :  { %6666 = vpow2.f32 %v4748_v42  ;;  %v4750_v37 = vmul.f32 1.442695, %v4747_v15 }
 0xdf9   :  { %6668 = vpow2.f32 %v4758_v57  ;;  %v4760_v50 = vmul.f32 1.442695, %v4757_v16  ;;  %v4772_v23 = vmul.f32 1.442695, %v4769_v34 }
 0xdfa   :  { %6670 = vpow2.f32 %v4750_v37 }
 0xdfb   :  { %6672 = vpow2.f32 %v4760_v50 }
 0xdfc   :  { %6674 = vtanh.f32 %v5855_v28 }
 0xdfd   :  { %6676 = vpow2.f32 %v4770_v61 }
 0xdfe   :  { %6678 = vpow2.f32 %v4772_v23 }
 0xe02   :  { %v6667_v48 = vpop.eup %6666 }
 0xe03   :  { %v6669_v1 = vpop.eup %6668  ;;  %v4752_v60 = vadd.f32 1.0, %v6667_v48 }
 0xe04   :  { %v4762_v14 = vadd.f32 1.0, %v6669_v1  ;;  %v6671_v39 = vpop.eup %6670 }
 0xe05   :  { %6680 = vrcp.f32 %v4752_v60  ;;  %v6673_v9 = vpop.eup %6672  ;;  %v4753_v56 = vadd.f32 1.0, %v6671_v39 }
 0xe06   :  { %6682 = vrcp.f32 %v4762_v14  ;;  %v4763_v11 = vadd.f32 1.0, %v6673_v9  ;;  %v6675_v3 = vpop.eup %6674 }
 0xe07   :  { %6684 = vtanh.f32 %v5857_v5  ;;  %v6677_v54 = vpop.eup %6676 }
 0xe08   :  { %6686 = vrcp.f32 %v4753_v56  ;;  %v6679_v42 = vpop.eup %6678  ;;  %v4774_v37 = vadd.f32 1.0, %v6677_v54 }
 0xe09   :  { %6688 = vrcp.f32 %v4763_v11  ;;  %v4775_v28 = vadd.f32 1.0, %v6679_v42 }
 0xe0a   :  { %6690 = vrcp.f32 %v4774_v37 }
 0xe0f   :  { %v6681_v15 = vpop.eup %6680 }
 0xe10   :  { %v6683_v57 = vpop.eup %6682  ;;  %v4780_v2 = vmul.f32 %v6681_v15, %v6675_v3 }
 0xe11   :  { %v6685_v16 = vpop.eup %6684  ;;  %v4778_v31 = vmul.f32 %v6683_v57, %v8002_v58 }
 0xe12   :  { %v6687_v55 = vpop.eup %6686 }
 0xe13   :  { %v6689_v50 = vpop.eup %6688  ;;  %v8112_v45 = vadd.f32 %v4780_v2, %v4778_v31  ;;  %v4781_v34 = vmul.f32 %v6687_v55, %v6685_v16 }
 0xe14   :  { %v4779_v61 = vmul.f32 %v6689_v50, %v8006_v25  ;;  %v6691_v48 = vpop.eup %6690 }
 0xe15   :  { %6692 = vtanh.f32 %v8112_v45 }
 0xe16   :  { %v8116_v23 = vadd.f32 %v4781_v34, %v4779_v61  ;;  %6694 = vrcp.f32 %v4775_v28 }
 0xe18   :  { %6696 = vtanh.f32 %v8116_v23 }
 0xe1f   :  { %v6693_v1 = vpop.eup %6692 }
 0xe20   :  { %v6695_v58 = vpop.eup %6694  ;;  %v4786_v5 = vmul.f32 %v6693_v1, %v6691_v48 }
 0xe22   :  { %v6697_v60 = vpop.eup %6696 }
 0xe23   :  { %v4787_v14 = vmul.f32 %v6697_v60, %v6695_v58 }
 0xe25   :  { %v4796_v39 = vpack.c.bf16 %v4787_v14, %v4786_v5 }
 0xe27   :  { %4830 = vmatmul.mubr.bf16.vlgmr.msra.gmra.mrb[52].mxu0 %v4796_v39  ;;  %4873 = vmatmul.mubr.bf16.vlgmr.msra.gmra.mrb[52].mxu1 %v4796_v39 }
 0xe28   :  { %4943 = vmatpush1.bf16.msra.mxu0 %v8009_v63  ;;  %4986 = vmatpush1.bf16.msra.mxu1 %v8012_v41 }
 0xe29   :  { %4944 = vmatprep.subr.bf16.mxu0 %v8015_v22  ;;  %4987 = vmatprep.subr.bf16.mxu1 %v8018_v4 }
 0xe2a   :  { %4974 = vmatprep.mubr.bf16.mxu0 %v6926_v0  ;;  %5017 = vmatprep.mubr.bf16.mxu1 %v6926_v0 }
 0xe2c   :  { %4945 = vmatpush1.bf16.msra.mxu0 %v8023_v29  ;;  %4988 = vmatpush1.bf16.msra.mxu1 %v8026_v13 }
 0xe2d   :  { %4946 = vmatprep.subr.bf16.mxu0 %v8029_v36  ;;  %4989 = vmatprep.subr.bf16.mxu1 %v8032_v38 }
 0xe30   :  { %4947 = vmatpush1.bf16.msra.mxu0 %v8035_v40  ;;  %4990 = vmatpush1.bf16.msra.mxu1 %v8038_v8 }
 0xe31   :  { %4948 = vmatprep.subr.bf16.mxu0 %v8041_v53  ;;  %4991 = vmatprep.subr.bf16.mxu1 %v8044_v32 }
 0xe34   :  { %4949 = vmatpush1.bf16.msra.mxu0 %v8047_v19  ;;  %4992 = vmatpush1.bf16.msra.mxu1 %v8050_v49 }
 0xe35   :  { %4950 = vmatprep.subr.bf16.mxu0 %v8053_v35  ;;  %4993 = vmatprep.subr.bf16.mxu1 %v8056_v17 }
 0xe38   :  { %4951 = vmatpush1.bf16.msra.mxu0 %v8059_v43  ;;  %4994 = vmatpush1.bf16.msra.mxu1 %v8062_v52 }
 0xe39   :  { %4952 = vmatprep.subr.bf16.mxu0 %v8065_v6  ;;  %4995 = vmatprep.subr.bf16.mxu1 %v8068_v7 }
 0xe3c   :  { %4953 = vmatpush1.bf16.msra.mxu0 %v8071_v26  ;;  %4996 = vmatpush1.bf16.msra.mxu1 %v8074_v10 }
 0xe3d   :  { %4954 = vmatprep.subr.bf16.mxu0 %v8077_v20  ;;  %4997 = vmatprep.subr.bf16.mxu1 %v8080_v44 }
 0xe40   :  { %4955 = vmatpush1.bf16.msra.mxu0 %v8083_v18  ;;  %4998 = vmatpush1.bf16.msra.mxu1 %v8086_v21 }
 0xe41   :  { %4956 = vmatprep.subr.bf16.mxu0 %v8089_v12  ;;  %4999 = vmatprep.subr.bf16.mxu1 %v8092_v47 }
 0xe44   :  { %4957 = vmatpush1.bf16.msra.mxu0 %v8095_v30  ;;  %5000 = vmatpush1.bf16.msra.mxu1 %v8098_v24 }
 0xe45   :  { %5087 = vmatprep.subr.bf16.mxu0 %v7987_v62  ;;  %5130 = vmatprep.subr.bf16.mxu1 %v7990_v27 }
 0xefa   :  { %v4831_v25 = vpop.f32.mrb[52].mxu0  ;;  %v4874_v9 = vpop.f32.mrb[52].mxu1 }
 0xefb   :  { %v5827_v56 = vadd.f32 %v4831_v25, %v7827_v46  ;;  %v4833_v11 = vpop.f32.mrb[53].mxu0  ;;  %v4876_v3 = vpop.f32.mrb[53].mxu1  ;;  %v5859_v5 = vadd.f32 %v4874_v9, %v7845_v33 }
 0xefc   :  { %v5828_v54 = vadd.f32 %v4833_v11, %v7831_v51  ;;  %v4835_v42 = vpop.f32.mrb[54].mxu0  ;;  %v4878_v15 = vpop.f32.mrb[54].mxu1  ;;  %v5860_v34 = vadd.f32 %v4876_v3, %v7837_v59 }
 0xefd   :  { %v4891_v57 = vsub.f32 0.0, %v5827_v56  ;;  %v5829_v2 = vadd.f32 %v4835_v42, %v7827_v46  ;;  %v4837_v16 = vpop.f32.mrb[55].mxu0  ;;  %v4880_v31 = vpop.f32.mrb[55].mxu1  ;;  %v5861_v3 = vadd.f32 %v4878_v15, %v7845_v33 }
 0xefe   :  { %v4901_v37 = vsub.f32 0.0, %v5828_v54  ;;  %v5830_v62 = vadd.f32 %v4837_v16, %v7831_v51  ;;  %v5862_v48 = vadd.f32 %v4880_v31, %v7837_v59  ;;  %v4913_v58 = vsub.f32 0.0, %v5860_v34 }
 0xeff   :  { %v4893_v55 = vmul.f32 1.442695, %v4891_v57  ;;  %v4892_v27 = vsub.f32 0.0, %v5829_v2 }
 0xf00   :  { %v4903_v50 = vmul.f32 1.442695, %v4901_v37  ;;  %v4902_v28 = vsub.f32 0.0, %v5830_v62  ;;  %v4914_v60 = vsub.f32 0.0, %v5862_v48  ;;  %v4915_v14 = vmul.f32 1.442695, %v4913_v58 }
 0xf01   :  { %6698 = vpow2.f32 %v4893_v55  ;;  %v4895_v61 = vmul.f32 1.442695, %v4892_v27 }
 0xf02   :  { %6700 = vpow2.f32 %v4903_v50  ;;  %v4905_v1 = vmul.f32 1.442695, %v4902_v28  ;;  %v4917_v39 = vmul.f32 1.442695, %v4914_v60 }
 0xf03   :  { %6702 = vpow2.f32 %v4895_v61 }
 0xf04   :  { %6704 = vpow2.f32 %v4905_v1 }
 0xf05   :  { %6706 = vtanh.f32 %v5859_v5 }
 0xf06   :  { %6708 = vpow2.f32 %v4915_v14 }
 0xf07   :  { %6710 = vpow2.f32 %v4917_v39 }
 0xf0b   :  { %v6699_v25 = vpop.eup %6698 }
 0xf0c   :  { %v6701_v56 = vpop.eup %6700  ;;  %v4897_v11 = vadd.f32 1.0, %v6699_v25 }
 0xf0d   :  { %v4907_v54 = vadd.f32 1.0, %v6701_v56  ;;  %v6703_v42 = vpop.eup %6702 }
 0xf0e   :  { %6712 = vrcp.f32 %v4897_v11  ;;  %v6705_v57 = vpop.eup %6704  ;;  %v4898_v2 = vadd.f32 1.0, %v6703_v42 }
 0xf0f   :  { %6714 = vrcp.f32 %v4907_v54  ;;  %v4908_v16 = vadd.f32 1.0, %v6705_v57  ;;  %v6707_v9 = vpop.eup %6706 }
 0xf10   :  { %6716 = vtanh.f32 %v5861_v3  ;;  %v6709_v31 = vpop.eup %6708 }
 0xf11   :  { %6718 = vrcp.f32 %v4898_v2  ;;  %v6711_v37 = vpop.eup %6710  ;;  %v4919_v34 = vadd.f32 1.0, %v6709_v31 }
 0xf12   :  { %6720 = vrcp.f32 %v4908_v16  ;;  %v4920_v58 = vadd.f32 1.0, %v6711_v37 }
 0xf13   :  { %6722 = vrcp.f32 %v4919_v34 }
 0xf18   :  { %v6713_v62 = vpop.eup %6712 }
 0xf19   :  { %v6715_v55 = vpop.eup %6714  ;;  %v4925_v27 = vmul.f32 %v6713_v62, %v6707_v9 }
 0xf1a   :  { %v6717_v50 = vpop.eup %6716  ;;  %v4923_v15 = vmul.f32 %v6715_v55, %v8112_v45 }
 0xf1b   :  { %v6719_v28 = vpop.eup %6718 }
 0xf1c   :  { %v6721_v61 = vpop.eup %6720  ;;  %v8162_v48 = vadd.f32 %v4925_v27, %v4923_v15  ;;  %v4926_v1 = vmul.f32 %v6719_v28, %v6717_v50 }
 0xf1d   :  { %v4924_v60 = vmul.f32 %v6721_v61, %v8116_v23  ;;  %v6723_v14 = vpop.eup %6722 }
 0xf1e   :  { %6724 = vtanh.f32 %v8162_v48 }
 0xf1f   :  { %v8166_v5 = vadd.f32 %v4926_v1, %v4924_v60  ;;  %6726 = vrcp.f32 %v4920_v58 }
 0xf21   :  { %6728 = vtanh.f32 %v8166_v5 }
 0xf28   :  { %v6725_v39 = vpop.eup %6724 }
 0xf29   :  { %v6727_v45 = vpop.eup %6726  ;;  %v4931_v56 = vmul.f32 %v6725_v39, %v6723_v14 }
 0xf2b   :  { %v6729_v25 = vpop.eup %6728 }
 0xf2c   :  { %v4932_v11 = vmul.f32 %v6729_v25, %v6727_v45 }
 0xf2e   :  { %v4941_v3 = vpack.c.bf16 %v4932_v11, %v4931_v56 }
 0xf30   :  { %4975 = vmatmul.mubr.bf16.vlgmr.msra.gmra.mrb[56].mxu0 %v4941_v3  ;;  %5018 = vmatmul.mubr.bf16.vlgmr.msra.gmra.mrb[56].mxu1 %v4941_v3 }
 0xf31   :  { %5088 = vmatpush1.bf16.msra.mxu0 %v8009_v63  ;;  %5131 = vmatpush1.bf16.msra.mxu1 %v8012_v41 }
 0xf32   :  { %5089 = vmatprep.subr.bf16.mxu0 %v8015_v22  ;;  %5132 = vmatprep.subr.bf16.mxu1 %v8018_v4 }
 0xf33   :  { %5119 = vmatprep.mubr.bf16.mxu0 %v6926_v0  ;;  %5162 = vmatprep.mubr.bf16.mxu1 %v6926_v0 }
 0xf35   :  { %5090 = vmatpush1.bf16.msra.mxu0 %v8023_v29  ;;  %5133 = vmatpush1.bf16.msra.mxu1 %v8026_v13 }
 0xf36   :  { %5091 = vmatprep.subr.bf16.mxu0 %v8029_v36  ;;  %5134 = vmatprep.subr.bf16.mxu1 %v8032_v38 }
 0xf39   :  { %5092 = vmatpush1.bf16.msra.mxu0 %v8035_v40  ;;  %5135 = vmatpush1.bf16.msra.mxu1 %v8038_v8 }
 0xf3a   :  { %5093 = vmatprep.subr.bf16.mxu0 %v8041_v53  ;;  %5136 = vmatprep.subr.bf16.mxu1 %v8044_v32 }
 0xf3d   :  { %5094 = vmatpush1.bf16.msra.mxu0 %v8047_v19  ;;  %5137 = vmatpush1.bf16.msra.mxu1 %v8050_v49 }
 0xf3e   :  { %5095 = vmatprep.subr.bf16.mxu0 %v8053_v35  ;;  %5138 = vmatprep.subr.bf16.mxu1 %v8056_v17 }
 0xf41   :  { %5096 = vmatpush1.bf16.msra.mxu0 %v8059_v43  ;;  %5139 = vmatpush1.bf16.msra.mxu1 %v8062_v52 }
 0xf42   :  { %5097 = vmatprep.subr.bf16.mxu0 %v8065_v6  ;;  %5140 = vmatprep.subr.bf16.mxu1 %v8068_v7 }
 0xf45   :  { %5098 = vmatpush1.bf16.msra.mxu0 %v8071_v26  ;;  %5141 = vmatpush1.bf16.msra.mxu1 %v8074_v10 }
 0xf46   :  { %5099 = vmatprep.subr.bf16.mxu0 %v8077_v20  ;;  %5142 = vmatprep.subr.bf16.mxu1 %v8080_v44 }
 0xf49   :  { %5100 = vmatpush1.bf16.msra.mxu0 %v8083_v18  ;;  %5143 = vmatpush1.bf16.msra.mxu1 %v8086_v21 }
 0xf4a   :  { %5101 = vmatprep.subr.bf16.mxu0 %v8089_v12  ;;  %5144 = vmatprep.subr.bf16.mxu1 %v8092_v47 }
 0xf4d   :  { %5102 = vmatpush1.bf16.msra.mxu0 %v8095_v30  ;;  %5145 = vmatpush1.bf16.msra.mxu1 %v8098_v24 }
0x1003   :  { %v4976_v0 = vpop.f32.mrb[56].mxu0  ;;  %v5019_v63 = vpop.f32.mrb[56].mxu1 }
0x1004   :  { %v5831_v41 = vadd.f32 %v4976_v0, %v7827_v46  ;;  %v4978_v22 = vpop.f32.mrb[57].mxu0  ;;  %v5021_v4 = vpop.f32.mrb[57].mxu1  ;;  %v5863_v44 = vadd.f32 %v5019_v63, %v7845_v33  ;;  %v6927_v0 = vmov 0.0   ;;  %v6275_v63 = vld [vmem:[%s8267_s7 + $0x8] sm:$0xff]  }
0x1005   :  { %v5832_v29 = vadd.f32 %v4978_v22, %v7831_v51  ;;  %v4980_v13 = vpop.f32.mrb[58].mxu0  ;;  %v5023_v36 = vpop.f32.mrb[58].mxu1  ;;  %v5864_v43 = vadd.f32 %v5021_v4, %v7837_v59  ;;  %5723 = vmatprep.subr.bf16.mxu0 %v6927_v0  ;;  %v6277_v22 = vld [vmem:[%s8267_s7 + $0x18] sm:$0xff]   ;;  %v6278_v4 = vld [vmem:[%s8267_s7 + $0x20] sm:$0xff]  }
0x1006   :  { %v5036_v38 = vsub.f32 0.0, %v5831_v41  ;;  %v5833_v40 = vadd.f32 %v4980_v13, %v7827_v46  ;;  %v4982_v8 = vpop.f32.mrb[59].mxu0  ;;  %v5025_v53 = vpop.f32.mrb[59].mxu1  ;;  %v5865_v24 = vadd.f32 %v5023_v36, %v7845_v33  ;;  %v6276_v41 = vld [vmem:[%s8267_s7 + $0x10] sm:$0xff]   ;;  %v6281_v36 = vld [vmem:[%s8267_s7 + $0x38] sm:$0xff]  }
0x1007   :  { %v5046_v32 = vsub.f32 0.0, %v5832_v29  ;;  %v5834_v19 = vadd.f32 %v4982_v8, %v7831_v51  ;;  %v5866_v7 = vadd.f32 %v5025_v53, %v7837_v59  ;;  %v5058_v10 = vsub.f32 0.0, %v5864_v43  ;;  %v6279_v29 = vld [vmem:[%s8267_s7 + $0x28] sm:$0xff]   ;;  %v6280_v13 = vld [vmem:[%s8267_s7 + $0x30] sm:$0xff]  }
0x1008   :  { %v5038_v49 = vmul.f32 1.442695, %v5036_v38  ;;  %v5037_v35 = vsub.f32 0.0, %v5833_v40 }
0x1009   :  { %v5048_v17 = vmul.f32 1.442695, %v5046_v32  ;;  %v5047_v52 = vsub.f32 0.0, %v5834_v19  ;;  %v5059_v20 = vsub.f32 0.0, %v5866_v7  ;;  %v5060_v18 = vmul.f32 1.442695, %v5058_v10 }
0x100a   :  { %6730 = vpow2.f32 %v5038_v49  ;;  %v5040_v6 = vmul.f32 1.442695, %v5037_v35 }
0x100b   :  { %6732 = vpow2.f32 %v5048_v17  ;;  %v5050_v26 = vmul.f32 1.442695, %v5047_v52  ;;  %v5062_v21 = vmul.f32 1.442695, %v5059_v20 }
0x100c   :  { %6734 = vpow2.f32 %v5040_v6 }
0x100d   :  { %6736 = vpow2.f32 %v5050_v26 }
0x100e   :  { %6738 = vtanh.f32 %v5863_v44 }
0x100f   :  { %6740 = vpow2.f32 %v5060_v18 }
0x1010   :  { %6742 = vpow2.f32 %v5062_v21 }
0x1014   :  { %v6731_v12 = vpop.eup %6730 }
0x1015   :  { %v6733_v47 = vpop.eup %6732  ;;  %v5042_v30 = vadd.f32 1.0, %v6731_v12 }
0x1016   :  { %v5052_v23 = vadd.f32 1.0, %v6733_v47  ;;  %v6735_v54 = vpop.eup %6734 }
0x1017   :  { %6744 = vrcp.f32 %v5042_v30  ;;  %v6737_v42 = vpop.eup %6736  ;;  %v5043_v57 = vadd.f32 1.0, %v6735_v54 }
0x1018   :  { %6746 = vrcp.f32 %v5052_v23  ;;  %v5053_v2 = vadd.f32 1.0, %v6737_v42  ;;  %v6739_v16 = vpop.eup %6738 }
0x1019   :  { %6748 = vtanh.f32 %v5865_v24  ;;  %v6741_v9 = vpop.eup %6740 }
0x101a   :  { %6750 = vrcp.f32 %v5043_v57  ;;  %v6743_v31 = vpop.eup %6742  ;;  %v5064_v15 = vadd.f32 1.0, %v6741_v9 }
0x101b   :  { %6752 = vrcp.f32 %v5053_v2  ;;  %v5065_v58 = vadd.f32 1.0, %v6743_v31 }
0x101c   :  { %6754 = vrcp.f32 %v5064_v15 }
0x1021   :  { %v6745_v37 = vpop.eup %6744 }
0x1022   :  { %v6747_v62 = vpop.eup %6746  ;;  %v5070_v55 = vmul.f32 %v6745_v37, %v6739_v16 }
0x1023   :  { %v6749_v27 = vpop.eup %6748  ;;  %v5068_v50 = vmul.f32 %v6747_v62, %v8162_v48 }
0x1024   :  { %v6751_v34 = vpop.eup %6750 }
0x1025   :  { %v6753_v28 = vpop.eup %6752  ;;  %v8210_v61 = vadd.f32 %v5070_v55, %v5068_v50  ;;  %v5071_v1 = vmul.f32 %v6751_v34, %v6749_v27 }
0x1026   :  { %v5069_v60 = vmul.f32 %v6753_v28, %v8166_v5  ;;  %v6755_v39 = vpop.eup %6754  ;;  %v6274_v5 = vld [vmem:[%s8267_s7] sm:$0xff]  }
0x1027   :  { %6756 = vtanh.f32 %v8210_v61 }
0x1028   :  { %v8214_v14 = vadd.f32 %v5071_v1, %v5069_v60  ;;  %6758 = vrcp.f32 %v5065_v58 }
0x102a   :  { %6760 = vtanh.f32 %v8214_v14 }
0x1031   :  { %v6757_v45 = vpop.eup %6756 }
0x1032   :  { %v6759_v48 = vpop.eup %6758  ;;  %v5076_v56 = vmul.f32 %v6757_v45, %v6755_v39 }
0x1034   :  { %v6761_v25 = vpop.eup %6760 }
0x1035   :  { %v5077_v11 = vmul.f32 %v6761_v25, %v6759_v48 }
0x1037   :  { %v5086_v3 = vpack.c.bf16 %v5077_v11, %v5076_v56 }
0x1039   :  { %5120 = vmatmul.mubr.bf16.vlgmr.msra.gmra.mrb[60].mxu0 %v5086_v3  ;;  %5163 = vmatmul.mubr.bf16.vlgmr.msra.gmra.mrb[60].mxu1 %v5086_v3 }
0x103a   :  { %5724 = vmatpush3.bf16.msra.mxu0 %v6274_v5  ;;  %5739 = vmatprep.mubr.msk.bf16.mxu0 %vm6928_vm0, %v6927_v0 }
0x103b   :  { %5725 = vmatprep.subr.bf16.mxu0 %v6927_v0 }
0x103e   :  { %5726 = vmatpush3.bf16.msra.mxu0 %v6275_v63 }
0x103f   :  { %5727 = vmatprep.subr.bf16.mxu0 %v6927_v0 }
0x1042   :  { %5728 = vmatpush3.bf16.msra.mxu0 %v6276_v41 }
0x1043   :  { %5729 = vmatprep.subr.bf16.mxu0 %v6927_v0 }
0x1046   :  { %5730 = vmatpush3.bf16.msra.mxu0 %v6277_v22 }
0x1047   :  { %5731 = vmatprep.subr.bf16.mxu0 %v6927_v0 }
0x104a   :  { %5732 = vmatpush3.bf16.msra.mxu0 %v6278_v4 }
0x104b   :  { %5733 = vmatprep.subr.bf16.mxu0 %v6927_v0 }
0x104e   :  { %5734 = vmatpush3.bf16.msra.mxu0 %v6279_v29 }
0x104f   :  { %5735 = vmatprep.subr.bf16.mxu0 %v6927_v0 }
0x1052   :  { %5736 = vmatpush3.bf16.msra.mxu0 %v6280_v13 }
0x1053   :  { %5737 = vmatprep.subr.bf16.mxu0 %v6927_v0 }
0x1056   :  { %5738 = vmatpush3.bf16.msra.mxu0 %v6281_v36 }
0x110c   :  { %v5121_v38 = vpop.f32.mrb[60].mxu0  ;;  %v5164_v40 = vpop.f32.mrb[60].mxu1 }
0x110d   :  { %v5835_v8 = vadd.f32 %v5121_v38, %v7827_v46  ;;  %v5123_v53 = vpop.f32.mrb[61].mxu0  ;;  %v5166_v32 = vpop.f32.mrb[61].mxu1  ;;  %v5867_v23 = vadd.f32 %v5164_v40, %v7845_v33 }
0x110e   :  { %v5836_v19 = vadd.f32 %v5123_v53, %v7831_v51  ;;  %v5125_v49 = vpop.f32.mrb[62].mxu0  ;;  %v5168_v35 = vpop.f32.mrb[62].mxu1  ;;  %v5868_v18 = vadd.f32 %v5166_v32, %v7837_v59 }
0x110f   :  { %v5181_v17 = vsub.f32 0.0, %v5835_v8  ;;  %v5837_v43 = vadd.f32 %v5125_v49, %v7827_v46  ;;  %v5127_v52 = vpop.f32.mrb[63].mxu0  ;;  %v5170_v6 = vpop.f32.mrb[63].mxu1  ;;  %v5869_v16 = vadd.f32 %v5168_v35, %v7845_v33 }
0x1110   :  { %v5191_v7 = vsub.f32 0.0, %v5836_v19  ;;  %v5838_v26 = vadd.f32 %v5127_v52, %v7831_v51  ;;  %v5870_v47 = vadd.f32 %v5170_v6, %v7837_v59  ;;  %v5203_v24 = vsub.f32 0.0, %v5868_v18 }
0x1111   :  { %v5183_v10 = vmul.f32 1.442695, %v5181_v17  ;;  %v5182_v20 = vsub.f32 0.0, %v5837_v43 }
0x1112   :  { %v5193_v44 = vmul.f32 1.442695, %v5191_v7  ;;  %v5192_v21 = vsub.f32 0.0, %v5838_v26  ;;  %v5204_v46 = vsub.f32 0.0, %v5870_v47  ;;  %v5205_v54 = vmul.f32 1.442695, %v5203_v24 }
0x1113   :  { %6762 = vpow2.f32 %v5183_v10  ;;  %v5185_v12 = vmul.f32 1.442695, %v5182_v20 }
0x1114   :  { %6764 = vpow2.f32 %v5193_v44  ;;  %v5195_v30 = vmul.f32 1.442695, %v5192_v21  ;;  %v5207_v51 = vmul.f32 1.442695, %v5204_v46 }
0x1115   :  { %6766 = vpow2.f32 %v5185_v12 }
0x1116   :  { %6768 = vpow2.f32 %v5195_v30 }
0x1117   :  { %6770 = vtanh.f32 %v5867_v23 }
0x1118   :  { %6772 = vpow2.f32 %v5205_v54 }
0x1119   :  { %6774 = vpow2.f32 %v5207_v51 }
0x111d   :  { %v6763_v42 = vpop.eup %6762 }
0x111e   :  { %v6765_v57 = vpop.eup %6764  ;;  %v5187_v2 = vadd.f32 1.0, %v6763_v42 }
0x111f   :  { %v5197_v9 = vadd.f32 1.0, %v6765_v57  ;;  %v6767_v59 = vpop.eup %6766 }
0x1120   :  { %6776 = vrcp.f32 %v5187_v2  ;;  %v6769_v31 = vpop.eup %6768  ;;  %v5188_v37 = vadd.f32 1.0, %v6767_v59 }
0x1121   :  { %6778 = vrcp.f32 %v5197_v9  ;;  %v5198_v62 = vadd.f32 1.0, %v6769_v31  ;;  %v6771_v55 = vpop.eup %6770 }
0x1122   :  { %6780 = vtanh.f32 %v5869_v16  ;;  %v6773_v27 = vpop.eup %6772 }
0x1123   :  { %6782 = vrcp.f32 %v5188_v37  ;;  %v6775_v50 = vpop.eup %6774  ;;  %v5209_v1 = vadd.f32 1.0, %v6773_v27 }
0x1124   :  { %6784 = vrcp.f32 %v5198_v62  ;;  %v5210_v25 = vadd.f32 1.0, %v6775_v50 }
0x1125   :  { %6786 = vrcp.f32 %v5209_v1 }
0x112a   :  { %v6777_v15 = vpop.eup %6776 }
0x112b   :  { %v6779_v34 = vpop.eup %6778  ;;  %v5215_v28 = vmul.f32 %v6777_v15, %v6771_v55 }
0x112c   :  { %v6781_v58 = vpop.eup %6780  ;;  %v5213_v33 = vmul.f32 %v6779_v34, %v8210_v61  ;;  %v5705_v61 = vld [vmem:[%s8268_s8] ss:$0 sm:$0xff] }
0x112d   :  { %v6783_v60 = vpop.eup %6782 }
0x112e   :  { %v6785_v39 = vpop.eup %6784  ;;  %v5217_v45 = vadd.f32 %v5215_v28, %v5213_v33  ;;  %v5216_v48 = vmul.f32 %v6783_v60, %v6781_v58 }
0x112f   :  { %v5214_v56 = vmul.f32 %v6785_v39, %v8214_v14  ;;  %v6787_v3 = vpop.eup %6786 }
0x1130   :  { %6788 = vtanh.f32 %v5217_v45 }
0x1131   :  { %v5218_v11 = vadd.f32 %v5216_v48, %v5214_v56  ;;  %6790 = vrcp.f32 %v5210_v25 }
0x1133   :  { %6792 = vtanh.f32 %v5218_v11 }
0x113a   :  { %v6789_v5 = vpop.eup %6788 }
0x113b   :  { %v5221_v0 = vmul.f32 %v6789_v5, %v6787_v3  ;;  %v6791_v63 = vpop.eup %6790 }
0x113d   :  { %v6793_v41 = vpop.eup %6792 }
0x113e   :  { %v5222_v22 = vmul.f32 %v6793_v41, %v6791_v63 }
0x1140   :  { %v5223_v4 = vpack.c.bf16 %v5222_v22, %v5221_v0 }
0x1142   :  { %5740 = vmatmul.mubr.bf16.vlgmr.msra.gmra.mrb[64].mxu0 %v5223_v4 }
0x1215   :  { %v5329_v29 = vpop.f32.mrb[64].mxu0 }
0x1216   :  { %v5330_v13 = vadd.f32 %v5705_v61, %v5329_v29  ;;  %v5741_v36 = vpop.f32.mrb[65].mxu0 }
0x1217   :  { %v5332_v14 = vpop.f32.mrb[66].mxu0 }
0x1218   :  { %5336 = vst [vmem:[%s8269_s9] sm:$0xff] %v5330_v13  ;;  %v5333_v38 = vadd.f32 %v5705_v61, %v5332_v14  ;;  %v5742_v40 = vpop.f32.mrb[67].mxu0 }
0x121a   :  { %5337 = vst [vmem:[%s8269_s9 + $0x8] sm:$0xff] %v5333_v38 }
0x121b   :  { %5342 = vsyncpa [#allocation5], 1 }
0x121c   :  { %5343 = vsyncpa [#allocation7], 1 }
0x121d   :  { %5344 = vsyncpa [#allocation10], 1 }

</bundles_post_ra>
